<compile_context>
chip_gen: v7x
topology: tpu7x:2x2x1
jax: 0.10.0
libtpu: 0.0.40
codegen_flags: <defaults>
</compile_context>

<pallas_src>
import functools

import numpy as np
import jax
import jax.numpy as jnp
from jax.experimental import pallas as pl
from jax.experimental.pallas import tpu as pltpu

NUM_NONTRIVIAL_IRREPS = 3   # SO(2) irreps of frequency 1..3, each 2-dimensional


def _round_up(v, m):
    return ((v + m - 1) // m) * m


# ---------------------------------------------------------------------------
# Pallas kernel: fused R2Conv(ks x ks) + ELU(trivial) + GatedNonLinearity1
# ---------------------------------------------------------------------------
def so2_conv_gate_kernel(x_ref, w_ref, b_ref, g_ref, o_ref, *, ks, wq, tr, c, halo):
    """x_ref : (1, flat_len, Cin)       bf16  padded, width-flattened input (one batch)
       w_ref : (ks*ks*Cin, ncat_pad)    bf16  fused conv weights, cols = [trivial|gated|gates|0pad]
       b_ref : (1, ncat_pad)            f32   bias (zero on gated / pad columns)
       g_ref : (3c, 6c)                 bf16  0/1 selector: gate k -> gated channels 2k, 2k+1
       o_ref : (1, tr*wq, 7c)           bf16  output rows (wq incl. garbage right-pad columns)
    """
    trwq = tr * wq
    n_head = 7 * c
    n_gates = NUM_NONTRIVIAL_IRREPS * c
    base = pl.multiple_of(pl.program_id(1) * trwq, 16)

    # One 16-aligned dynamic load of this tile's rows (+ conv halo); every tap reuses it.
    slab = x_ref[0, pl.ds(base, trwq + halo), :]                       # (trwq+halo, Cin) bf16
    # Fold all ks*ks taps into the contraction dim -> a single deep MXU matmul.
    lhs = jnp.concatenate(
        [slab[dy * wq + dx:dy * wq + dx + trwq, :]
         for dy in range(ks) for dx in range(ks)],
        axis=-1)                                                        # (trwq, ks*ks*Cin) bf16
    acc = jnp.dot(lhs, w_ref[...], preferred_element_type=jnp.float32) + b_ref[...]

    triv = acc[:, :c]                                                   # trivial channels
    gated = acc[:, c:n_head]                                            # 3c gated fields (6c ch)
    # Transcendentals only where needed: sigmoid on 3c gate channels, exp on c trivial channels.
    sig = jax.nn.sigmoid(acc[:, n_head:n_head + n_gates])               # (trwq, 3c)
    # Tiny 0/1 selector dot interleave-expands gate k onto channels 2k, 2k+1.
    mult = jnp.dot(sig.astype(jnp.bfloat16), g_ref[...],
                   preferred_element_type=jnp.float32)                  # (trwq, 6c)
    # TODO(synk): switch to expm1 once Mosaic lowering is confirmed; exp-1 is within tolerance.
    elu = jnp.where(triv > 0.0, triv, jnp.exp(triv) - 1.0)              # ELU, alpha = 1
    o_ref[0] = jnp.concatenate([elu, gated * mult], axis=-1).astype(o_ref.dtype)


# ---------------------------------------------------------------------------
# Parameters (deterministic, synthetic weights of the correct shapes)
# ---------------------------------------------------------------------------
def make_params(in_channels, out_channel, kernel_size=3, padding=1, stride=1,
                key=None):
    if key is None:
        key = jax.random.PRNGKey(42)
    c = out_channel
    i = NUM_NONTRIVIAL_IRREPS
    n_gates, n_gated = i * c, 2 * i * c          # 3c gate channels, 6c gated channels
    n_head = c + n_gated                         # 7c output channels of the module
    ncat = n_head + n_gates                      # 10c conv channels [trivial|gated|gates]
    ncat_pad = _round_up(ncat, 128)              # lane-full MXU output columns
    kk = kernel_size * kernel_size
    k1, k2 = jax.random.split(key)
    # Logical weights (kk, Cin, ncat) shared by kernel and reference (bf16).
    w_log = (jax.random.normal(k1, (kk, in_channels, ncat), jnp.float32)
             / np.sqrt(kk * in_channels)).astype(jnp.bfloat16)
    # Kernel weights: taps folded into K, columns zero-padded to ncat_pad.
    w_k = jnp.zeros((kk * in_channels, ncat_pad), jnp.bfloat16)
    w_k = w_k.at[:, :ncat].set(w_log.reshape(kk * in_channels, ncat))
    # R2Conv bias only on trivial-irrep output channels (trivial block + gate block).
    bvals = 0.05 * jax.random.normal(k2, (c + n_gates,), jnp.float32)
    b = jnp.zeros((ncat_pad,), jnp.float32)
    b = b.at[:c].set(bvals[:c]).at[n_head:ncat].set(bvals[c:])
    # gate k drives gated field k (irrep_{1+k//c}, copy k%c) -> gated channels 2k, 2k+1.
    gsel = np.zeros((n_gates, n_gated), np.float32)
    for k in range(n_gates):
        gsel[k, 2 * k] = 1.0
        gsel[k, 2 * k + 1] = 1.0
    return dict(w=w_k, b=b.reshape(1, ncat_pad), gsel=jnp.asarray(gsel, jnp.bfloat16),
                w_log=w_log, c=c, ks=kernel_size, padding=padding, stride=stride,
                ncat=ncat, n_head=n_head)


# ---------------------------------------------------------------------------
# Wrapper
# ---------------------------------------------------------------------------
def equivariant_so2_layer_forward(x_nchw, params):
    ks, pad, stride, c = params["ks"], params["padding"], params["stride"], params["c"]
    w, b, gsel = params["w"], params["b"], params["gsel"]
    n_head = params["n_head"]
    K, ncat_pad = w.shape
    bsz, cin, h, wdt = x_nchw.shape

    x = jnp.transpose(x_nchw, (0, 2, 3, 1)).astype(jnp.bfloat16)        # NCHW -> NHWC (bf16)
    x = jnp.pad(x, ((0, 0), (pad, pad), (pad, pad), (0, 0)))
    hp, wp = h + 2 * pad, wdt + 2 * pad
    ho, wo = hp - ks + 1, wp - ks + 1                                    # dense (stride-1) output
    wq = _round_up(wp, 16)                                               # bf16-sublane-aligned width
    x = jnp.pad(x, ((0, 0), (0, 0), (0, wq - wp), (0, 0)))
    xf = x.reshape(bsz, hp * wq, cin)

    halo = _round_up((ks - 1) * wq + (ks - 1), 16)                       # tap over-read rows
    # Row tile: keep the (trwq, ncat_pad) f32 accumulator in the few-hundred-KiB range.
    cap_rows = max(wq, min(512, (384 * 1024) // max(1, ncat_pad * 4)))
    tr = max(1, min(ho, cap_rows // wq))
    nrt = -(-ho // tr)                                                   # ceil; last tile over-computes
    trwq = tr * wq
    flat_len = nrt * trwq + halo
    xf = jnp.pad(xf, ((0, 0), (0, flat_len - hp * wq), (0, 0)))          # bottom halo / tile pad

    # VMEM budget derived from actual buffer sizes (double-buffered in/out + intermediates).
    x_bytes = flat_len * cin * 2
    w_bytes = K * ncat_pad * 2 + ncat_pad * 4 + int(gsel.size) * 2
    o_bytes = trwq * n_head * 2
    interm = trwq * (ncat_pad * 4 + K * 2 + n_head * 4) + (trwq + halo) * cin * 2
    needed = 2 * (x_bytes + o_bytes + w_bytes) + interm
    try:
        vmem_cap = pltpu.get_tpu_info().vmem_capacity_bytes
    except Exception:
        vmem_cap = 64 * 1024 * 1024
    vmem_limit = int(min(max(needed + (8 << 20), 32 << 20), (vmem_cap * 3) // 4))

    out = pl.pallas_call(
        functools.partial(so2_conv_gate_kernel, ks=ks, wq=wq, tr=tr, c=c, halo=halo),
        out_shape=jax.ShapeDtypeStruct((bsz, nrt * trwq, n_head), jnp.bfloat16),
        grid=(bsz, nrt),
        in_specs=[
            pl.BlockSpec((1, flat_len, cin), lambda bi, ri: (bi, 0, 0)),
            pl.BlockSpec((K, ncat_pad), lambda bi, ri: (0, 0)),
            pl.BlockSpec((1, ncat_pad), lambda bi, ri: (0, 0)),
            pl.BlockSpec(gsel.shape, lambda bi, ri: (0, 0)),
        ],
        out_specs=pl.BlockSpec((1, trwq, n_head), lambda bi, ri: (bi, ri, 0)),
        compiler_params=pltpu.CompilerParams(
            dimension_semantics=("parallel", "parallel"),
            vmem_limit_bytes=vmem_limit),
    )(xf, w, b, gsel)

    out = out.reshape(bsz, nrt * tr, wq, n_head)[:, :ho, :wo, :]         # trim garbage rows/cols
    out = out.astype(jnp.float32)
    if stride > 1:
        # TODO(synk): stride > 1 is handled by dense conv + subsampling (overcompute).
        out = out[:, ::stride, ::stride, :]
    return jnp.transpose(out, (0, 3, 1, 2))                              # NHWC -> NCHW


# ---------------------------------------------------------------------------
# Pure-JAX reference (same synthetic weights, f32 math)
# ---------------------------------------------------------------------------
def reference_forward(x_nchw, params):
    ks, pad, stride, c = params["ks"], params["padding"], params["stride"], params["c"]
    w = params["w_log"].astype(jnp.float32)
    ncat, n_head = params["ncat"], params["n_head"]
    b = params["b"][0, :ncat]
    x = jnp.transpose(x_nchw, (0, 2, 3, 1)).astype(jnp.float32)
    x = jnp.pad(x, ((0, 0), (pad, pad), (pad, pad), (0, 0)))
    hp, wp = x.shape[1], x.shape[2]
    ho, wo = hp - ks + 1, wp - ks + 1
    acc = jnp.zeros((x.shape[0], ho, wo, ncat), jnp.float32)
    for dy in range(ks):
        for dx in range(ks):
            acc = acc + jnp.einsum("bhwc,cn->bhwn",
                                   x[:, dy:dy + ho, dx:dx + wo, :], w[dy * ks + dx],
                                   precision=jax.lax.Precision.HIGHEST)
    acc = acc + b
    triv, gated, gates = acc[..., :c], acc[..., c:n_head], acc[..., n_head:ncat]
    triv = jnp.where(triv > 0.0, triv, jnp.expm1(triv))
    out = jnp.concatenate(
        [triv, gated * jnp.repeat(jax.nn.sigmoid(gates), 2, axis=-1)], axis=-1)
    if stride > 1:
        out = out[:, ::stride, ::stride, :]
    return jnp.transpose(out, (0, 3, 1, 2))


if __name__ == "__main__":
    key = jax.random.PRNGKey(0)
    kp, kx = jax.random.split(key)
    batch, in_channels, h, w = 2, 4, 16, 16
    out_channel = 8
    params = make_params(in_channels, out_channel, kernel_size=3, padding=1,
                         stride=1, key=kp)
    x = jax.random.normal(kx, (batch, in_channels, h, w), jnp.float32)

    out = jax.block_until_ready(equivariant_so2_layer_forward(x, params))
    assert out.shape == (batch, 7 * out_channel, h, w), out.shape
    assert bool(jnp.all(jnp.isfinite(out)))

    ref = jax.block_until_ready(reference_forward(x, params))
    err = float(jnp.max(jnp.abs(out - ref)))
    assert err < 5e-2, f"max abs err vs reference: {err}"
    print("KERNEL_OK")
</pallas_src>

<mosaic_0001>
module attributes {stable_mosaic.version = 11 : i64} {
  func.func @so2_conv_gate_kernel(%arg0: i32, %arg1: i32, %arg2: memref<1x592x4xbf16, #tpu.memory_space<vmem>>, %arg3: memref<36x128xbf16, #tpu.memory_space<vmem>>, %arg4: memref<1x128xf32, #tpu.memory_space<vmem>>, %arg5: memref<24x48xbf16, #tpu.memory_space<vmem>>, %arg6: memref<1x512x56xbf16, #tpu.memory_space<vmem>>) attributes {dimension_semantics = [#tpu.dimension_semantics<parallel>, #tpu.dimension_semantics<parallel>], iteration_bounds = array<i64: 2, 1>, scalar_prefetch = 0 : i64, scratch_operands = 0 : i64, tpu.core_type = #tpu.core_type<tc>, window_params = [{transform_indices = @transform_0, window_bounds = array<i64: 1, 592, 4>}, {pipeline_mode = #tpu.pipeline_mode<synchronous>, transform_indices = @transform_1, window_bounds = array<i64: 36, 128>}, {pipeline_mode = #tpu.pipeline_mode<synchronous>, transform_indices = @transform_2, window_bounds = array<i64: 1, 128>}, {pipeline_mode = #tpu.pipeline_mode<synchronous>, transform_indices = @transform_3, window_bounds = array<i64: 24, 48>}, {transform_indices = @transform_4, window_bounds = array<i64: 1, 512, 56>}]} {
    %c512_i32 = arith.constant 512 : i32
    %0 = arith.muli %arg1, %c512_i32 : i32
    %1 = tpu.assume_multiple %0, 16 : i32
    %c0 = arith.constant 0 : index
    %2 = arith.index_cast %1 : i32 to index
    %c0_0 = arith.constant 0 : index
    %3 = vector.load %arg2[%c0, %2, %c0_0] : memref<1x592x4xbf16, #tpu.memory_space<vmem>>, vector<1x592x4xbf16>
    %4 = vector.shape_cast %3 : vector<1x592x4xbf16> to vector<592x4xbf16>
    %5 = vector.extract_strided_slice %4 {offsets = [0, 0], sizes = [512, 4], strides = [1, 1]} : vector<592x4xbf16> to vector<512x4xbf16>
    %6 = vector.extract_strided_slice %4 {offsets = [1, 0], sizes = [512, 4], strides = [1, 1]} : vector<592x4xbf16> to vector<512x4xbf16>
    %7 = vector.extract_strided_slice %4 {offsets = [2, 0], sizes = [512, 4], strides = [1, 1]} : vector<592x4xbf16> to vector<512x4xbf16>
    %8 = vector.extract_strided_slice %4 {offsets = [32, 0], sizes = [512, 4], strides = [1, 1]} : vector<592x4xbf16> to vector<512x4xbf16>
    %9 = vector.extract_strided_slice %4 {offsets = [33, 0], sizes = [512, 4], strides = [1, 1]} : vector<592x4xbf16> to vector<512x4xbf16>
    %10 = vector.extract_strided_slice %4 {offsets = [34, 0], sizes = [512, 4], strides = [1, 1]} : vector<592x4xbf16> to vector<512x4xbf16>
    %11 = vector.extract_strided_slice %4 {offsets = [64, 0], sizes = [512, 4], strides = [1, 1]} : vector<592x4xbf16> to vector<512x4xbf16>
    %12 = vector.extract_strided_slice %4 {offsets = [65, 0], sizes = [512, 4], strides = [1, 1]} : vector<592x4xbf16> to vector<512x4xbf16>
    %13 = vector.extract_strided_slice %4 {offsets = [66, 0], sizes = [512, 4], strides = [1, 1]} : vector<592x4xbf16> to vector<512x4xbf16>
    %14 = tpu.concatenate %5, %6, %7, %8, %9, %10, %11, %12, %13 in 1 : vector<512x4xbf16>, vector<512x4xbf16>, vector<512x4xbf16>, vector<512x4xbf16>, vector<512x4xbf16>, vector<512x4xbf16>, vector<512x4xbf16>, vector<512x4xbf16>, vector<512x4xbf16> -> vector<512x36xbf16>
    %c0_1 = arith.constant 0 : index
    %c0_2 = arith.constant 0 : index
    %15 = vector.load %arg3[%c0_1, %c0_2] : memref<36x128xbf16, #tpu.memory_space<vmem>>, vector<36x128xbf16>
    %cst = arith.constant dense<0.000000e+00> : vector<512x128xf32>
    %16 = tpu.matmul %14, %15, %cst {dimension_numbers = #tpu.dot_dimension_numbers<[1], [0], [0], [1], [0, 0, 1, 1], [], []>} : vector<512x36xbf16>, vector<36x128xbf16>, vector<512x128xf32> -> vector<512x128xf32>
    %c0_3 = arith.constant 0 : index
    %c0_4 = arith.constant 0 : index
    %17 = vector.load %arg4[%c0_3, %c0_4] : memref<1x128xf32, #tpu.memory_space<vmem>>, vector<1x128xf32>
    %18 = vector.broadcast %17 : vector<1x128xf32> to vector<512x128xf32>
    %19 = arith.addf %16, %18 : vector<512x128xf32>
    %20 = vector.extract_strided_slice %19 {offsets = [0, 0], sizes = [512, 8], strides = [1, 1]} : vector<512x128xf32> to vector<512x8xf32>
    %21 = vector.extract_strided_slice %19 {offsets = [0, 8], sizes = [512, 48], strides = [1, 1]} : vector<512x128xf32> to vector<512x48xf32>
    %22 = vector.extract_strided_slice %19 {offsets = [0, 56], sizes = [512, 24], strides = [1, 1]} : vector<512x128xf32> to vector<512x24xf32>
    %23 = arith.negf %22 : vector<512x24xf32>
    %24 = math.exp %23 : vector<512x24xf32>
    %cst_5 = arith.constant 1.000000e+00 : f32
    %25 = vector.broadcast %cst_5 : f32 to vector<512x24xf32>
    %26 = arith.addf %25, %24 : vector<512x24xf32>
    %27 = arith.divf %25, %26 : vector<512x24xf32>
    %28 = arith.truncf %27 : vector<512x24xf32> to vector<512x24xbf16>
    %c0_6 = arith.constant 0 : index
    %c0_7 = arith.constant 0 : index
    %29 = vector.load %arg5[%c0_6, %c0_7] : memref<24x48xbf16, #tpu.memory_space<vmem>>, vector<24x48xbf16>
    %cst_8 = arith.constant dense<0.000000e+00> : vector<512x48xf32>
    %30 = tpu.matmul %28, %29, %cst_8 {dimension_numbers = #tpu.dot_dimension_numbers<[1], [0], [0], [1], [0, 0, 1, 1], [], []>} : vector<512x24xbf16>, vector<24x48xbf16>, vector<512x48xf32> -> vector<512x48xf32>
    %cst_9 = arith.constant 0.000000e+00 : f32
    %31 = vector.broadcast %cst_9 : f32 to vector<512x8xf32>
    %32 = arith.cmpf ogt, %20, %31 : vector<512x8xf32>
    %33 = math.exp %20 : vector<512x8xf32>
    %cst_10 = arith.constant 1.000000e+00 : f32
    %34 = vector.broadcast %cst_10 : f32 to vector<512x8xf32>
    %35 = arith.subf %33, %34 : vector<512x8xf32>
    %36 = arith.select %32, %20, %35 : vector<512x8xi1>, vector<512x8xf32>
    %37 = arith.mulf %21, %30 : vector<512x48xf32>
    %38 = tpu.concatenate %36, %37 in 1 : vector<512x8xf32>, vector<512x48xf32> -> vector<512x56xf32>
    %39 = arith.truncf %38 : vector<512x56xf32> to vector<512x56xbf16>
    %c0_11 = arith.constant 0 : index
    %c0_12 = arith.constant 0 : index
    %c0_13 = arith.constant 0 : index
    %40 = vector.load %arg6[%c0_11, %c0_12, %c0_13] : memref<1x512x56xbf16, #tpu.memory_space<vmem>>, vector<1x512x56xbf16>
    %41 = vector.shape_cast %40 : vector<1x512x56xbf16> to vector<512x56xbf16>
    %42 = vector.shape_cast %39 : vector<512x56xbf16> to vector<1x512x56xbf16>
    tpu.vector_store %arg6[%c0_11, %c0_12, %c0_13], %42 {strides = array<i32>} : memref<1x512x56xbf16, #tpu.memory_space<vmem>>, vector<1x512x56xbf16>,
    return
  }
  func.func @transform_0(%arg0: i32, %arg1: i32) -> (i32, i32, i32) {
    %c0_i32 = arith.constant 0 : i32
    %c0_i32_0 = arith.constant 0 : i32
    %c0_i32_1 = arith.constant 0 : i32
    return %arg0, %c0_i32, %c0_i32_0 : i32, i32, i32
  }
  func.func @transform_1(%arg0: i32, %arg1: i32) -> (i32, i32) {
    %c0_i32 = arith.constant 0 : i32
    %c0_i32_0 = arith.constant 0 : i32
    %c0_i32_1 = arith.constant 0 : i32
    return %c0_i32, %c0_i32_0 : i32, i32
  }
  func.func @transform_2(%arg0: i32, %arg1: i32) -> (i32, i32) {
    %c0_i32 = arith.constant 0 : i32
    %c0_i32_0 = arith.constant 0 : i32
    %c0_i32_1 = arith.constant 0 : i32
    return %c0_i32, %c0_i32_0 : i32, i32
  }
  func.func @transform_3(%arg0: i32, %arg1: i32) -> (i32, i32) {
    %c0_i32 = arith.constant 0 : i32
    %c0_i32_0 = arith.constant 0 : i32
    %c0_i32_1 = arith.constant 0 : i32
    return %c0_i32, %c0_i32_0 : i32, i32
  }
  func.func @transform_4(%arg0: i32, %arg1: i32) -> (i32, i32, i32) {
    %c0_i32 = arith.constant 0 : i32
    %c0_i32_0 = arith.constant 0 : i32
    return %arg0, %arg1, %c0_i32 : i32, i32, i32
  }
}

</mosaic_0001>

<bundles_post_ra>
// kernel: tpu_custom_call.1
= control target key start
LH: loop header
LB: loop body
LE: loop exit
PB: predicated region body
PF: predicated region fallthrough
CT: control target
= control target key end

     0   :  { %s5420_s15 = smov 0   ;;  %s5422_s16 = smov 0   ;;  %s7695_s0 = inlined_call_operand.vmem [shape: bf16[2,592,4], index: 0, kind: input, shape index: {}]   ;;  %s7696_s1 = inlined_call_operand.vmem [shape: bf16[36,128], index: 1, kind: input, shape index: {}]   ;;  %s7697_s2 = inlined_call_operand.vmem [shape: f32[1,128], index: 2, kind: input, shape index: {}]   ;;  %s7698_s3 = inlined_call_operand.vmem [shape: bf16[24,48], index: 3, kind: input, shape index: {}]   ;;  %s7699_s4 = inlined_call_operand.vmem [shape: bf16[2,512,56], index: 4, kind: output, shape index: {}]  }
   0x1   :  { %s5424_s17 = smov 0  }
   0x2 LB: > { %s26_s18 = sadd.s32 1, %s5380_s16  ;;  %p4308_p0 = scmp.ge.s32.totalorder %s5384_s17, 1  ;;  %s5384_s17 = sphi %s5424_s17, %s14_s17   ;;  %s5380_s16 = sphi %s5422_s16, %s7809_s16   ;;  %s5376_s15 = sphi %s5420_s15, %s7808_s15  }
   0x3   : > { %p28_p1 = scmp.ge.s32.totalorder %s26_s18, 2  ;;  %p176_p2 = scmp.lt.s32.totalorder %s5384_s17, 3 }
   0x5   : > { %s7811_s18 = smov (%p28_p1, %s26_s18), 0  ;;  %p177_p3 = pnand %p4308_p0, %p176_p2 }
   0x7   : > { %180 = sbr.rel (%p177_p3) target bundleno = 1348 (0x544), region = 36 }
   0xe   : > { %p206_p4 = scmp.lt.s32.totalorder %s5376_s15, 1  ;;  %vm463_vm0 = vsmask.f32 7424  ;;  %vm788_vm1 = vcmask 1046528   ;;  %s5386_s23 = smov 12   ;;  %v4936_v43 = vld [vmem:[%s7696_s1] sm:$0xff]  }
   0xf   : > { %s5387_s24 = smov 20   ;;  %s5388_s25 = smov 8   ;;  %v4937_v44 = vld [vmem:[%s7696_s1 + $0x8] sm:$0xff]   ;;  %4749 = vmatprep.subr.bf16.mxu0 %v4936_v43  ;;  %v4938_v48 = vld [vmem:[%s7696_s1 + $0x10] ss:$0 sps:$4 sm:$0x33]  }
  0x10   : > { %s7813_s15 = smov (!%p206_p4, %s5376_s15), 1  ;;  %s5389_s26 = smov 4   ;;  %4750 = vmatpush3.bf16.msra.mxu0 %v4936_v43  ;;  %vm1990_vm2 = vcmask 1041408   ;;  %vm1378_vm3 = vcmask 31744   ;;  %vm1443_vm4 = vcmask 64512   ;;  %vm1508_vm5 = vcmask 97280  }
  0x11   : > { %s4889_s19 = smul.u32 296, %s7813_s15  ;;  %s5390_s5 = smov 16   ;;  %4751 = vmatprep.subr.bf16.mxu0 %v4937_v44  ;;  %v1992_v52 = vsel %vm1990_vm2, %v4938_v48, 0  ;;  %vm1573_vm6 = vcmask 130048   ;;  %vm1638_vm7 = vcmask 162816   ;;  %vm1703_vm8 = vcmask 195584  }
  0x12   : > { %s5391_s6 = smov 24   ;;  %s5392_s9 = smov 28   ;;  %vm1768_vm9 = vcmask 228352   ;;  %vm1833_vm10 = vcmask 261120   ;;  %vm1925_vm11 = vcmask 293888   ;;  %vm2903_vm12 = vcmask 1043456  }
  0x13   : > { %s5444_s22 = scalar_lea.vmem %s7695_s0, %s4889_s19  ;;  %s5393_s10 = smov 32   ;;  %vm4156_vm15 = vcmask 453632  }
  0x14   : > { %v5447_v0 = vld [vmem:[%s5444_s22 + $0x18] sm:$0xff]   ;;  %v5450_v1 = vld [vmem:[%s5444_s22 + $0x10] sm:$0xff]   ;;  %v5456_v3 = vld [vmem:[%s5444_s22] sm:$0xff]   ;;  %4752 = vmatpush3.bf16.msra.mxu0 %v4937_v44  ;;  %s5394_s21 = smov 72  }
  0x15   : > { %928 = vrot.lane.b32.xlu1 %v5447_v0, %s5386_s23  ;;  %v794_v2 = vrot.slane %v5447_v0, 1  ;;  %926 = vrot.lane.b32.xlu0 %v5450_v1, %s5386_s23  ;;  %v792_v4 = vrot.slane %v5450_v1, 1  ;;  %v5462_v5 = vld [vmem:[%s5444_s22 + $0x8] sm:$0xff]   ;;  %v789_v6 = vrot.slane %v5456_v3, 1  ;;  %v465_v7 = vshrl.u32 %v5456_v3, 16  ;;  %v5468_v9 = vld [vmem:[%s5444_s22 + $0x20] sm:$0xff]  }
  0x16   : > { %v467_v8 = vshll.u32 %v5456_v3, 16  ;;  %v790_v11 = vrot.slane %v5462_v5, 1  ;;  %v472_v12 = vshll.u32 %v5462_v5, 16  ;;  %v476_v13 = vshrl.u32 %v5462_v5, 16  ;;  %v5488_v28 = vld [vmem:[%s5444_s22 + $0x28] sm:$0xff]   ;;  %v5495_v32 = vld [vmem:[%s5444_s22 + $0x30] sm:$0xff]   ;;  %4887 = vmatprep.subr.msk.bf16.mxu0 %vm1990_vm2, %v4938_v48 }
  0x17   : > { %v5471_v10 = vsel %vm788_vm1, %v792_v4, %v794_v2  ;;  %v480_v15 = vshll.u32 %v5450_v1, 16  ;;  %v488_v16 = vshll.u32 %v5447_v0, 16  ;;  %v796_v19 = vrot.slane %v5468_v9, 1  ;;  %v5537_v56 = vld [vmem:[%s5444_s22 + $0x38] sm:$0xff]   ;;  %v5544_v57 = vld [vmem:[%s5444_s22 + $0x40] sm:$0xff]  }
  0x18   : > { %v469_v14 = vrot.slane %v467_v8, 1  ;;  %v791_v17 = vsel %vm788_vm1, %v789_v6, %v790_v11  ;;  %v474_v18 = vrot.slane %v472_v12, 1  ;;  %v793_v20 = vsel %vm788_vm1, %v790_v11, %v792_v4  ;;  %4754 = vmatpush3.bf16.msra.mxu0 %v1992_v52 }
  0x19   : > { %1084 = vrot.lane.b32.xlu0 %v5471_v10, %s5387_s24  ;;  %854 = vrot.lane.b32.xlu1 %v791_v17, %s5388_s25  ;;  %v482_v22 = vrot.slane %v480_v15, 1  ;;  %v492_v23 = vshrl.u32 %v5447_v0, 16  ;;  %v490_v25 = vrot.slane %v488_v16, 1  ;;  %v496_v26 = vshll.u32 %v5468_v9, 16 }
  0x1a   : > { %v470_v21 = vor.u32 %v469_v14, %v465_v7  ;;  %v478_v24 = vor.u32 %v476_v13, %v474_v18  ;;  %v484_v27 = vshrl.u32 %v5450_v1, 16  ;;  %v797_v33 = vsel %vm788_vm1, %v794_v2, %v796_v19  ;;  %v5573_v13 = vld [vmem:[%s5444_s22 + $0x48] sm:$0xff]   ;;  %v5580_v14 = vld [vmem:[%s5444_s22 + $0x50] sm:$0xff]  }
  0x1b   : > { %v494_v34 = vor.u32 %v492_v23, %v490_v25  ;;  %v498_v35 = vrot.slane %v496_v26, 1  ;;  %v504_v36 = vshll.u32 %v5488_v28, 16  ;;  %v508_v38 = vshrl.u32 %v5488_v28, 16 }
  0x1c   : > { %v475_v29 = vsel %vm463_vm0, %v470_v21, %v474_v18  ;;  %v483_v30 = vsel %vm463_vm0, %v478_v24, %v482_v22  ;;  %v486_v31 = vor.u32 %v484_v27, %v482_v22  ;;  %v500_v39 = vshrl.u32 %v5468_v9, 16 }
  0x1d   : > { %724 = vrot.lane.b32.xlu0 %v475_v29, %s5389_s26  ;;  %856 = vrot.lane.b32.xlu1 %v793_v20, %s5388_s25  ;;  %v499_v40 = vsel %vm463_vm0, %v494_v34, %v498_v35  ;;  %v506_v41 = vrot.slane %v504_v36, 1  ;;  %v512_v42 = vshll.u32 %v5495_v32, 16  ;;  %v798_v50 = vrot.slane %v5488_v28, 1 }
  0x1e   : > { %v491_v37 = vsel %vm463_vm0, %v486_v31, %v490_v25  ;;  %v502_v45 = vor.u32 %v500_v39, %v498_v35  ;;  %v800_v54 = vrot.slane %v5495_v32, 1  ;;  %v520_v58 = vshll.u32 %v5537_v56, 16  ;;  %v5616_v31 = vld [vmem:[%s5444_s22 + $0x60] sm:$0xff]  }
  0x1f   : > { %v510_v46 = vor.u32 %v508_v38, %v506_v41  ;;  %v514_v47 = vrot.slane %v512_v42, 1  ;;  %v799_v53 = vsel %vm788_vm1, %v796_v19, %v798_v50  ;;  %v516_v59 = vshrl.u32 %v5495_v32, 16 }
  0x20   : > { %v507_v49 = vsel %vm463_vm0, %v502_v45, %v506_v41  ;;  %v801_v55 = vsel %vm788_vm1, %v798_v50, %v800_v54  ;;  %v522_v60 = vrot.slane %v520_v58, 1  ;;  %v524_v61 = vshrl.u32 %v5537_v56, 16 }
  0x21   : > { %726 = vrot.lane.b32.xlu0 %v483_v30, %s5389_s26  ;;  %1086 = vrot.lane.b32.xlu1 %v797_v33, %s5387_s24  ;;  %v515_v51 = vsel %vm463_vm0, %v510_v46, %v514_v47  ;;  %v528_v62 = vshll.u32 %v5544_v57, 16  ;;  %v518_v63 = vor.u32 %v516_v59, %v514_v47  ;;  %v802_v7 = vrot.slane %v5537_v56, 1  ;;  %v5609_v30 = vld [vmem:[%s5444_s22 + $0x58] sm:$0xff]  }
  0x22   : > { %v526_v2 = vor.u32 %v524_v61, %v522_v60  ;;  %v804_v11 = vrot.slane %v5544_v57, 1  ;;  %v536_v15 = vshll.u32 %v5573_v13, 16  ;;  %v532_v16 = vshrl.u32 %v5544_v57, 16 }
  0x23   : > { %v530_v4 = vrot.slane %v528_v62, 1  ;;  %v523_v6 = vsel %vm463_vm0, %v518_v63, %v522_v60  ;;  %v540_v18 = vshrl.u32 %v5573_v13, 16  ;;  %v544_v19 = vshll.u32 %v5580_v14, 16  ;;  %v5667_v63 = vld [vmem:[%s5444_s22 + $0x68] sm:$0xff]  }
  0x24   : > { %v805_v12 = vsel %vm788_vm1, %v802_v7, %v804_v11  ;;  %v538_v17 = vrot.slane %v536_v15, 1  ;;  %v806_v24 = vrot.slane %v5573_v13, 1  ;;  %v808_v27 = vrot.slane %v5580_v14, 1 }
  0x25   : > { %1014 = vrot.lane.b32.xlu0 %v491_v37, %s5390_s5  ;;  %1016 = vrot.lane.b32.xlu1 %v499_v40, %s5390_s5  ;;  %v531_v8 = vsel %vm463_vm0, %v526_v2, %v530_v4  ;;  %v534_v20 = vor.u32 %v532_v16, %v530_v4  ;;  %v546_v22 = vrot.slane %v544_v19, 1  ;;  %v548_v34 = vshrl.u32 %v5580_v14, 16 }
  0x26   : > { %v542_v21 = vor.u32 %v540_v18, %v538_v17  ;;  %v807_v26 = vsel %vm788_vm1, %v804_v11, %v806_v24  ;;  %v809_v29 = vsel %vm788_vm1, %v806_v24, %v808_v27  ;;  %v556_v36 = vshrl.u32 %v5609_v30, 16 }
  0x27   : > { %v539_v23 = vsel %vm463_vm0, %v534_v20, %v538_v17  ;;  %v550_v39 = vor.u32 %v548_v34, %v546_v22  ;;  %v810_v44 = vrot.slane %v5609_v30, 1  ;;  %v564_v17 = vshrl.u32 %v5616_v31, 16 }
  0x28   : > { %v547_v25 = vsel %vm463_vm0, %v542_v21, %v546_v22  ;;  %v572_v21 = vshrl.u32 %v5667_v63, 16 }
  0x29   : > { %1156 = vrot.lane.b32.xlu0 %v5468_v9, %s5391_s6  ;;  %1158 = vrot.lane.b32.xlu1 %v5488_v28, %s5391_s6  ;;  %v5645_v48 = vsel %vm788_vm1, %v808_v27, %v810_v44 }
  0x2d   : > { %1244 = vrot.lane.b32.xlu0 %v507_v49, %s5392_s9  ;;  %1246 = vrot.lane.b32.xlu1 %v515_v51, %s5392_s9 }
  0x31   : > { %1314 = vrot.lane.b32.xlu0 %v799_v53, %s5393_s10  ;;  %728 = vrot.lane.b32.xlu1 %v491_v37, %s5389_s26  ;;  %v560_v37 = vshll.u32 %v5616_v31, 16 }
  0x33   : > { %v5626_v42 = vrot.slane %v560_v37, 1 }
  0x35   : > { %1316 = vrot.lane.b32.xlu0 %v801_v55, %s5393_s10  ;;  %730 = vrot.lane.b32.xlu1 %v499_v40, %s5389_s26  ;;  %v566_v27 = vor.u32 %v564_v17, %v5626_v42 }
  0x39   : > { %858 = vrot.lane.b32.xlu0 %v5471_v10, %s5388_s25  ;;  %860 = vrot.lane.b32.xlu1 %v797_v33, %s5388_s25  ;;  %v803_v10 = vsel %vm788_vm1, %v800_v54, %v802_v7  ;;  %v552_v33 = vshll.u32 %v5609_v30, 16 }
  0x3b   : > { %v554_v35 = vrot.slane %v552_v33, 1 }
  0x3d   : > { %930 = vrot.lane.b32.xlu0 %v5468_v9, %s5386_s23  ;;  %932 = vrot.lane.b32.xlu1 %v5488_v28, %s5386_s23  ;;  %v558_v41 = vor.u32 %v556_v36, %v554_v35  ;;  %v5633_v43 = vsel %vm463_vm0, %v550_v39, %v554_v35  ;;  %v814_v39 = vrot.slane %v5667_v63, 1 }
  0x3f   : > { %v5638_v46 = vsel %vm463_vm0, %v558_v41, %v5626_v42 }
  0x41   : > { %1018 = vrot.lane.b32.xlu0 %v507_v49, %s5390_s5  ;;  %1020 = vrot.lane.b32.xlu1 %v515_v51, %s5390_s5 }
  0x45   : > { %1088 = vrot.lane.b32.xlu0 %v799_v53, %s5387_s24  ;;  %1090 = vrot.lane.b32.xlu1 %v801_v55, %s5387_s24 }
  0x49   : > { %1160 = vrot.lane.b32.xlu0 %v5495_v32, %s5391_s6  ;;  %1162 = vrot.lane.b32.xlu1 %v5537_v56, %s5391_s6 }
  0x4d   : > { %1248 = vrot.lane.b32.xlu0 %v523_v6, %s5392_s9  ;;  %1250 = vrot.lane.b32.xlu1 %v531_v8, %s5392_s9 }
  0x51   : > { %1318 = vrot.lane.b32.xlu0 %v803_v10, %s5393_s10  ;;  %732 = vrot.lane.b32.xlu1 %v507_v49, %s5389_s26  ;;  %v812_v49 = vrot.slane %v5616_v31, 1 }
  0x53   : > { %v5654_v52 = vsel %vm788_vm1, %v810_v44, %v812_v49  ;;  %v5722_v44 = vsel %vm788_vm1, %v812_v49, %v814_v39 }
  0x55   : > { %1320 = vrot.lane.b32.xlu0 %v805_v12, %s5393_s10  ;;  %734 = vrot.lane.b32.xlu1 %v515_v51, %s5389_s26 }
  0x59   : > { %862 = vrot.lane.b32.xlu0 %v799_v53, %s5388_s25  ;;  %864 = vrot.lane.b32.xlu1 %v801_v55, %s5388_s25 }
  0x5d   : > { %934 = vrot.lane.b32.xlu0 %v5495_v32, %s5386_s23  ;;  %936 = vrot.lane.b32.xlu1 %v5537_v56, %s5386_s23 }
  0x61   : > { %1022 = vrot.lane.b32.xlu0 %v523_v6, %s5390_s5  ;;  %1024 = vrot.lane.b32.xlu1 %v531_v8, %s5390_s5 }
  0x65   : > { %1092 = vrot.lane.b32.xlu0 %v803_v10, %s5387_s24  ;;  %1094 = vrot.lane.b32.xlu1 %v805_v12, %s5387_s24 }
  0x69   : > { %1164 = vrot.lane.b32.xlu0 %v5544_v57, %s5391_s6  ;;  %1166 = vrot.lane.b32.xlu1 %v5573_v13, %s5391_s6 }
  0x6d   : > { %1252 = vrot.lane.b32.xlu0 %v539_v23, %s5392_s9  ;;  %1254 = vrot.lane.b32.xlu1 %v547_v25, %s5392_s9 }
  0x71   : > { %1322 = vrot.lane.b32.xlu0 %v807_v26, %s5393_s10  ;;  %736 = vrot.lane.b32.xlu1 %v523_v6, %s5389_s26 }
  0x75   : > { %1324 = vrot.lane.b32.xlu0 %v809_v29, %s5393_s10  ;;  %738 = vrot.lane.b32.xlu1 %v531_v8, %s5389_s26  ;;  %v5678_v8 = vld [vmem:[%s5444_s22 + $0x70] sm:$0xff]  }
  0x76   : > { %v576_v22 = vshll.u32 %v5678_v8, 16 }
  0x78   : > { %v578_v35 = vrot.slane %v576_v22, 1 }
  0x79   : > { %866 = vrot.lane.b32.xlu0 %v803_v10, %s5388_s25  ;;  %868 = vrot.lane.b32.xlu1 %v805_v12, %s5388_s25  ;;  %v568_v10 = vshll.u32 %v5667_v63, 16 }
  0x7b   : > { %v570_v20 = vrot.slane %v568_v10, 1  ;;  %v580_v10 = vshrl.u32 %v5678_v8, 16 }
  0x7d   : > { %938 = vrot.lane.b32.xlu0 %v5544_v57, %s5386_s23  ;;  %940 = vrot.lane.b32.xlu1 %v5573_v13, %s5386_s23  ;;  %v574_v34 = vor.u32 %v572_v21, %v570_v20  ;;  %v582_v22 = vor.u32 %v580_v10, %v578_v35 }
  0x7f   : > { %v5713_v41 = vsel %vm463_vm0, %v574_v34, %v578_v35 }
  0x81   : > { %1026 = vrot.lane.b32.xlu0 %v539_v23, %s5390_s5  ;;  %1028 = vrot.lane.b32.xlu1 %v547_v25, %s5390_s5 }
  0x85   : > { %1096 = vrot.lane.b32.xlu0 %v807_v26, %s5387_s24  ;;  %1098 = vrot.lane.b32.xlu1 %v809_v29, %s5387_s24 }
  0x87   : > { %v929_v38 = vpop.permute.xlu1 %928  ;;  %v927_v40 = vpop.permute.xlu0 %926 }
  0x89   : > { %1168 = vrot.lane.b32.xlu0 %v5580_v14, %s5391_s6  ;;  %1170 = vrot.lane.b32.xlu1 %v5609_v30, %s5391_s6 }
  0x8b   : > { %v1085_v45 = vpop.permute.xlu0 %1084  ;;  %v855_v47 = vpop.permute.xlu1 %854 }
  0x8d   : > { %1256 = vrot.lane.b32.xlu0 %v5633_v43, %s5392_s9  ;;  %1258 = vrot.lane.b32.xlu1 %v5638_v46, %s5392_s9 }
  0x8f   : > { %v725_v50 = vpop.permute.xlu0 %724  ;;  %v857_v51 = vpop.permute.xlu1 %856 }
  0x90   : > { %v1380_v55 = vsel %vm1378_vm3, %v5456_v3, %v725_v50 }
  0x91   : > { %1326 = vrot.lane.b32.xlu0 %v5645_v48, %s5393_s10  ;;  %740 = vrot.lane.b32.xlu1 %v539_v23, %s5389_s26  ;;  %v1445_v61 = vsel %vm1443_vm4, %v1380_v55, %v855_v47 }
  0x92   : > { %v1510_v4 = vsel %vm1508_vm5, %v1445_v61, %v927_v40 }
  0x93   : > { %v727_v53 = vpop.permute.xlu0 %726  ;;  %v1087_v54 = vpop.permute.xlu1 %1086 }
  0x94   : > { %v1382_v60 = vsel %vm1378_vm3, %v5462_v5, %v727_v53 }
  0x95   : > { %1328 = vrot.lane.b32.xlu0 %v5654_v52, %s5393_s10  ;;  %742 = vrot.lane.b32.xlu1 %v547_v25, %s5389_s26  ;;  %v1447_v2 = vsel %vm1443_vm4, %v1382_v60, %v857_v51 }
  0x96   : > { %v1512_v6 = vsel %vm1508_vm5, %v1447_v2, %v929_v38  ;;  %v5709_v38 = vsel %vm463_vm0, %v566_v27, %v570_v20 }
  0x97   : > { %v1015_v58 = vpop.permute.xlu0 %1014  ;;  %v1017_v59 = vpop.permute.xlu1 %1016 }
  0x98   : > { %v1575_v5 = vsel %vm1573_vm6, %v1510_v4, %v1015_v58  ;;  %v1577_v15 = vsel %vm1573_vm6, %v1512_v6, %v1017_v59 }
  0x99   : > { %870 = vrot.lane.b32.xlu0 %v807_v26, %s5388_s25  ;;  %872 = vrot.lane.b32.xlu1 %v809_v29, %s5388_s25  ;;  %v1640_v12 = vsel %vm1638_vm7, %v1575_v5, %v1085_v45  ;;  %v1642_v25 = vsel %vm1638_vm7, %v1577_v15, %v1087_v54  ;;  %v816_v45 = vrot.slane %v5678_v8, 1 }
  0x9b   : > { %v1157_v62 = vpop.permute.xlu0 %1156  ;;  %v1159_v3 = vpop.permute.xlu1 %1158  ;;  %v5732_v51 = vsel %vm788_vm1, %v814_v39, %v816_v45 }
  0x9c   : > { %v1705_v16 = vsel %vm1703_vm8, %v1640_v12, %v1157_v62  ;;  %v1707_v26 = vsel %vm1703_vm8, %v1642_v25, %v1159_v3  ;;  %v5755_v62 = vld [vmem:[%s5444_s22 + $0x80] sm:$0xff]  }
  0x9d   : > { %942 = vrot.lane.b32.xlu0 %v5580_v14, %s5386_s23  ;;  %944 = vrot.lane.b32.xlu1 %v5609_v30, %s5386_s23 }
  0x9f   : > { %v1245_v7 = vpop.permute.xlu0 %1244  ;;  %v1247_v11 = vpop.permute.xlu1 %1246 }
  0xa0   : > { %v1770_v18 = vsel %vm1768_vm9, %v1705_v16, %v1245_v7  ;;  %v1772_v29 = vsel %vm1768_vm9, %v1707_v26, %v1247_v11  ;;  %v592_v16 = vshll.u32 %v5755_v62, 16 }
  0xa1   : > { %1030 = vrot.lane.b32.xlu0 %v5633_v43, %s5390_s5  ;;  %1032 = vrot.lane.b32.xlu1 %v5638_v46, %s5390_s5 }
  0xa2   : > { %v594_v26 = vrot.slane %v592_v16, 1 }
  0xa3   : > { %v1315_v19 = vpop.permute.xlu0 %1314  ;;  %v729_v23 = vpop.permute.xlu1 %728 }
  0xa4   : > { %v1835_v24 = vsel %vm1833_vm10, %v1770_v18, %v1315_v19  ;;  %v1384_v60 = vsel %vm1378_vm3, %v5450_v1, %v729_v23 }
  0xa5   : > { %1100 = vrot.lane.b32.xlu0 %v5645_v48, %s5387_s24  ;;  %4755 = vmatprep.mubr.msk.bf16.mxu0 %vm1925_vm11, %v1835_v24 }
  0xa6   : > { %1102 = vrot.lane.b32.xlu1 %v5654_v52, %s5387_s24 }
  0xa7   : > { %v1317_v33 = vpop.permute.xlu0 %1316  ;;  %v731_v36 = vpop.permute.xlu1 %730 }
  0xa8   : > { %v1837_v37 = vsel %vm1833_vm10, %v1772_v29, %v1317_v33  ;;  %v1386_v1 = vsel %vm1378_vm3, %v5447_v0, %v731_v36 }
  0xa9   : > { %1172 = vrot.lane.b32.xlu0 %v5616_v31, %s5391_s6  ;;  %4756 = vmatmul.mubr.msk.bf16.vlgmr.msra.gmra.mrb[0].mxu0 %vm1925_vm11, %v1837_v37 }
  0xaa   : > { %1174 = vrot.lane.b32.xlu1 %v5667_v63, %s5391_s6 }
  0xab   : > { %v859_v40 = vpop.permute.xlu0 %858  ;;  %v861_v42 = vpop.permute.xlu1 %860 }
  0xac   : > { %v1451_v5 = vsel %vm1443_vm4, %v1386_v1, %v861_v42 }
  0xad   : > { %1260 = vrot.lane.b32.xlu0 %v5709_v38, %s5392_s9 }
  0xae   : > { %1262 = vrot.lane.b32.xlu1 %v5713_v41, %s5392_s9 }
  0xaf   : > { %v931_v47 = vpop.permute.xlu0 %930  ;;  %v933_v50 = vpop.permute.xlu1 %932 }
  0xb0   : > { %v1516_v11 = vsel %vm1508_vm5, %v1451_v5, %v933_v50 }
  0xb1   : > { %1330 = vrot.lane.b32.xlu0 %v5722_v44, %s5393_s10 }
  0xb2   : > { %744 = vrot.lane.b32.xlu1 %v5633_v43, %s5389_s26  ;;  %v5743_v43 = vld [vmem:[%s5444_s22 + $0x78] sm:$0xff]  }
  0xb3   : > { %v1019_v53 = vpop.permute.xlu0 %1018  ;;  %v1021_v54 = vpop.permute.xlu1 %1020  ;;  %v588_v15 = vshrl.u32 %v5743_v43, 16  ;;  %v818_v34 = vrot.slane %v5743_v43, 1 }
  0xb4   : > { %v1581_v17 = vsel %vm1573_vm6, %v1516_v11, %v1021_v54 }
  0xb5   : > { %1332 = vrot.lane.b32.xlu0 %v5732_v51, %s5393_s10  ;;  %v5802_v39 = vsel %vm788_vm1, %v816_v45, %v818_v34 }
  0xb6   : > { %746 = vrot.lane.b32.xlu1 %v5638_v46, %s5389_s26  ;;  %v1449_v46 = vsel %vm1443_vm4, %v1384_v60, %v859_v40  ;;  %v820_v40 = vrot.slane %v5755_v62, 1 }
  0xb7   : > { %v1089_v49 = vpop.permute.xlu0 %1088  ;;  %v1091_v55 = vpop.permute.xlu1 %1090  ;;  %v1514_v61 = vsel %vm1508_vm5, %v1449_v46, %v931_v47  ;;  %v5835_v46 = vld [vmem:[%s5444_s22 + $0x90] sm:$0xff]  }
  0xb8   : > { %v1579_v2 = vsel %vm1573_vm6, %v1514_v61, %v1019_v53  ;;  %v1646_v20 = vsel %vm1638_vm7, %v1581_v17, %v1091_v55  ;;  %v5812_v50 = vsel %vm788_vm1, %v818_v34, %v820_v40  ;;  %v608_v10 = vshll.u32 %v5835_v46, 16 }
  0xb9   : > { %874 = vrot.lane.b32.xlu0 %v5645_v48, %s5388_s25  ;;  %v584_v48 = vshll.u32 %v5743_v43, 16  ;;  %v1644_v4 = vsel %vm1638_vm7, %v1579_v2, %v1089_v49 }
  0xba   : > { %876 = vrot.lane.b32.xlu1 %v5654_v52, %s5388_s25 }
  0xbb   : > { %v1161_v58 = vpop.permute.xlu0 %1160  ;;  %v1163_v59 = vpop.permute.xlu1 %1162  ;;  %v586_v7 = vrot.slane %v584_v48, 1 }
  0xbc   : > { %v1709_v6 = vsel %vm1703_vm8, %v1644_v4, %v1161_v58  ;;  %v1711_v21 = vsel %vm1703_vm8, %v1646_v20, %v1163_v59  ;;  %v596_v4 = vshrl.u32 %v5755_v62, 16 }
  0xbd   : > { %946 = vrot.lane.b32.xlu0 %v5616_v31, %s5386_s23  ;;  %v590_v25 = vor.u32 %v588_v15, %v586_v7  ;;  %v5789_v33 = vsel %vm463_vm0, %v582_v22, %v586_v7 }
  0xbe   : > { %948 = vrot.lane.b32.xlu1 %v5667_v63, %s5386_s23  ;;  %v598_v17 = vor.u32 %v596_v4, %v594_v26 }
  0xbf   : > { %v1249_v52 = vpop.permute.xlu0 %1248  ;;  %v1251_v3 = vpop.permute.xlu1 %1250  ;;  %v5793_v36 = vsel %vm463_vm0, %v590_v25, %v594_v26 }
  0xc0   : > { %v1774_v12 = vsel %vm1768_vm9, %v1709_v6, %v1249_v52  ;;  %v1776_v23 = vsel %vm1768_vm9, %v1711_v21, %v1251_v3  ;;  %v610_v21 = vrot.slane %v608_v10, 1 }
  0xc1   : > { %1034 = vrot.lane.b32.xlu0 %v5709_v38, %s5390_s5 }
  0xc2   : > { %1036 = vrot.lane.b32.xlu1 %v5713_v41, %s5390_s5 }
  0xc3   : > { %v1319_v0 = vpop.permute.xlu0 %1318  ;;  %v733_v18 = vpop.permute.xlu1 %732 }
  0xc4   : > { %v1839_v19 = vsel %vm1833_vm10, %v1774_v12, %v1319_v0  ;;  %v1388_v59 = vsel %vm1378_vm3, %v5468_v9, %v733_v18 }
  0xc5   : > { %1104 = vrot.lane.b32.xlu0 %v5722_v44, %s5387_s24  ;;  %4759 = vmatprep.mubr.msk.bf16.mxu0 %vm1925_vm11, %v1839_v19 }
  0xc6   : > { %1106 = vrot.lane.b32.xlu1 %v5732_v51, %s5387_s24 }
  0xc7   : > { %v1321_v24 = vpop.permute.xlu0 %1320  ;;  %v735_v27 = vpop.permute.xlu1 %734 }
  0xc8   : > { %v1841_v29 = vsel %vm1833_vm10, %v1776_v23, %v1321_v24  ;;  %v1390_v9 = vsel %vm1378_vm3, %v5488_v28, %v735_v27 }
  0xc9   : > { %1176 = vrot.lane.b32.xlu0 %v5678_v8, %s5391_s6  ;;  %4760 = vmatmul.mubr.msk.bf16.gmra.mrb[4].mxu0 %vm1925_vm11, %v1841_v29 }
  0xca   : > { %1178 = vrot.lane.b32.xlu1 %v5743_v43, %s5391_s6 }
  0xcb   : > { %v863_v35 = vpop.permute.xlu0 %862  ;;  %v865_v37 = vpop.permute.xlu1 %864 }
  0xcc   : > { %v1455_v2 = vsel %vm1443_vm4, %v1390_v9, %v865_v37 }
  0xcd   : > { %1264 = vrot.lane.b32.xlu0 %v5789_v33, %s5392_s9 }
  0xce   : > { %1266 = vrot.lane.b32.xlu1 %v5793_v36, %s5392_s9 }
  0xcf   : > { %v935_v42 = vpop.permute.xlu0 %934  ;;  %v937_v47 = vpop.permute.xlu1 %936 }
  0xd0   : > { %v1520_v5 = vsel %vm1508_vm5, %v1455_v2, %v937_v47 }
  0xd1   : > { %1334 = vrot.lane.b32.xlu0 %v5802_v39, %s5393_s10 }
  0xd2   : > { %748 = vrot.lane.b32.xlu1 %v5709_v38, %s5389_s26  ;;  %v5823_v38 = vld [vmem:[%s5444_s22 + $0x88] sm:$0xff]  }
  0xd3   : > { %v1023_v53 = vpop.permute.xlu0 %1022  ;;  %v1025_v54 = vpop.permute.xlu1 %1024  ;;  %v604_v7 = vshrl.u32 %v5823_v38, 16  ;;  %v822_v25 = vrot.slane %v5823_v38, 1 }
  0xd4   : > { %v1585_v11 = vsel %vm1573_vm6, %v1520_v5, %v1025_v54 }
  0xd5   : > { %1336 = vrot.lane.b32.xlu0 %v5812_v50, %s5393_s10  ;;  %v5882_v34 = vsel %vm788_vm1, %v820_v40, %v822_v25 }
  0xd6   : > { %750 = vrot.lane.b32.xlu1 %v5713_v41, %s5389_s26  ;;  %v1453_v41 = vsel %vm1443_vm4, %v1388_v59, %v863_v35  ;;  %v824_v35 = vrot.slane %v5835_v46, 1 }
  0xd7   : > { %v1093_v45 = vpop.permute.xlu0 %1092  ;;  %v1095_v49 = vpop.permute.xlu1 %1094  ;;  %v1518_v60 = vsel %vm1508_vm5, %v1453_v41, %v935_v42  ;;  %v5915_v41 = vld [vmem:[%s5444_s22 + $0xa0] sm:$0xff]  }
  0xd8   : > { %v1583_v48 = vsel %vm1573_vm6, %v1518_v60, %v1023_v53  ;;  %v1650_v15 = vsel %vm1638_vm7, %v1585_v11, %v1095_v49  ;;  %v5892_v47 = vsel %vm788_vm1, %v822_v25, %v824_v35  ;;  %v624_v4 = vshll.u32 %v5915_v41, 16 }
  0xd9   : > { %878 = vrot.lane.b32.xlu0 %v5722_v44, %s5388_s25  ;;  %v600_v44 = vshll.u32 %v5823_v38, 16  ;;  %v1648_v52 = vsel %vm1638_vm7, %v1583_v48, %v1093_v45 }
  0xda   : > { %880 = vrot.lane.b32.xlu1 %v5732_v51, %s5388_s25 }
  0xdb   : > { %v1165_v55 = vpop.permute.xlu0 %1164  ;;  %v1167_v58 = vpop.permute.xlu1 %1166  ;;  %v602_v1 = vrot.slane %v600_v44, 1 }
  0xdc   : > { %v1713_v3 = vsel %vm1703_vm8, %v1648_v52, %v1165_v55  ;;  %v1715_v16 = vsel %vm1703_vm8, %v1650_v15, %v1167_v58  ;;  %v612_v52 = vshrl.u32 %v5835_v46, 16 }
  0xdd   : > { %950 = vrot.lane.b32.xlu0 %v5678_v8, %s5386_s23  ;;  %v606_v20 = vor.u32 %v604_v7, %v602_v1  ;;  %v5869_v24 = vsel %vm463_vm0, %v598_v17, %v602_v1 }
  0xde   : > { %952 = vrot.lane.b32.xlu1 %v5743_v43, %s5386_s23  ;;  %v614_v11 = vor.u32 %v612_v52, %v610_v21 }
  0xdf   : > { %v1253_v51 = vpop.permute.xlu0 %1252  ;;  %v1255_v61 = vpop.permute.xlu1 %1254  ;;  %v5873_v27 = vsel %vm463_vm0, %v606_v20, %v610_v21 }
  0xe0   : > { %v1778_v6 = vsel %vm1768_vm9, %v1713_v3, %v1253_v51  ;;  %v1780_v18 = vsel %vm1768_vm9, %v1715_v16, %v1255_v61  ;;  %v626_v16 = vrot.slane %v624_v4, 1 }
  0xe1   : > { %1038 = vrot.lane.b32.xlu0 %v5789_v33, %s5390_s5 }
  0xe2   : > { %1040 = vrot.lane.b32.xlu1 %v5793_v36, %s5390_s5 }
  0xe3   : > { %v1323_v28 = vpop.permute.xlu0 %1322  ;;  %v737_v12 = vpop.permute.xlu1 %736 }
  0xe4   : > { %v1843_v0 = vsel %vm1833_vm10, %v1778_v6, %v1323_v28  ;;  %v1392_v58 = vsel %vm1378_vm3, %v5495_v32, %v737_v12 }
  0xe5   : > { %1108 = vrot.lane.b32.xlu0 %v5802_v39, %s5387_s24  ;;  %4763 = vmatprep.mubr.msk.bf16.mxu0 %vm1925_vm11, %v1843_v0 }
  0xe6   : > { %1110 = vrot.lane.b32.xlu1 %v5812_v50, %s5387_s24 }
  0xe7   : > { %v1325_v19 = vpop.permute.xlu0 %1324  ;;  %v739_v22 = vpop.permute.xlu1 %738 }
  0xe8   : > { %v1845_v23 = vsel %vm1833_vm10, %v1780_v18, %v1325_v19  ;;  %v1394_v32 = vsel %vm1378_vm3, %v5537_v56, %v739_v22 }
  0xe9   : > { %1180 = vrot.lane.b32.xlu0 %v5755_v62, %s5391_s6  ;;  %4764 = vmatmul.mubr.msk.bf16.gmra.mrb[8].mxu0 %vm1925_vm11, %v1845_v23 }
  0xea   : > { %1182 = vrot.lane.b32.xlu1 %v5823_v38, %s5391_s6 }
  0xeb   : > { %v867_v26 = vpop.permute.xlu0 %866  ;;  %v869_v29 = vpop.permute.xlu1 %868 }
  0xec   : > { %v1459_v48 = vsel %vm1443_vm4, %v1394_v32, %v869_v29 }
  0xed   : > { %1268 = vrot.lane.b32.xlu0 %v5869_v24, %s5392_s9 }
  0xee   : > { %1270 = vrot.lane.b32.xlu1 %v5873_v27, %s5392_s9 }
  0xef   : > { %v939_v37 = vpop.permute.xlu0 %938  ;;  %v941_v42 = vpop.permute.xlu1 %940 }
  0xf0   : > { %v1524_v2 = vsel %vm1508_vm5, %v1459_v48, %v941_v42 }
  0xf1   : > { %1338 = vrot.lane.b32.xlu0 %v5882_v34, %s5393_s10 }
  0xf2   : > { %752 = vrot.lane.b32.xlu1 %v5789_v33, %s5389_s26  ;;  %v5903_v33 = vld [vmem:[%s5444_s22 + $0x98] sm:$0xff]  }
  0xf3   : > { %v1027_v53 = vpop.permute.xlu0 %1026  ;;  %v1029_v54 = vpop.permute.xlu1 %1028  ;;  %v620_v1 = vshrl.u32 %v5903_v33, 16  ;;  %v826_v20 = vrot.slane %v5903_v33, 1 }
  0xf4   : > { %v1589_v5 = vsel %vm1573_vm6, %v1524_v2, %v1029_v54 }
  0xf5   : > { %1340 = vrot.lane.b32.xlu0 %v5892_v47, %s5393_s10  ;;  %v5962_v25 = vsel %vm788_vm1, %v824_v35, %v826_v20 }
  0xf6   : > { %754 = vrot.lane.b32.xlu1 %v5793_v36, %s5389_s26  ;;  %v1457_v36 = vsel %vm1443_vm4, %v1392_v58, %v867_v26  ;;  %v828_v26 = vrot.slane %v5915_v41, 1 }
  0xf7   : > { %v1097_v40 = vpop.permute.xlu0 %1096  ;;  %v1099_v45 = vpop.permute.xlu1 %1098  ;;  %v1522_v59 = vsel %vm1508_vm5, %v1457_v36, %v939_v37  ;;  %v5995_v36 = vld [vmem:[%s5444_s22 + $0xb0] sm:$0xff]  }
  0xf8   : > { %v1587_v44 = vsel %vm1573_vm6, %v1522_v59, %v1027_v53  ;;  %v1654_v7 = vsel %vm1638_vm7, %v1589_v5, %v1099_v45  ;;  %v5972_v42 = vsel %vm788_vm1, %v826_v20, %v828_v26  ;;  %v640_v52 = vshll.u32 %v5995_v36, 16 }
  0xf9   : > { %882 = vrot.lane.b32.xlu0 %v5802_v39, %s5388_s25  ;;  %v616_v39 = vshll.u32 %v5903_v33, 16  ;;  %v1652_v51 = vsel %vm1638_vm7, %v1587_v44, %v1097_v40 }
  0xfa   : > { %884 = vrot.lane.b32.xlu1 %v5812_v50, %s5388_s25 }
  0xfb   : > { %v1169_v49 = vpop.permute.xlu0 %1168  ;;  %v1171_v55 = vpop.permute.xlu1 %1170  ;;  %v618_v9 = vrot.slane %v616_v39, 1 }
  0xfc   : > { %v1717_v61 = vsel %vm1703_vm8, %v1652_v51, %v1169_v49  ;;  %v1719_v10 = vsel %vm1703_vm8, %v1654_v7, %v1171_v55  ;;  %v628_v51 = vshrl.u32 %v5915_v41, 16 }
  0xfd   : > { %954 = vrot.lane.b32.xlu0 %v5755_v62, %s5386_s23  ;;  %v622_v15 = vor.u32 %v620_v1, %v618_v9  ;;  %v5949_v19 = vsel %vm463_vm0, %v614_v11, %v618_v9 }
  0xfe   : > { %956 = vrot.lane.b32.xlu1 %v5823_v38, %s5386_s23  ;;  %v630_v5 = vor.u32 %v628_v51, %v626_v16 }
  0xff   : > { %v1257_v50 = vpop.permute.xlu0 %1256  ;;  %v1259_v60 = vpop.permute.xlu1 %1258  ;;  %v5953_v22 = vsel %vm463_vm0, %v622_v15, %v626_v16 }
 0x100   : > { %v1782_v3 = vsel %vm1768_vm9, %v1717_v61, %v1257_v50  ;;  %v1784_v12 = vsel %vm1768_vm9, %v1719_v10, %v1259_v60  ;;  %v642_v10 = vrot.slane %v640_v52, 1 }
 0x101   : > { %1042 = vrot.lane.b32.xlu0 %v5869_v24, %s5390_s5 }
 0x102   : > { %1044 = vrot.lane.b32.xlu1 %v5873_v27, %s5390_s5 }
 0x103   : > { %v1327_v56 = vpop.permute.xlu0 %1326  ;;  %v741_v6 = vpop.permute.xlu1 %740 }
 0x104   : > { %v1847_v28 = vsel %vm1833_vm10, %v1782_v3, %v1327_v56  ;;  %v1396_v55 = vsel %vm1378_vm3, %v5544_v57, %v741_v6 }
 0x105   : > { %1112 = vrot.lane.b32.xlu0 %v5882_v34, %s5387_s24  ;;  %4767 = vmatprep.mubr.msk.bf16.mxu0 %vm1925_vm11, %v1847_v28 }
 0x106   : > { %1114 = vrot.lane.b32.xlu1 %v5892_v47, %s5387_s24 }
 0x107   : > { %v1329_v0 = vpop.permute.xlu0 %1328  ;;  %v743_v17 = vpop.permute.xlu1 %742 }
 0x108   : > { %v1849_v18 = vsel %vm1833_vm10, %v1784_v12, %v1329_v0  ;;  %v1398_v57 = vsel %vm1378_vm3, %v5573_v13, %v743_v17 }
 0x109   : > { %1184 = vrot.lane.b32.xlu0 %v5835_v46, %s5391_s6  ;;  %4768 = vmatmul.mubr.msk.bf16.gmra.mrb[12].mxu0 %vm1925_vm11, %v1849_v18 }
 0x10a   : > { %1186 = vrot.lane.b32.xlu1 %v5903_v33, %s5391_s6 }
 0x10b   : > { %v871_v21 = vpop.permute.xlu0 %870  ;;  %v873_v23 = vpop.permute.xlu1 %872 }
 0x10c   : > { %v1463_v44 = vsel %vm1443_vm4, %v1398_v57, %v873_v23 }
 0x10d   : > { %1272 = vrot.lane.b32.xlu0 %v5949_v19, %s5392_s9 }
 0x10e   : > { %1274 = vrot.lane.b32.xlu1 %v5953_v22, %s5392_s9 }
 0x10f   : > { %v943_v29 = vpop.permute.xlu0 %942  ;;  %v945_v37 = vpop.permute.xlu1 %944 }
 0x110   : > { %v1528_v48 = vsel %vm1508_vm5, %v1463_v44, %v945_v37 }
 0x111   : > { %1342 = vrot.lane.b32.xlu0 %v5962_v25, %s5393_s10 }
 0x112   : > { %756 = vrot.lane.b32.xlu1 %v5869_v24, %s5389_s26  ;;  %v5983_v24 = vld [vmem:[%s5444_s22 + $0xa8] sm:$0xff]  }
 0x113   : > { %v1031_v53 = vpop.permute.xlu0 %1030  ;;  %v1033_v54 = vpop.permute.xlu1 %1032  ;;  %v636_v9 = vshrl.u32 %v5983_v24, 16  ;;  %v830_v15 = vrot.slane %v5983_v24, 1 }
 0x114   : > { %v1593_v2 = vsel %vm1573_vm6, %v1528_v48, %v1033_v54 }
 0x115   : > { %1344 = vrot.lane.b32.xlu0 %v5972_v42, %s5393_s10  ;;  %v6042_v20 = vsel %vm788_vm1, %v828_v26, %v830_v15 }
 0x116   : > { %758 = vrot.lane.b32.xlu1 %v5873_v27, %s5389_s26  ;;  %v1461_v27 = vsel %vm1443_vm4, %v1396_v55, %v871_v21  ;;  %v832_v21 = vrot.slane %v5995_v36, 1 }
 0x117   : > { %v1101_v35 = vpop.permute.xlu0 %1100  ;;  %v1526_v58 = vsel %vm1508_vm5, %v1461_v27, %v943_v29  ;;  %v6075_v27 = vld [vmem:[%s5444_s22 + $0xc0] sm:$0xff]  }
 0x118   : > { %v1103_v40 = vpop.permute.xlu1 %1102  ;;  %v1591_v39 = vsel %vm1573_vm6, %v1526_v58, %v1031_v53  ;;  %v6052_v37 = vsel %vm788_vm1, %v830_v15, %v832_v21  ;;  %v656_v51 = vshll.u32 %v6075_v27, 16 }
 0x119   : > { %886 = vrot.lane.b32.xlu0 %v5882_v34, %s5388_s25  ;;  %v632_v34 = vshll.u32 %v5983_v24, 16  ;;  %v1656_v50 = vsel %vm1638_vm7, %v1591_v39, %v1101_v35  ;;  %v1658_v1 = vsel %vm1638_vm7, %v1593_v2, %v1103_v40 }
 0x11a   : > { %888 = vrot.lane.b32.xlu1 %v5892_v47, %s5388_s25 }
 0x11b   : > { %v1173_v45 = vpop.permute.xlu0 %1172  ;;  %v634_v32 = vrot.slane %v632_v34, 1 }
 0x11c   : > { %v1175_v49 = vpop.permute.xlu1 %1174  ;;  %v1721_v60 = vsel %vm1703_vm8, %v1656_v50, %v1173_v45  ;;  %v644_v50 = vshrl.u32 %v5995_v36, 16 }
 0x11d   : > { %958 = vrot.lane.b32.xlu0 %v5835_v46, %s5386_s23  ;;  %v1723_v4 = vsel %vm1703_vm8, %v1658_v1, %v1175_v49  ;;  %v638_v7 = vor.u32 %v636_v9, %v634_v32  ;;  %v6029_v0 = vsel %vm463_vm0, %v630_v5, %v634_v32 }
 0x11e   : > { %960 = vrot.lane.b32.xlu1 %v5903_v33, %s5386_s23  ;;  %v646_v2 = vor.u32 %v644_v50, %v642_v10 }
 0x11f   : > { %v1261_v47 = vpop.permute.xlu0 %1260  ;;  %v6033_v17 = vsel %vm463_vm0, %v638_v7, %v642_v10 }
 0x120   : > { %v1263_v59 = vpop.permute.xlu1 %1262  ;;  %v1786_v61 = vsel %vm1768_vm9, %v1721_v60, %v1261_v47 }
 0x121   : > { %1046 = vrot.lane.b32.xlu0 %v5949_v19, %s5390_s5  ;;  %v1788_v6 = vsel %vm1768_vm9, %v1723_v4, %v1263_v59  ;;  %v658_v4 = vrot.slane %v656_v51, 1 }
 0x122   : > { %1048 = vrot.lane.b32.xlu1 %v5953_v22, %s5390_s5 }
 0x123   : > { %v1331_v13 = vpop.permute.xlu0 %1330 }
 0x124   : > { %v745_v3 = vpop.permute.xlu1 %744  ;;  %v1851_v56 = vsel %vm1833_vm10, %v1786_v61, %v1331_v13 }
 0x125   : > { %1116 = vrot.lane.b32.xlu0 %v5962_v25, %s5387_s24  ;;  %4771 = vmatprep.mubr.msk.bf16.mxu0 %vm1925_vm11, %v1851_v56  ;;  %v1400_v49 = vsel %vm1378_vm3, %v5580_v14, %v745_v3 }
 0x126   : > { %1118 = vrot.lane.b32.xlu1 %v5972_v42, %s5387_s24 }
 0x127   : > { %v1333_v28 = vpop.permute.xlu0 %1332 }
 0x128   : > { %v747_v11 = vpop.permute.xlu1 %746  ;;  %v1853_v12 = vsel %vm1833_vm10, %v1788_v6, %v1333_v28 }
 0x129   : > { %1188 = vrot.lane.b32.xlu0 %v5915_v41, %s5391_s6  ;;  %4772 = vmatmul.mubr.msk.bf16.gmra.mrb[16].mxu0 %vm1925_vm11, %v1853_v12  ;;  %v1402_v14 = vsel %vm1378_vm3, %v5609_v30, %v747_v11 }
 0x12a   : > { %1190 = vrot.lane.b32.xlu1 %v5983_v24, %s5391_s6 }
 0x12b   : > { %v875_v16 = vpop.permute.xlu0 %874 }
 0x12c   : > { %v877_v18 = vpop.permute.xlu1 %876 }
 0x12d   : > { %1276 = vrot.lane.b32.xlu0 %v6029_v0, %s5392_s9  ;;  %v1467_v39 = vsel %vm1443_vm4, %v1402_v14, %v877_v18 }
 0x12e   : > { %1278 = vrot.lane.b32.xlu1 %v6033_v17, %s5392_s9 }
 0x12f   : > { %v947_v23 = vpop.permute.xlu0 %946 }
 0x130   : > { %v949_v29 = vpop.permute.xlu1 %948 }
 0x131   : > { %1346 = vrot.lane.b32.xlu0 %v6042_v20, %s5393_s10  ;;  %v1532_v44 = vsel %vm1508_vm5, %v1467_v39, %v949_v29 }
 0x132   : > { %760 = vrot.lane.b32.xlu1 %v5949_v19, %s5389_s26  ;;  %v6063_v19 = vld [vmem:[%s5444_s22 + $0xb8] sm:$0xff]  }
 0x133   : > { %v1035_v53 = vpop.permute.xlu0 %1034  ;;  %v652_v32 = vshrl.u32 %v6063_v19, 16  ;;  %v834_v7 = vrot.slane %v6063_v19, 1 }
 0x134   : > { %v1037_v54 = vpop.permute.xlu1 %1036 }
 0x135   : > { %1348 = vrot.lane.b32.xlu0 %v6052_v37, %s5393_s10  ;;  %v1597_v48 = vsel %vm1573_vm6, %v1532_v44, %v1037_v54  ;;  %v6122_v15 = vsel %vm788_vm1, %v832_v21, %v834_v7 }
 0x136   : > { %762 = vrot.lane.b32.xlu1 %v5953_v22, %s5389_s26  ;;  %v1465_v22 = vsel %vm1443_vm4, %v1400_v49, %v875_v16  ;;  %v836_v16 = vrot.slane %v6075_v27, 1 }
 0x137   : > { %v1105_v26 = vpop.permute.xlu0 %1104  ;;  %v1530_v55 = vsel %vm1508_vm5, %v1465_v22, %v947_v23  ;;  %v6155_v22 = vld [vmem:[%s5444_s22 + $0xd0] sm:$0xff]  }
 0x138   : > { %v1107_v35 = vpop.permute.xlu1 %1106  ;;  %v1595_v34 = vsel %vm1573_vm6, %v1530_v55, %v1035_v53  ;;  %v6132_v29 = vsel %vm788_vm1, %v834_v7, %v836_v16 }
 0x139   : > { %890 = vrot.lane.b32.xlu0 %v5962_v25, %s5388_s25  ;;  %v648_v25 = vshll.u32 %v6063_v19, 16  ;;  %v1660_v47 = vsel %vm1638_vm7, %v1595_v34, %v1105_v26  ;;  %v1662_v9 = vsel %vm1638_vm7, %v1597_v48, %v1107_v35 }
 0x13a   : > { %892 = vrot.lane.b32.xlu1 %v5972_v42, %s5388_s25 }
 0x13b   : > { %v1177_v40 = vpop.permute.xlu0 %1176  ;;  %v650_v57 = vrot.slane %v648_v25, 1 }
 0x13c   : > { %v1179_v45 = vpop.permute.xlu1 %1178  ;;  %v1725_v59 = vsel %vm1703_vm8, %v1660_v47, %v1177_v40 }
 0x13d   : > { %962 = vrot.lane.b32.xlu0 %v5915_v41, %s5386_s23  ;;  %v1727_v52 = vsel %vm1703_vm8, %v1662_v9, %v1179_v45  ;;  %v654_v1 = vor.u32 %v652_v32, %v650_v57  ;;  %v6109_v28 = vsel %vm463_vm0, %v646_v2, %v650_v57 }
 0x13e   : > { %964 = vrot.lane.b32.xlu1 %v5983_v24, %s5386_s23 }
 0x13f   : > { %v1265_v42 = vpop.permute.xlu0 %1264  ;;  %v6113_v11 = vsel %vm463_vm0, %v654_v1, %v658_v4 }
 0x140   : > { %v1267_v58 = vpop.permute.xlu1 %1266  ;;  %v1790_v60 = vsel %vm1768_vm9, %v1725_v59, %v1265_v42  ;;  %v672_v59 = vshll.u32 %v6155_v22, 16 }
 0x141   : > { %1050 = vrot.lane.b32.xlu0 %v6029_v0, %s5390_s5  ;;  %v1792_v3 = vsel %vm1768_vm9, %v1727_v52, %v1267_v58  ;;  %v660_v58 = vshrl.u32 %v6075_v27, 16 }
 0x142   : > { %1052 = vrot.lane.b32.xlu1 %v6033_v17, %s5390_s5 }
 0x143   : > { %v1335_v30 = vpop.permute.xlu0 %1334  ;;  %v662_v32 = vor.u32 %v660_v58, %v658_v4 }
 0x144   : > { %v749_v61 = vpop.permute.xlu1 %748  ;;  %v1855_v13 = vsel %vm1833_vm10, %v1790_v60, %v1335_v30 }
 0x145   : > { %1120 = vrot.lane.b32.xlu0 %v6042_v20, %s5387_s24  ;;  %4775 = vmatprep.mubr.msk.bf16.mxu0 %vm1925_vm11, %v1855_v13  ;;  %v1404_v45 = vsel %vm1378_vm3, %v5616_v31, %v749_v61  ;;  %v6182_v13 = vrot.slane %v672_v59, 1 }
 0x146   : > { %1122 = vrot.lane.b32.xlu1 %v6052_v37, %s5387_s24 }
 0x147   : > { %v1337_v56 = vpop.permute.xlu0 %1336 }
 0x148   : > { %v751_v5 = vpop.permute.xlu1 %750  ;;  %v1857_v6 = vsel %vm1833_vm10, %v1792_v3, %v1337_v56 }
 0x149   : > { %1192 = vrot.lane.b32.xlu0 %v5995_v36, %s5391_s6  ;;  %4776 = vmatmul.mubr.msk.bf16.gmra.mrb[20].mxu0 %vm1925_vm11, %v1857_v6  ;;  %v1406_v31 = vsel %vm1378_vm3, %v5667_v63, %v751_v5  ;;  %v840_v6 = vrot.slane %v6155_v22, 1 }
 0x14a   : > { %1194 = vrot.lane.b32.xlu1 %v6063_v19, %s5391_s6 }
 0x14b   : > { %v879_v10 = vpop.permute.xlu0 %878 }
 0x14c   : > { %v881_v12 = vpop.permute.xlu1 %880 }
 0x14d   : > { %1280 = vrot.lane.b32.xlu0 %v6109_v28, %s5392_s9 }
 0x14e   : > { %1282 = vrot.lane.b32.xlu1 %v6113_v11, %s5392_s9 }
 0x14f   : > { %v951_v18 = vpop.permute.xlu0 %950 }
 0x150   : > { %v953_v23 = vpop.permute.xlu1 %952 }
 0x151   : > { %1350 = vrot.lane.b32.xlu0 %v6122_v15, %s5393_s10 }
 0x152   : > { %764 = vrot.lane.b32.xlu1 %v6029_v0, %s5389_s26  ;;  %v6143_v0 = vld [vmem:[%s5444_s22 + $0xc8] sm:$0xff]  }
 0x153   : > { %v1039_v53 = vpop.permute.xlu0 %1038  ;;  %v668_v39 = vshrl.u32 %v6143_v0, 16  ;;  %v838_v3 = vrot.slane %v6143_v0, 1 }
 0x154   : > { %v1041_v54 = vpop.permute.xlu1 %1040 }
 0x155   : > { %1352 = vrot.lane.b32.xlu0 %v6132_v29, %s5393_s10  ;;  %v6205_v5 = vsel %vm788_vm1, %v836_v16, %v838_v3 }
 0x156   : > { %766 = vrot.lane.b32.xlu1 %v6033_v17, %s5389_s26  ;;  %v1469_v17 = vsel %vm1443_vm4, %v1404_v45, %v879_v10 }
 0x157   : > { %v1109_v21 = vpop.permute.xlu0 %1108  ;;  %v1534_v49 = vsel %vm1508_vm5, %v1469_v17, %v951_v18 }
 0x158   : > { %v1111_v26 = vpop.permute.xlu1 %1110  ;;  %v1599_v25 = vsel %vm1573_vm6, %v1534_v49, %v1039_v53 }
 0x159   : > { %894 = vrot.lane.b32.xlu0 %v6042_v20, %s5388_s25  ;;  %v664_v20 = vshll.u32 %v6143_v0, 16 }
 0x15a   : > { %896 = vrot.lane.b32.xlu1 %v6052_v37, %s5388_s25 }
 0x15b   : > { %v1181_v35 = vpop.permute.xlu0 %1180  ;;  %v666_v34 = vrot.slane %v664_v20, 1 }
 0x15c   : > { %v1183_v40 = vpop.permute.xlu1 %1182 }
 0x15d   : > { %966 = vrot.lane.b32.xlu0 %v5995_v36, %s5386_s23  ;;  %v1664_v36 = vsel %vm1638_vm7, %v1599_v25, %v1109_v21  ;;  %v670_v61 = vor.u32 %v668_v39, %v666_v34  ;;  %v6191_v2 = vsel %vm463_vm0, %v662_v32, %v666_v34 }
 0x15e   : > { %968 = vrot.lane.b32.xlu1 %v6063_v19, %s5386_s23  ;;  %v1471_v19 = vsel %vm1443_vm4, %v1406_v31, %v881_v12  ;;  %v1729_v42 = vsel %vm1703_vm8, %v1664_v36, %v1181_v35  ;;  %v6215_v12 = vsel %vm788_vm1, %v838_v3, %v840_v6  ;;  %v676_v36 = vshrl.u32 %v6155_v22, 16 }
 0x15f   : > { %v1269_v37 = vpop.permute.xlu0 %1268  ;;  %v1536_v14 = vsel %vm1508_vm5, %v1471_v19, %v953_v23  ;;  %v6196_v1 = vsel %vm463_vm0, %v670_v61, %v6182_v13 }
 0x160   : > { %v1271_v55 = vpop.permute.xlu1 %1270  ;;  %v1794_v47 = vsel %vm1768_vm9, %v1729_v42, %v1269_v37  ;;  %v1601_v57 = vsel %vm1573_vm6, %v1536_v14, %v1041_v54 }
 0x161   : > { %1054 = vrot.lane.b32.xlu0 %v6109_v28, %s5390_s5  ;;  %v1666_v60 = vsel %vm1638_vm7, %v1601_v57, %v1111_v26  ;;  %v678_v57 = vor.u32 %v676_v36, %v6182_v13 }
 0x162   : > { %1056 = vrot.lane.b32.xlu1 %v6113_v11, %s5390_s5  ;;  %v1731_v30 = vsel %vm1703_vm8, %v1666_v60, %v1183_v40 }
 0x163   : > { %v1339_v63 = vpop.permute.xlu0 %1338  ;;  %v1796_v51 = vsel %vm1768_vm9, %v1731_v30, %v1271_v55 }
 0x164   : > { %v753_v50 = vpop.permute.xlu1 %752  ;;  %v1859_v44 = vsel %vm1833_vm10, %v1794_v47, %v1339_v63 }
 0x165   : > { %1124 = vrot.lane.b32.xlu0 %v6122_v15, %s5387_s24  ;;  %4779 = vmatprep.mubr.msk.bf16.mxu0 %vm1925_vm11, %v1859_v44  ;;  %v1408_v35 = vsel %vm1378_vm3, %v5678_v8, %v753_v50  ;;  %v6246_v8 = vld [vmem:[%s5444_s22 + $0xe0] sm:$0xff]  }
 0x166   : > { %1126 = vrot.lane.b32.xlu1 %v6132_v29, %s5387_s24  ;;  %v688_v58 = vshll.u32 %v6246_v8, 16 }
 0x167   : > { %v1341_v48 = vpop.permute.xlu0 %1340 }
 0x168   : > { %v755_v9 = vpop.permute.xlu1 %754  ;;  %v1861_v52 = vsel %vm1833_vm10, %v1796_v51, %v1341_v48  ;;  %v6274_v30 = vrot.slane %v688_v58, 1 }
 0x169   : > { %1196 = vrot.lane.b32.xlu0 %v6075_v27, %s5391_s6  ;;  %4780 = vmatmul.mubr.msk.bf16.gmra.mrb[24].mxu0 %vm1925_vm11, %v1861_v52 }
 0x16a   : > { %1198 = vrot.lane.b32.xlu1 %v6143_v0, %s5391_s6 }
 0x16b   : > { %v883_v56 = vpop.permute.xlu0 %882 }
 0x16c   : > { %v885_v4 = vpop.permute.xlu1 %884 }
 0x16d   : > { %1284 = vrot.lane.b32.xlu0 %v6191_v2, %s5392_s9 }
 0x16e   : > { %1286 = vrot.lane.b32.xlu1 %v6196_v1, %s5392_s9 }
 0x16f   : > { %v955_v7 = vpop.permute.xlu0 %954 }
 0x170   : > { %v957_v10 = vpop.permute.xlu1 %956 }
 0x171   : > { %1354 = vrot.lane.b32.xlu0 %v6205_v5, %s5393_s10 }
 0x172   : > { %768 = vrot.lane.b32.xlu1 %v6109_v28, %s5389_s26  ;;  %v6226_v28 = vld [vmem:[%s5444_s22 + $0xd8] sm:$0xff]  }
 0x173   : > { %v1043_v18 = vpop.permute.xlu0 %1042  ;;  %v684_v34 = vshrl.u32 %v6226_v28, 16  ;;  %v842_v61 = vrot.slane %v6226_v28, 1 }
 0x174   : > { %v1045_v23 = vpop.permute.xlu1 %1044 }
 0x175   : > { %1356 = vrot.lane.b32.xlu0 %v6215_v12, %s5393_s10  ;;  %v6297_v3 = vsel %vm788_vm1, %v840_v6, %v842_v61 }
 0x176   : > { %770 = vrot.lane.b32.xlu1 %v6113_v11, %s5389_s26  ;;  %v1473_v11 = vsel %vm1443_vm4, %v1408_v35, %v883_v56  ;;  %v844_v56 = vrot.slane %v6246_v8, 1 }
 0x177   : > { %v1113_v16 = vpop.permute.xlu0 %1112  ;;  %v1538_v45 = vsel %vm1508_vm5, %v1473_v11, %v955_v7 }
 0x178   : > { %v1115_v53 = vpop.permute.xlu1 %1114  ;;  %v1603_v49 = vsel %vm1573_vm6, %v1538_v45, %v1043_v18 }
 0x179   : > { %898 = vrot.lane.b32.xlu0 %v6122_v15, %s5388_s25  ;;  %v1668_v25 = vsel %vm1638_vm7, %v1603_v49, %v1113_v16 }
 0x17a   : > { %900 = vrot.lane.b32.xlu1 %v6132_v29, %s5388_s25  ;;  %v680_v29 = vshll.u32 %v6226_v28, 16 }
 0x17b   : > { %v1185_v54 = vpop.permute.xlu0 %1184 }
 0x17c   : > { %v1187_v21 = vpop.permute.xlu1 %1186  ;;  %v6228_v26 = vpop.f32.mrb[0].mxu0  ;;  %v1733_v55 = vsel %vm1703_vm8, %v1668_v25, %v1185_v54  ;;  %v682_v31 = vrot.slane %v680_v29, 1 }
 0x17d   : > { %v6232_v40 = vpop.f32.mrb[1].mxu0  ;;  %970 = vrot.lane.b32.xlu0 %v6075_v27, %s5386_s23  ;;  %v1410_v27 = vsel %vm1378_vm3, %v5743_v43, %v755_v9 }
 0x17e   : > { %972 = vrot.lane.b32.xlu1 %v6143_v0, %s5386_s23  ;;  %v6239_v15 = vpop.f32.mrb[2].mxu0  ;;  %v1475_v0 = vsel %vm1443_vm4, %v1410_v27, %v885_v4  ;;  %v686_v60 = vor.u32 %v684_v34, %v682_v31  ;;  %v6283_v48 = vsel %vm463_vm0, %v678_v57, %v682_v31 }
 0x17f   : > { %v6243_v17 = vpop.f32.mrb[3].mxu0  ;;  %v1273_v20 = vpop.permute.xlu0 %1272  ;;  %v1540_v19 = vsel %vm1508_vm5, %v1475_v0, %v957_v10  ;;  %v6307_v10 = vsel %vm788_vm1, %v842_v61, %v844_v56 }
 0x180   : > { %v1275_v37 = vpop.permute.xlu1 %1274  ;;  %v1798_v42 = vsel %vm1768_vm9, %v1733_v55, %v1273_v20  ;;  %v1605_v14 = vsel %vm1573_vm6, %v1540_v19, %v1045_v23  ;;  %v6288_v9 = vsel %vm463_vm0, %v686_v60, %v6274_v30  ;;  %v692_v55 = vshrl.u32 %v6246_v8, 16 }
 0x181   : > { %1058 = vrot.lane.b32.xlu0 %v6191_v2, %s5390_s5  ;;  %v1670_v39 = vsel %vm1638_vm7, %v1605_v14, %v1115_v53 }
 0x182   : > { %1060 = vrot.lane.b32.xlu1 %v6196_v1, %s5390_s5  ;;  %v1735_v59 = vsel %vm1703_vm8, %v1670_v39, %v1187_v21 }
 0x183   : > { %v1343_v43 = vpop.permute.xlu0 %1342  ;;  %v1800_v50 = vsel %vm1768_vm9, %v1735_v59, %v1275_v37 }
 0x184   : > { %v757_v47 = vpop.permute.xlu1 %756  ;;  %v1863_v63 = vsel %vm1833_vm10, %v1798_v42, %v1343_v43 }
 0x185   : > { %1128 = vrot.lane.b32.xlu0 %v6205_v5, %s5387_s24  ;;  %4783 = vmatprep.mubr.msk.bf16.mxu0 %vm1925_vm11, %v1863_v63  ;;  %v1412_v35 = vsel %vm1378_vm3, %v5755_v62, %v757_v47  ;;  %v6338_v62 = vld [vmem:[%s5444_s22 + $0xf0] sm:$0xff]   ;;  %v694_v63 = vor.u32 %v692_v55, %v6274_v30 }
 0x186   : > { %1130 = vrot.lane.b32.xlu1 %v6215_v12, %s5387_s24  ;;  %v704_v42 = vshll.u32 %v6338_v62, 16 }
 0x187   : > { %v1345_v44 = vpop.permute.xlu0 %1344 }
 0x188   : > { %v759_v32 = vpop.permute.xlu1 %758  ;;  %v1865_v51 = vsel %vm1833_vm10, %v1800_v50, %v1345_v44  ;;  %v6366_v50 = vrot.slane %v704_v42, 1 }
 0x189   : > { %1200 = vrot.lane.b32.xlu0 %v6155_v22, %s5391_s6  ;;  %4784 = vmatmul.mubr.msk.bf16.gmra.mrb[28].mxu0 %vm1925_vm11, %v1865_v51 }
 0x18a   : > { %1202 = vrot.lane.b32.xlu1 %v6226_v28, %s5391_s6 }
 0x18b   : > { %v887_v13 = vpop.permute.xlu0 %886 }
 0x18c   : > { %v889_v52 = vpop.permute.xlu1 %888 }
 0x18d   : > { %1288 = vrot.lane.b32.xlu0 %v6283_v48, %s5392_s9 }
 0x18e   : > { %1290 = vrot.lane.b32.xlu1 %v6288_v9, %s5392_s9 }
 0x18f   : > { %v959_v4 = vpop.permute.xlu0 %958 }
 0x190   : > { %v961_v7 = vpop.permute.xlu1 %960 }
 0x191   : > { %1358 = vrot.lane.b32.xlu0 %v6297_v3, %s5393_s10 }
 0x192   : > { %772 = vrot.lane.b32.xlu1 %v6191_v2, %s5389_s26  ;;  %v6318_v2 = vld [vmem:[%s5444_s22 + $0xe8] sm:$0xff]  }
 0x193   : > { %v1047_v18 = vpop.permute.xlu0 %1046  ;;  %v700_v19 = vshrl.u32 %v6318_v2, 16  ;;  %v846_v30 = vrot.slane %v6318_v2, 1 }
 0x194   : > { %v1049_v23 = vpop.permute.xlu1 %1048 }
 0x195   : > { %1360 = vrot.lane.b32.xlu0 %v6307_v10, %s5393_s10 }
 0x196   : > { %774 = vrot.lane.b32.xlu1 %v6196_v1, %s5389_s26  ;;  %v1477_v1 = vsel %vm1443_vm4, %v1412_v35, %v887_v13 }
 0x197   : > { %v1117_v6 = vpop.permute.xlu0 %1116  ;;  %v1542_v29 = vsel %vm1508_vm5, %v1477_v1, %v959_v4  ;;  %v848_v4 = vrot.slane %v6338_v62, 1 }
 0x198   : > { %v1119_v16 = vpop.permute.xlu1 %1118  ;;  %v1607_v49 = vsel %vm1573_vm6, %v1542_v29, %v1047_v18  ;;  %v292_v29 = vld [vmem:[%s5444_s22 + $0x104] sm:$0xf] }
 0x199   : > { %902 = vrot.lane.b32.xlu0 %v6205_v5, %s5388_s25  ;;  %v1672_v27 = vsel %vm1638_vm7, %v1607_v49, %v1117_v6 }
 0x19a   : > { %904 = vrot.lane.b32.xlu1 %v6215_v12, %s5388_s25  ;;  %v696_v12 = vshll.u32 %v6318_v2, 16 }
 0x19b   : > { %v1189_v53 = vpop.permute.xlu0 %1188 }
 0x19c   : > { %v1191_v54 = vpop.permute.xlu1 %1190  ;;  %v6320_v21 = vpop.f32.mrb[4].mxu0  ;;  %v1737_v25 = vsel %vm1703_vm8, %v1672_v27, %v1189_v53  ;;  %v698_v0 = vrot.slane %v696_v12, 1  ;;  %v6415_v12 = vld [vmem:[%s5444_s22 + $0x100] sm:$0xf] }
 0x19d   : > { %v6324_v11 = vpop.f32.mrb[5].mxu0  ;;  %974 = vrot.lane.b32.xlu0 %v6155_v22, %s5386_s23  ;;  %v1414_v22 = vsel %vm1378_vm3, %v5823_v38, %v759_v32 }
 0x19e   : > { %976 = vrot.lane.b32.xlu1 %v6226_v28, %s5386_s23  ;;  %v6331_v5 = vpop.f32.mrb[6].mxu0  ;;  %v1479_v28 = vsel %vm1443_vm4, %v1414_v22, %v889_v52  ;;  %v702_v57 = vor.u32 %v700_v19, %v698_v0  ;;  %v6375_v32 = vsel %vm463_vm0, %v694_v63, %v698_v0  ;;  %v6389_v52 = vsel %vm788_vm1, %v844_v56, %v846_v30 }
 0x19f   : > { %v6335_v45 = vpop.f32.mrb[7].mxu0  ;;  %v1277_v20 = vpop.permute.xlu0 %1276  ;;  %v1544_v31 = vsel %vm1508_vm5, %v1479_v28, %v961_v7 }
 0x1a0   : > { %v1279_v37 = vpop.permute.xlu1 %1278  ;;  %v1802_v36 = vsel %vm1768_vm9, %v1737_v25, %v1277_v20  ;;  %v1609_v43 = vsel %vm1573_vm6, %v1544_v31, %v1049_v23  ;;  %v6380_v61 = vsel %vm463_vm0, %v702_v57, %v6366_v50  ;;  %v6399_v23 = vsel %vm788_vm1, %v846_v30, %v848_v4 }
 0x1a1   : > { %1062 = vrot.lane.b32.xlu0 %v6283_v48, %s5390_s5  ;;  %v1674_v14 = vsel %vm1638_vm7, %v1609_v43, %v1119_v16 }
 0x1a2   : > { %1064 = vrot.lane.b32.xlu1 %v6288_v9, %s5390_s5  ;;  %v1739_v47 = vsel %vm1703_vm8, %v1674_v14, %v1191_v54 }
 0x1a3   : > { %v1347_v38 = vpop.permute.xlu0 %1346  ;;  %v1804_v39 = vsel %vm1768_vm9, %v1739_v47, %v1279_v37 }
 0x1a4   : > { %v761_v34 = vpop.permute.xlu1 %760  ;;  %v1867_v58 = vsel %vm1833_vm10, %v1802_v36, %v1347_v38  ;;  %v708_v36 = vshrl.u32 %v6338_v62, 16 }
 0x1a5   : > { %1132 = vrot.lane.b32.xlu0 %v6297_v3, %s5387_s24  ;;  %4787 = vmatprep.mubr.msk.bf16.mxu0 %vm1925_vm11, %v1867_v58 }
 0x1a6   : > { %1134 = vrot.lane.b32.xlu1 %v6307_v10, %s5387_s24 }
 0x1a7   : > { %v1349_v59 = vpop.permute.xlu0 %1348 }
 0x1a8   : > { %v763_v44 = vpop.permute.xlu1 %762  ;;  %v1869_v60 = vsel %vm1833_vm10, %v1804_v39, %v1349_v59  ;;  %v710_v39 = vor.u32 %v708_v36, %v6366_v50 }
 0x1a9   : > { %1204 = vrot.lane.b32.xlu0 %v6246_v8, %s5391_s6  ;;  %4788 = vmatmul.mubr.msk.bf16.gmra.mrb[32].mxu0 %vm1925_vm11, %v1869_v60  ;;  %v1418_v25 = vsel %vm1378_vm3, %v5903_v33, %v763_v44 }
 0x1aa   : > { %1206 = vrot.lane.b32.xlu1 %v6318_v2, %s5391_s6 }
 0x1ab   : > { %v891_v51 = vpop.permute.xlu0 %890 }
 0x1ac   : > { %v893_v13 = vpop.permute.xlu1 %892 }
 0x1ad   : > { %1292 = vrot.lane.b32.xlu0 %v6375_v32, %s5392_s9  ;;  %v1483_v0 = vsel %vm1443_vm4, %v1418_v25, %v893_v13  ;;  %v296_v25 = vld [vmem:[%s5444_s22 + $0x114] sm:$0xf] }
 0x1ae   : > { %1294 = vrot.lane.b32.xlu1 %v6380_v61, %s5392_s9 }
 0x1af   : > { %v963_v7 = vpop.permute.xlu0 %962 }
 0x1b0   : > { %v965_v18 = vpop.permute.xlu1 %964 }
 0x1b1   : > { %1362 = vrot.lane.b32.xlu0 %v6389_v52, %s5393_s10  ;;  %v1548_v38 = vsel %vm1508_vm5, %v1483_v0, %v965_v18 }
 0x1b2   : > { %776 = vrot.lane.b32.xlu1 %v6283_v48, %s5389_s26  ;;  %v6410_v48 = vld [vmem:[%s5444_s22 + $0xf8] sm:$0xff]  }
 0x1b3   : > { %v1051_v6 = vpop.permute.xlu0 %1050  ;;  %v712_v49 = vshll.u32 %v6410_v48, 16  ;;  %v716_v42 = vshrl.u32 %v6410_v48, 16  ;;  %v6476_v13 = vrot.slane %v6410_v48, 1 }
 0x1b4   : > { %v1053_v56 = vpop.permute.xlu1 %1052 }
 0x1b5   : > { %1364 = vrot.lane.b32.xlu0 %v6399_v23, %s5393_s10  ;;  %v714_v31 = vrot.slane %v712_v49, 1  ;;  %v6510_v49 = vld [vmem:[%s5444_s22 + $0x108] sm:$0xff]  }
 0x1b6   : > { %778 = vrot.lane.b32.xlu1 %v6288_v9, %s5389_s26  ;;  %v1416_v9 = vsel %vm1378_vm3, %v5835_v46, %v761_v34  ;;  %v6434_v46 = vcombine.low %v6415_v12, %v292_v29  ;;  %v1613_v34 = vsel %vm1573_vm6, %v1548_v38, %v1053_v56  ;;  %v6488_v56 = vsel %vm788_vm1, %v848_v4, %v6476_v13 }
 0x1b7   : > { %v1121_v16 = vpop.permute.xlu0 %1120  ;;  %v6462_v44 = vor.u32 %v716_v42, %v714_v31  ;;  %v6473_v50 = vsel %vm463_vm0, %v710_v39, %v714_v31 }
 0x1b8   : > { %v1123_v53 = vpop.permute.xlu1 %1122  ;;  %v994_v43 = vshll.u32 %v6434_v46, 16 }
 0x1b9   : > { %906 = vrot.lane.b32.xlu0 %v6297_v3, %s5388_s25  ;;  %v1481_v3 = vsel %vm1443_vm4, %v1416_v9, %v891_v51  ;;  %v1678_v47 = vsel %vm1638_vm7, %v1613_v34, %v1123_v53 }
 0x1ba   : > { %908 = vrot.lane.b32.xlu1 %v6307_v10, %s5388_s25  ;;  %v1546_v37 = vsel %vm1508_vm5, %v1481_v3, %v963_v7  ;;  %v6464_v60 = vrot.slane %v994_v43, 1 }
 0x1bb   : > { %v1193_v54 = vpop.permute.xlu0 %1192  ;;  %v1611_v28 = vsel %vm1573_vm6, %v1546_v37, %v1051_v6 }
 0x1bc   : > { %v1195_v35 = vpop.permute.xlu1 %1194  ;;  %v6412_v1 = vpop.f32.mrb[8].mxu0  ;;  %v997_v18 = vsel %vm463_vm0, %v6462_v44, %v6464_v60 }
 0x1bd   : > { %v6420_v20 = vpop.f32.mrb[9].mxu0  ;;  %978 = vrot.lane.b32.xlu0 %v6246_v8, %s5386_s23  ;;  %v1743_v63 = vsel %vm1703_vm8, %v1678_v47, %v1195_v35  ;;  %v998_v47 = vshrl.u32 %v6434_v46, 16 }
 0x1be   : > { %980 = vrot.lane.b32.xlu1 %v6318_v2, %s5386_s23  ;;  %v6427_v10 = vpop.f32.mrb[10].mxu0  ;;  %v1676_v2 = vsel %vm1638_vm7, %v1611_v28, %v1121_v16  ;;  %v1078_v16 = vrot.slane %v6434_v46, 1 }
 0x1bf   : > { %v6431_v22 = vpop.f32.mrb[11].mxu0  ;;  %v1281_v27 = vpop.permute.xlu0 %1280  ;;  %v1741_v55 = vsel %vm1703_vm8, %v1676_v2, %v1193_v54 }
 0x1c0   : > { %v1283_v8 = vpop.permute.xlu1 %1282  ;;  %v1806_v19 = vsel %vm1768_vm9, %v1741_v55, %v1281_v27  ;;  %v1079_v35 = vsel %vm788_vm1, %v6476_v13, %v1078_v16 }
 0x1c1   : > { %1066 = vrot.lane.b32.xlu0 %v6375_v32, %s5390_s5  ;;  %v1808_v59 = vsel %vm1768_vm9, %v1743_v63, %v1283_v8  ;;  %v295_v8 = vld [vmem:[%s5444_s22 + $0x110] sm:$0xf] }
 0x1c2   : > { %1068 = vrot.lane.b32.xlu1 %v6380_v61, %s5390_s5  ;;  %v6545_v38 = vcombine.low %v295_v8, %v296_v25 }
 0x1c3   : > { %v1351_v33 = vpop.permute.xlu0 %1350 }
 0x1c4   : > { %v765_v58 = vpop.permute.xlu1 %764  ;;  %v1871_v14 = vsel %vm1833_vm10, %v1806_v19, %v1351_v33 }
 0x1c5   : > { %1136 = vrot.lane.b32.xlu0 %v6389_v52, %s5387_s24  ;;  %4791 = vmatprep.mubr.msk.bf16.mxu0 %vm1925_vm11, %v1871_v14 }
 0x1c6   : > { %1138 = vrot.lane.b32.xlu1 %v6399_v23, %s5387_s24 }
 0x1c7   : > { %v1353_v57 = vpop.permute.xlu0 %1352 }
 0x1c8   : > { %v767_v30 = vpop.permute.xlu1 %766  ;;  %v1873_v51 = vsel %vm1833_vm10, %v1808_v59, %v1353_v57  ;;  %v1006_v59 = vshrl.u32 %v6510_v49, 16  ;;  %v1224_v57 = vshll.u32 %v6545_v38, 16 }
 0x1c9   : > { %1208 = vrot.lane.b32.xlu0 %v6338_v62, %s5391_s6  ;;  %4792 = vmatmul.mubr.msk.bf16.gmra.mrb[36].mxu0 %vm1925_vm11, %v1873_v51  ;;  %v1422_v42 = vsel %vm1378_vm3, %v5983_v24, %v767_v30 }
 0x1ca   : > { %1210 = vrot.lane.b32.xlu1 %v6410_v48, %s5391_s6 }
 0x1cb   : > { %v895_v7 = vpop.permute.xlu0 %894 }
 0x1cc   : > { %v897_v6 = vpop.permute.xlu1 %896 }
 0x1cd   : > { %1296 = vrot.lane.b32.xlu0 %v6473_v50, %s5392_s9 }
 0x1ce   : > { %1298 = vrot.lane.b32.xlu1 %v997_v18, %s5392_s9 }
 0x1cf   : > { %v967_v53 = vpop.permute.xlu0 %966 }
 0x1d0   : > { %v969_v54 = vpop.permute.xlu1 %968 }
 0x1d1   : > { %1366 = vrot.lane.b32.xlu0 %v6488_v56, %s5393_s10 }
 0x1d2   : > { %780 = vrot.lane.b32.xlu1 %v6375_v32, %s5389_s26  ;;  %v6505_v32 = vld [vmem:[%s7697_s2] ss:$0 sm:$0xff] }
 0x1d3   : > { %v1055_v29 = vpop.permute.xlu0 %1054  ;;  %v6516_v27 = vadd.f32 %v6228_v26, %v6505_v32  ;;  %v6524_v2 = vadd.f32 %v6505_v32, %v6232_v40  ;;  %v1002_v26 = vshll.u32 %v6510_v49, 16 }
 0x1d4   : > { %v1057_v4 = vpop.permute.xlu1 %1056 }
 0x1d5   : > { %1368 = vrot.lane.b32.xlu0 %v1079_v35, %s5393_s10  ;;  %v4387_v33 = vmul.f32 -1.442695, %v6524_v2  ;;  %v1004_v43 = vrot.slane %v1002_v26, 1  ;;  %vm3198_vm14 = vcmp.gt.f32.partialorder %v6516_v27, 0.0 }
 0x1d6   : > { %782 = vrot.lane.b32.xlu1 %v6380_v61, %s5389_s26 }
 0x1d7   : > { %v1125_v9 = vpop.permute.xlu0 %1124 }
 0x1d8   : > { %v1127_v3 = vpop.permute.xlu1 %1126 }
 0x1d9   : > { %910 = vrot.lane.b32.xlu0 %v6389_v52, %s5388_s25  ;;  %v1420_v52 = vsel %vm1378_vm3, %v5915_v41, %v765_v58  ;;  %v1487_v58 = vsel %vm1443_vm4, %v1422_v42, %v897_v6 }
 0x1da   : > { %912 = vrot.lane.b32.xlu1 %v6399_v23, %s5388_s25  ;;  %v6535_v23 = vadd.f32 %v6239_v15, %v6505_v32  ;;  %v1485_v55 = vsel %vm1443_vm4, %v1420_v52, %v895_v7  ;;  %v1552_v63 = vsel %vm1508_vm5, %v1487_v58, %v969_v54 }
 0x1db   : > { %v1197_v37 = vpop.permute.xlu0 %1196  ;;  %v1550_v41 = vsel %vm1508_vm5, %v1485_v55, %v967_v53  ;;  %v1617_v30 = vsel %vm1573_vm6, %v1552_v63, %v1057_v4  ;;  %v1000_v53 = vor.u32 %v998_v47, %v6464_v60  ;;  %v6576_v4 = vor.u32 %v1006_v59, %v1004_v43  ;;  %v6643_v63 = vld [vmem:[%s5444_s22 + $0x118] sm:$0xff]  }
 0x1dc   : > { %v1199_v61 = vpop.permute.xlu1 %1198  ;;  %v6518_v28 = vpop.f32.mrb[12].mxu0  ;;  %v1615_v19 = vsel %vm1573_vm6, %v1550_v41, %v1055_v29  ;;  %v4390_v34 = vmul.f32 -1.442695, %v6535_v23  ;;  %v4347_v41 = vcombine.low %v295_v8, %v295_v8  ;;  %v6634_v47 = vadd.f32 %v6331_v5, %v6505_v32 }
 0x1dd   : > { %v6528_v0 = vpop.f32.mrb[13].mxu0  ;;  %982 = vrot.lane.b32.xlu0 %v6338_v62, %s5386_s23  ;;  %v4389_v62 = vmul.f32 -1.442695, %v6516_v27  ;;  %v6595_v60 = vsel %vm463_vm0, %v1000_v53, %v1004_v43  ;;  %v1232_v53 = vshll.u32 %v6643_v63, 16  ;;  %vm3199_vm13 = vcmp.gt.f32.partialorder %v6535_v23, 0.0 }
 0x1de   : > { %984 = vrot.lane.b32.xlu1 %v6410_v48, %s5386_s23  ;;  %v6540_v40 = vpop.f32.mrb[14].mxu0  ;;  %v1680_v48 = vsel %vm1638_vm7, %v1615_v19, %v1125_v9  ;;  %v6578_v9 = vrot.slane %v1224_v57, 1  ;;  %v1308_v19 = vrot.slane %v6545_v38, 1  ;;  %v6656_v57 = vadd.f32 %v6412_v1, %v6505_v32 }
 0x1df   : > { %v6543_v31 = vpop.f32.mrb[15].mxu0  ;;  %v1285_v36 = vpop.permute.xlu0 %1284  ;;  %v1745_v14 = vsel %vm1703_vm8, %v1680_v48, %v1197_v37  ;;  %4967 = vpow2.f32 %v4389_v62  ;;  %v6584_v37 = vadd.f32 %v6505_v32, %v6243_v17  ;;  %v6622_v48 = vadd.f32 %v6320_v21, %v6505_v32 }
 0x1e0   : > { %v1287_v15 = vpop.permute.xlu1 %1286  ;;  %v1810_v24 = vsel %vm1768_vm9, %v1745_v14, %v1285_v36  ;;  %4969 = vpow2.f32 %v4387_v33  ;;  %v6669_v1 = vadd.f32 %v6427_v10, %v6505_v32  ;;  %v6683_v10 = vadd.f32 %v6540_v40, %v6505_v32 }
 0x1e1   : > { %1070 = vrot.lane.b32.xlu0 %v6473_v50, %s5390_s5  ;;  %4971 = vpow2.f32 %v4390_v34  ;;  %v4388_v26 = vmul.f32 -1.442695, %v6584_v37  ;;  %v1010_v34 = vshll.u32 %v4347_v41, 16  ;;  %vm3203_vm2 = vcmp.gt.f32.partialorder %v6634_v47, 0.0 }
 0x1e2   : > { %1072 = vrot.lane.b32.xlu1 %v997_v18, %s5390_s5  ;;  %v1682_v18 = vsel %vm1638_vm7, %v1617_v30, %v1127_v3  ;;  %v4344_v3 = vcombine.low %v6415_v12, %v6415_v12  ;;  %v6598_v12 = vrot.slane %v6510_v49, 1 }
 0x1e3   : > { %v1355_v39 = vpop.permute.xlu0 %1354  ;;  %v1747_v6 = vsel %vm1703_vm8, %v1682_v18, %v1199_v61  ;;  %v1227_v61 = vsel %vm463_vm0, %v6576_v4, %v6578_v9  ;;  %4973 = vpow2.f32 %v4388_v26  ;;  %v6690_v26 = vld [vmem:[%s5444_s22 + $0x120] ss:$0 sps:$4 sm:$0xff]  }
 0x1e4   : > { %v6565_v51 = vpop.permute.xlu1 %768  ;;  %v1875_v7 = vsel %vm1833_vm10, %v1810_v24, %v1355_v39  ;;  %v1812_v54 = vsel %vm1768_vm9, %v1747_v6, %v1287_v15  ;;  %v720_v52 = vshll.u32 %v4344_v3, 16  ;;  %v6615_v62 = vsel %vm788_vm1, %v1078_v16, %v6598_v12 }
 0x1e5   : > { %1140 = vrot.lane.b32.xlu0 %v6488_v56, %s5387_s24  ;;  %4795 = vmatprep.mubr.msk.bf16.mxu0 %vm1925_vm11, %v1875_v7  ;;  %v6628_v16 = vadd.f32 %v6505_v32, %v6335_v45  ;;  %v1309_v21 = vsel %vm788_vm1, %v6598_v12, %v1308_v19  ;;  %v6647_v24 = vadd.f32 %v6505_v32, %v6324_v11  ;;  %v852_v59 = vrot.slane %v4344_v3, 1 }
 0x1e6   : > { %1142 = vrot.lane.b32.xlu1 %v1079_v35, %s5387_s24  ;;  %v722_v42 = vrot.slane %v720_v52, 1  ;;  %v1012_v7 = vrot.slane %v1010_v34, 1  ;;  %v6663_v11 = vadd.f32 %v6505_v32, %v6431_v22  ;;  %v4394_v6 = vmul.f32 -1.442695, %v6634_v47 }
 0x1e7   : > { %v1357_v29 = vpop.permute.xlu0 %1356  ;;  %v4392_v18 = vmul.f32 -1.442695, %v6628_v16  ;;  %v6676_v22 = vadd.f32 %v6505_v32, %v6420_v20  ;;  %v853_v3 = vsel %vm788_vm1, %v6476_v13, %v852_v59  ;;  %v6695_v13 = vadd.f32 %v6505_v32, %v6543_v31 }
 0x1e8   : > { %v6586_v25 = vpop.permute.xlu1 %770  ;;  %v1877_v35 = vsel %vm1833_vm10, %v1812_v54, %v1357_v29  ;;  %v723_v5 = vsel %vm463_vm0, %v6462_v44, %v722_v42  ;;  %v1082_v44 = vrot.slane %v4347_v41, 1  ;;  %v4391_v54 = vmul.f32 -1.442695, %v6647_v24 }
 0x1e9   : > { %1212 = vrot.lane.b32.xlu0 %v6434_v46, %s5391_s6  ;;  %4796 = vmatmul.mubr.msk.bf16.gmra.mrb[40].mxu0 %vm1925_vm11, %v1877_v35  ;;  %v4968_v36 = vpop.eup %4967  ;;  %v4397_v35 = vmul.f32 -1.442695, %v6656_v57  ;;  %v1013_v52 = vsel %vm463_vm0, %v6576_v4, %v1012_v7  ;;  %v4396_v20 = vmul.f32 -1.442695, %v6663_v11  ;;  %v4398_v4 = vmul.f32 -1.442695, %v6669_v1 }
 0x1ea   : > { %1214 = vrot.lane.b32.xlu1 %v6510_v49, %s5391_s6  ;;  %v4970_v15 = vpop.eup %4969  ;;  %v2477_v58 = vadd.f32 1.0, %v4968_v36  ;;  %v6701_v40 = vsel %vm788_vm1, %v6598_v12, %v1082_v44  ;;  %v6706_v36 = vadd.f32 %v6518_v28, %v6505_v32  ;;  %v6709_v31 = vrot.slane %v1232_v53, 1 }
 0x1eb   : > { %v6600_v17 = vpop.permute.xlu0 %898  ;;  %v4972_v8 = vpop.eup %4971  ;;  %v2475_v14 = vadd.f32 1.0, %v4970_v15  ;;  %v6714_v12 = vadd.f32 %v6505_v32, %v6528_v0  ;;  %v1236_v42 = vshrl.u32 %v6643_v63, 16 }
 0x1ec   : > { %v6606_v55 = vpop.permute.xlu1 %900  ;;  %v2478_v45 = vadd.f32 1.0, %v4972_v8  ;;  %4975 = vrcp.f32 %v2477_v58  ;;  %v4402_v8 = vmul.f32 -1.442695, %v6683_v10  ;;  %v1240_v58 = vshll.u32 %v6690_v26, 16 }
 0x1ed   : > { %1300 = vrot.lane.b32.xlu0 %v6595_v60, %s5392_s9  ;;  %4977 = vrcp.f32 %v2475_v14  ;;  %v4974_v41 = vpop.eup %4973  ;;  %v1228_v14 = vshrl.u32 %v6545_v38, 16 }
 0x1ee   : > { %1302 = vrot.lane.b32.xlu1 %v1227_v61, %s5392_s9  ;;  %4979 = vrcp.f32 %v2478_v45  ;;  %v4400_v45 = vmul.f32 -1.442695, %v6695_v13 }
 0x1ef   : > { %v6618_v33 = vpop.permute.xlu0 %970 }
 0x1f0   : > { %v6624_v43 = vpop.permute.xlu1 %972 }
 0x1f1   : > { %1370 = vrot.lane.b32.xlu0 %v6615_v62, %s5393_s10 }
 0x1f2   : > { %784 = vrot.lane.b32.xlu1 %v6473_v50, %s5389_s26  ;;  %v4393_v50 = vmul.f32 -1.442695, %v6622_v48 }
 0x1f3   : > { %v6649_v39 = vpop.permute.xlu0 %1058 }
 0x1f4   : > { %v6658_v30 = vpop.permute.xlu1 %1060  ;;  %4981 = vpow2.f32 %v4393_v50  ;;  %v4401_v50 = vmul.f32 -1.442695, %v6706_v36 }
 0x1f5   : > { %1372 = vrot.lane.b32.xlu0 %v1309_v21, %s5393_s10  ;;  %4983 = vpow2.f32 %v4392_v18  ;;  %v2476_v21 = vadd.f32 1.0, %v4974_v41 }
 0x1f6   : > { %786 = vrot.lane.b32.xlu1 %v723_v5, %s5389_s26  ;;  %4985 = vpow2.f32 %v4394_v6  ;;  %v5351_v5 = vld [vmem:[%s5444_s22 + $0xb0] sm:$0xff]   ;;  %v6736_v6 = vpop.eup %4975 }
 0x1f7   : > { %v1129_v29 = vpop.permute.xlu0 %1128  ;;  %4987 = vpow2.f32 %v4391_v54  ;;  %v1424_v0 = vsel %vm1378_vm3, %v5351_v5, %v6565_v51  ;;  %v4399_v51 = vmul.f32 -1.442695, %v6714_v12 }
 0x1f8   : > { %v6685_v61 = vpop.permute.xlu1 %1130  ;;  %4989 = vpow2.f32 %v4397_v35  ;;  %v1489_v7 = vsel %vm1443_vm4, %v1424_v0, %v6600_v17 }
 0x1f9   : > { %914 = vrot.lane.b32.xlu0 %v6488_v56, %s5388_s25  ;;  %v4395_v56 = vmul.f32 -1.442695, %v6676_v22  ;;  %4991 = vpow2.f32 %v4396_v20 }
 0x1fa   : > { %916 = vrot.lane.b32.xlu1 %v853_v3, %s5388_s25  ;;  %4993 = vpow2.f32 %v4398_v4  ;;  %v6744_v3 = vpop.eup %4977 }
 0x1fb   : > { %v1201_v15 = vpop.permute.xlu0 %1200  ;;  %4995 = vpow2.f32 %v4395_v56  ;;  %v6754_v4 = vpop.eup %4979 }
 0x1fc   : > { %v6718_v28 = vpop.permute.xlu1 %1202  ;;  %v4773_v34 = vpop.f32.mrb[16].mxu0  ;;  %4997 = vpow2.f32 %v4402_v8 }
 0x1fd   : > { %v2092_v59 = vpop.f32.mrb[17].mxu0  ;;  %986 = vrot.lane.b32.xlu0 %v6434_v46, %s5386_s23  ;;  %v1554_v46 = vsel %vm1508_vm5, %v1489_v7, %v6618_v33  ;;  %v6749_v35 = vadd.f32 %v4773_v34, %v6505_v32  ;;  %4999 = vpow2.f32 %v4400_v45  ;;  %v5352_v33 = vld [vmem:[%s5444_s22 + $0xb8] sm:$0xff]  }
 0x1fe   : > { %988 = vrot.lane.b32.xlu1 %v6510_v49, %s5386_s23  ;;  %v6734_v18 = vadd.f32 %v6505_v32, %v2092_v59  ;;  %v4774_v44 = vpop.f32.mrb[18].mxu0  ;;  %v1619_v49 = vsel %vm1573_vm6, %v1554_v46, %v6649_v39  ;;  %v1426_v56 = vsel %vm1378_vm3, %v5352_v33, %v6586_v25  ;;  %v4982_v39 = vpop.eup %4981  ;;  %5001 = vpow2.f32 %v4401_v50 }
 0x1ff   : > { %v6742_v53 = vadd.f32 %v4774_v44, %v6505_v32  ;;  %v2095_v17 = vpop.f32.mrb[19].mxu0  ;;  %v1289_v54 = vpop.permute.xlu0 %1288  ;;  %v1684_v5 = vsel %vm1638_vm7, %v1619_v49, %v1129_v29  ;;  %v1491_v34 = vsel %vm1443_vm4, %v1426_v56, %v6606_v55  ;;  %5003 = vpow2.f32 %v4399_v51  ;;  %v4965_v55 = vld [vmem:[%s7698_s3] sm:$0xff]  }
 0x200   : > { %v1291_v20 = vpop.permute.xlu1 %1290  ;;  %v6752_v41 = vadd.f32 %v6505_v32, %v2095_v17  ;;  %v4403_v8 = vmul.f32 -1.442695, %v6734_v18  ;;  %v1749_v0 = vsel %vm1703_vm8, %v1684_v5, %v1201_v15  ;;  %v4984_v59 = vpop.eup %4983  ;;  %v1556_v25 = vsel %vm1508_vm5, %v1491_v34, %v6624_v43  ;;  %4819 = vmatprep.subr.bf16.mxu1 %v4965_v55 }
 0x201   : > { %1074 = vrot.lane.b32.xlu0 %v6595_v60, %s5390_s5  ;;  %v4406_v45 = vmul.f32 -1.442695, %v6742_v53  ;;  %v1814_v60 = vsel %vm1768_vm9, %v1749_v0, %v1289_v54  ;;  %v4986_v50 = vpop.eup %4985  ;;  %5005 = vrcp.f32 %v2476_v21  ;;  %v1621_v15 = vsel %vm1573_vm6, %v1556_v25, %v6658_v30  ;;  %4820 = vmatpush3.bf16.msra.mxu1 %v4965_v55 }
 0x202   : > { %1076 = vrot.lane.b32.xlu1 %v1013_v52, %s5390_s5  ;;  %v4404_v29 = vmul.f32 -1.442695, %v6752_v41  ;;  %v4405_v52 = vmul.f32 -1.442695, %v6749_v35  ;;  %v4988_v51 = vpop.eup %4987  ;;  %v2481_v46 = vadd.f32 1.0, %v4982_v39  ;;  %v1686_v17 = vsel %vm1638_vm7, %v1621_v15, %v6685_v61 }
 0x203   : > { %v1359_v7 = vpop.permute.xlu0 %1358  ;;  %5007 = vpow2.f32 %v4403_v8  ;;  %v1238_v30 = vor.u32 %v1236_v42, %v6709_v31  ;;  %v4990_v21 = vpop.eup %4989  ;;  %v2480_v54 = vadd.f32 1.0, %v4984_v59  ;;  %v1751_v49 = vsel %vm1703_vm8, %v1686_v17, %v6718_v28  ;;  %v4966_v28 = vld [vmem:[%s7698_s3 + $0x8] ss:$0 sps:$4 sm:$0xff]  }
 0x204   : > { %v6778_v44 = vpop.permute.xlu1 %772  ;;  %v1879_v43 = vsel %vm1833_vm10, %v1814_v60, %v1359_v7  ;;  %5009 = vpow2.f32 %v4406_v45  ;;  %v1230_v61 = vor.u32 %v1228_v14, %v6578_v9  ;;  %v2482_v33 = vadd.f32 1.0, %v4986_v50  ;;  %4888 = vmatprep.subr.msk.bf16.mxu1 %vm2903_vm12, %v4966_v28 }
 0x205   : > { %1144 = vrot.lane.b32.xlu0 %v6615_v62, %s5387_s24  ;;  %4799 = vmatprep.mubr.msk.bf16.mxu0 %vm1925_vm11, %v1879_v43  ;;  %v4992_v62 = vpop.eup %4991  ;;  %v1816_v56 = vsel %vm1768_vm9, %v1751_v49, %v1291_v20  ;;  %5011 = vpow2.f32 %v4404_v29  ;;  %v1242_v5 = vrot.slane %v1240_v58, 1  ;;  %v2479_v8 = vadd.f32 1.0, %v4988_v51 }
 0x206   : > { %1146 = vrot.lane.b32.xlu1 %v6701_v40, %s5387_s24  ;;  %v4994_v40 = vpop.eup %4993  ;;  %5013 = vpow2.f32 %v4405_v52  ;;  %v2485_v20 = vadd.f32 1.0, %v4990_v21  ;;  %v2905_v58 = vsel %vm2903_vm12, %v4966_v28, 0  ;;  %v2484_v0 = vadd.f32 1.0, %v4992_v62 }
 0x207   : > { %v1361_v42 = vpop.permute.xlu0 %1360  ;;  %v4996_v14 = vpop.eup %4995  ;;  %5015 = vrcp.f32 %v2481_v46  ;;  %v1235_v45 = vsel %vm463_vm0, %v1230_v61, %v6709_v31  ;;  %v1310_v59 = vrot.slane %v6643_v63, 1  ;;  %v2486_v29 = vadd.f32 1.0, %v4994_v40  ;;  %4822 = vmatpush3.bf16.msra.mxu1 %v2905_v58 }
 0x208   : > { %v6802_v39 = vpop.permute.xlu1 %774  ;;  %v1881_v9 = vsel %vm1833_vm10, %v1816_v56, %v1361_v42  ;;  %v4998_v34 = vpop.eup %4997  ;;  %5017 = vrcp.f32 %v2480_v54  ;;  %v1243_v7 = vsel %vm463_vm0, %v1238_v30, %v1242_v5  ;;  %v1312_v55 = vrot.slane %v6690_v26, 1 }
 0x209   : > { %1216 = vrot.lane.b32.xlu0 %v6545_v38, %s5391_s6  ;;  %4800 = vmatmul.mubr.msk.bf16.gmra.mrb[44].mxu0 %vm1925_vm11, %v1881_v9  ;;  %v5000_v25 = vpop.eup %4999  ;;  %5019 = vrcp.f32 %v2482_v33  ;;  %v2483_v15 = vadd.f32 1.0, %v4996_v14  ;;  %v2490_v31 = vadd.f32 1.0, %v4998_v34  ;;  %v1311_v26 = vsel %vm788_vm1, %v1308_v19, %v1310_v59 }
 0x20a   : > { %1218 = vrot.lane.b32.xlu1 %v6643_v63, %s5391_s6  ;;  %v5002_v50 = vpop.eup %5001  ;;  %5021 = vrcp.f32 %v2479_v8  ;;  %v2488_v51 = vadd.f32 1.0, %v5000_v25  ;;  %v1313_v21 = vsel %vm788_vm1, %v1310_v59, %v1312_v55  ;;  %v2668_v9 = vpack.c.bf16 %v6754_v4, %v6736_v6 }
 0x20b   : > { %v6813_v60 = vpop.permute.xlu0 %902  ;;  %v5004_v43 = vpop.eup %5003  ;;  %5023 = vrcp.f32 %v2485_v20  ;;  %v2489_v17 = vadd.f32 1.0, %v5002_v50  ;;  %vm3197_vm0 = vcmp.gt.f32.partialorder %v6584_v37, 0.0  ;;  %vm3196_vm1 = vcmp.gt.f32.partialorder %v6524_v2, 0.0 }
 0x20c   : > { %v6817_v52 = vpop.permute.xlu1 %904  ;;  %v5006_v63 = vpop.eup %5005  ;;  %5025 = vrcp.f32 %v2484_v0  ;;  %v2487_v49 = vadd.f32 1.0, %v5004_v43  ;;  %vm3210_vm12 = vcmp.gt.f32.partialorder %v6706_v36, 0.0 }
 0x20d   : > { %1304 = vrot.lane.b32.xlu0 %v1235_v45, %s5392_s9  ;;  %v5008_v46 = vpop.eup %5007  ;;  %5027 = vrcp.f32 %v2486_v29  ;;  %v2667_v5 = vpack.c.bf16 %v5006_v63, %v6744_v3 }
 0x20e   : > { %1306 = vrot.lane.b32.xlu1 %v1243_v7, %s5392_s9  ;;  %v5010_v54 = vpop.eup %5009  ;;  %5029 = vrcp.f32 %v2483_v15  ;;  %v2491_v40 = vadd.f32 1.0, %v5008_v46 }
 0x20f   : > { %v6824_v30 = vpop.permute.xlu0 %974  ;;  %v5012_v62 = vpop.eup %5011  ;;  %5031 = vrcp.f32 %v2490_v31  ;;  %v2494_v56 = vadd.f32 1.0, %v5010_v54 }
 0x210   : > { %v6827_v61 = vpop.permute.xlu1 %976  ;;  %v5014_v33 = vpop.eup %5013  ;;  %5033 = vrcp.f32 %v2488_v51  ;;  %v2492_v38 = vadd.f32 1.0, %v5012_v62  ;;  %v5353_v51 = vld [vmem:[%s5444_s22 + $0xc0] sm:$0xff]  }
 0x211   : > { %1374 = vrot.lane.b32.xlu0 %v1311_v26, %s5393_s10  ;;  %v5016_v19 = vpop.eup %5015  ;;  %5035 = vrcp.f32 %v2489_v17  ;;  %v2493_v20 = vadd.f32 1.0, %v5014_v33  ;;  %v1428_v26 = vsel %vm1378_vm3, %v5353_v51, %v6778_v44 }
 0x212   : > { %1376 = vrot.lane.b32.xlu1 %v1313_v21, %s5393_s10  ;;  %v5018_v28 = vpop.eup %5017  ;;  %5037 = vrcp.f32 %v2487_v49  ;;  %v1493_v54 = vsel %vm1443_vm4, %v1428_v26, %v6813_v60  ;;  %v5354_v60 = vld [vmem:[%s5444_s22 + $0xc8] sm:$0xff]  }
 0x213   : > { %v1063_v42 = vpop.permute.xlu0 %1062  ;;  %v5020_v14 = vpop.eup %5019  ;;  %5039 = vrcp.f32 %v2492_v38  ;;  %v1558_v44 = vsel %vm1508_vm5, %v1493_v54, %v6824_v30 }
 0x214   : > { %v6832_v8 = vpop.permute.xlu1 %1064  ;;  %v5022_v58 = vpop.eup %5021  ;;  %5041 = vrcp.f32 %v2494_v56  ;;  %v2670_v25 = vpack.c.bf16 %v5020_v14, %v5016_v19  ;;  %v1623_v14 = vsel %vm1573_vm6, %v1558_v44, %v1063_v42 }
 0x215   : > { %2734 = vrot.lane.b32.xlu0 %v2667_v5, %s5394_s21  ;;  %v5024_v34 = vpop.eup %5023  ;;  %v2669_v0 = vpack.c.bf16 %v5018_v28, %v5022_v58  ;;  %5043 = vrcp.f32 %v2491_v40 }
 0x216   : > { %2736 = vrot.lane.b32.xlu1 %v2668_v9, %s5394_s21  ;;  %v5026_v45 = vpop.eup %5025  ;;  %5045 = vrcp.f32 %v2493_v20  ;;  %v1430_v9 = vsel %vm1378_vm3, %v5354_v60, %v6802_v39 }
 0x217   : > { %v1133_v3 = vpop.permute.xlu0 %1132  ;;  %v5028_v29 = vpop.eup %5027 }
 0x218   : > { %v1135_v59 = vpop.permute.xlu1 %1134  ;;  %v5030_v6 = vpop.eup %5029  ;;  %v2672_v31 = vpack.c.bf16 %v5028_v29, %v5024_v34 }
 0x219   : > { %2738 = vrot.lane.b32.xlu0 %v2669_v0, %s5394_s21  ;;  %v5032_v4 = vpop.eup %5031  ;;  %v2671_v55 = vpack.c.bf16 %v5026_v45, %v5030_v6  ;;  %v1495_v0 = vsel %vm1443_vm4, %v1430_v9, %v6817_v52  ;;  %v1688_v45 = vsel %vm1638_vm7, %v1623_v14, %v1133_v3 }
 0x21a   : > { %2740 = vrot.lane.b32.xlu1 %v2670_v25, %s5394_s21  ;;  %v5034_v50 = vpop.eup %5033  ;;  %v1560_v42 = vsel %vm1508_vm5, %v1495_v0, %v6827_v61 }
 0x21b   : > { %v1205_v7 = vpop.permute.xlu0 %1204  ;;  %v5036_v63 = vpop.eup %5035 }
 0x21c   : > { %v1207_v15 = vpop.permute.xlu1 %1206  ;;  %v4777_v43 = vpop.f32.mrb[20].mxu0  ;;  %v2674_v33 = vpack.c.bf16 %v5032_v4, %v5036_v63  ;;  %v1753_v29 = vsel %vm1703_vm8, %v1688_v45, %v1205_v7 }
 0x21d   : > { %v6844_v46 = vadd.f32 %v4777_v43, %v6505_v32  ;;  %v2108_v17 = vpop.f32.mrb[21].mxu0  ;;  %2742 = vrot.lane.b32.xlu0 %v2671_v55, %s5394_s21  ;;  %v5038_v21 = vpop.eup %5037 }
 0x21e   : > { %2744 = vrot.lane.b32.xlu1 %v2672_v31, %s5394_s21  ;;  %v6851_v49 = vadd.f32 %v6505_v32, %v2108_v17  ;;  %v4778_v62 = vpop.f32.mrb[22].mxu0  ;;  %v2673_v28 = vpack.c.bf16 %v5034_v50, %v5038_v21  ;;  %v5040_v40 = vpop.eup %5039  ;;  %v1625_v50 = vsel %vm1573_vm6, %v1560_v42, %v6832_v8  ;;  %v5355_v42 = vld [vmem:[%s5444_s22 + $0xd0] sm:$0xff]  }
 0x21f   : > { %v4409_v38 = vmul.f32 -1.442695, %v6844_v46  ;;  %v6857_v19 = vadd.f32 %v4778_v62, %v6505_v32  ;;  %v2111_v56 = vpop.f32.mrb[23].mxu0  ;;  %v1293_v5 = vpop.permute.xlu0 %1292  ;;  %v1690_v61 = vsel %vm1638_vm7, %v1625_v50, %v1135_v59 }
 0x220   : > { %v4407_v20 = vmul.f32 -1.442695, %v6851_v49  ;;  %v1295_v58 = vpop.permute.xlu1 %1294  ;;  %v6865_v30 = vadd.f32 %v6505_v32, %v2111_v56  ;;  %v5042_v34 = vpop.eup %5041  ;;  %v1818_v52 = vsel %vm1768_vm9, %v1753_v29, %v1293_v5  ;;  %v1755_v7 = vsel %vm1703_vm8, %v1690_v61, %v1207_v15 }
 0x221   : > { %5047 = vpow2.f32 %v4409_v38  ;;  %v4410_v25 = vmul.f32 -1.442695, %v6857_v19  ;;  %2746 = vrot.lane.b32.xlu0 %v2673_v28, %s5394_s21  ;;  %v5044_v39 = vpop.eup %5043  ;;  %v1820_v51 = vsel %vm1768_vm9, %v1755_v7, %v1295_v58 }
 0x222   : > { %2748 = vrot.lane.b32.xlu1 %v2674_v33, %s5394_s21  ;;  %v5046_v6 = vpop.eup %5045  ;;  %5049 = vpow2.f32 %v4407_v20  ;;  %v4408_v4 = vmul.f32 -1.442695, %v6865_v30  ;;  %v2675_v55 = vpack.c.bf16 %v5040_v40, %v5044_v39 }
 0x223   : > { %v1363_v3 = vpop.permute.xlu0 %1362  ;;  %v2676_v63 = vpack.c.bf16 %v5042_v34, %v5046_v6  ;;  %5051 = vpow2.f32 %v4410_v25 }
 0x224   : > { %v777_v43 = vpop.permute.xlu1 %776  ;;  %v1883_v31 = vsel %vm1833_vm10, %v1818_v52, %v1363_v3  ;;  %5053 = vpow2.f32 %v4408_v4 }
 0x225   : > { %2750 = vrot.lane.b32.xlu0 %v2675_v55, %s5394_s21  ;;  %4803 = vmatprep.mubr.msk.bf16.mxu0 %vm1925_vm11, %v1883_v31  ;;  %v1432_v29 = vsel %vm1378_vm3, %v5355_v42, %v777_v43 }
 0x226   : > { %2752 = vrot.lane.b32.xlu1 %v2676_v63, %s5394_s21 }
 0x227   : > { %v1365_v26 = vpop.permute.xlu0 %1364 }
 0x228   : > { %v779_v8 = vpop.permute.xlu1 %778  ;;  %v1885_v17 = vsel %vm1833_vm10, %v1820_v51, %v1365_v26 }
 0x229   : > { %4804 = vmatmul.mubr.msk.bf16.gmra.mrb[48].mxu0 %vm1925_vm11, %v1885_v17 }
 0x22b   : > { %v5048_v21 = vpop.eup %5047  ;;  %v907_v59 = vpop.permute.xlu0 %906 }
 0x22c   : > { %v909_v54 = vpop.permute.xlu1 %908  ;;  %v5050_v62 = vpop.eup %5049  ;;  %v2497_v33 = vadd.f32 1.0, %v5048_v21  ;;  %v1497_v55 = vsel %vm1443_vm4, %v1432_v29, %v907_v59 }
 0x22d   : > { %v5052_v44 = vpop.eup %5051  ;;  %v2495_v38 = vadd.f32 1.0, %v5050_v62 }
 0x22e   : > { %v2498_v15 = vadd.f32 1.0, %v5052_v44  ;;  %v5054_v28 = vpop.eup %5053  ;;  %5055 = vrcp.f32 %v2497_v33  ;;  %v5356_v33 = vld [vmem:[%s5444_s22 + $0xd8] sm:$0xff]  }
 0x22f   : > { %v979_v56 = vpop.permute.xlu0 %978  ;;  %v2496_v40 = vadd.f32 1.0, %v5054_v28  ;;  %v1434_v44 = vsel %vm1378_vm3, %v5356_v33, %v779_v8 }
 0x230   : > { %v981_v5 = vpop.permute.xlu1 %980  ;;  %5057 = vrcp.f32 %v2498_v15  ;;  %v1562_v63 = vsel %vm1508_vm5, %v1497_v55, %v979_v56  ;;  %v1499_v15 = vsel %vm1443_vm4, %v1434_v44, %v909_v54 }
 0x231   : > { %5059 = vrcp.f32 %v2495_v38 }
 0x232   : > { %5061 = vrcp.f32 %v2496_v40  ;;  %v1564_v40 = vsel %vm1508_vm5, %v1499_v15, %v981_v5 }
 0x233   : > { %v1067_v60 = vpop.permute.xlu0 %1066 }
 0x234   : > { %v1069_v9 = vpop.permute.xlu1 %1068  ;;  %v1627_v17 = vsel %vm1573_vm6, %v1562_v63, %v1067_v60 }
 0x235   : > { %v1629_v8 = vsel %vm1573_vm6, %v1564_v40, %v1069_v9  ;;  %v5357_v40 = vld [vmem:[%s5444_s22 + $0xe0] sm:$0xff]  }
 0x237   : > { %v1137_v14 = vpop.permute.xlu0 %1136 }
 0x238   : > { %v1139_v20 = vpop.permute.xlu1 %1138  ;;  %v5056_v58 = vpop.eup %5055  ;;  %v1692_v38 = vsel %vm1638_vm7, %v1627_v17, %v1137_v14 }
 0x23a   : > { %v5058_v0 = vpop.eup %5057 }
 0x23b   : > { %v1209_v34 = vpop.permute.xlu0 %1208  ;;  %v5060_v39 = vpop.eup %5059  ;;  %v2678_v4 = vpack.c.bf16 %v5058_v0, %v5056_v58 }
 0x23c   : > { %v1211_v45 = vpop.permute.xlu1 %1210  ;;  %v4781_v25 = vpop.f32.mrb[24].mxu0  ;;  %v1757_v28 = vsel %vm1703_vm8, %v1692_v38, %v1209_v34 }
 0x23d   : > { %v6892_v6 = vadd.f32 %v4781_v25, %v6505_v32  ;;  %v2124_v52 = vpop.f32.mrb[25].mxu0  ;;  %v5062_v3 = vpop.eup %5061  ;;  %2756 = vrot.lane.b32.xlu1 %v2678_v4, %s5394_s21 }
 0x23e   : > { %v6896_v50 = vadd.f32 %v6505_v32, %v2124_v52  ;;  %v4782_v31 = vpop.f32.mrb[26].mxu0  ;;  %v2677_v7 = vpack.c.bf16 %v5062_v3, %v5060_v39  ;;  %v1694_v39 = vsel %vm1638_vm7, %v1629_v8, %v1139_v20 }
 0x23f   : > { %v4413_v61 = vmul.f32 -1.442695, %v6892_v6  ;;  %v6902_v43 = vadd.f32 %v4782_v31, %v6505_v32  ;;  %v2127_v51 = vpop.f32.mrb[27].mxu0  ;;  %v1297_v26 = vpop.permute.xlu0 %1296  ;;  %v1759_v54 = vsel %vm1703_vm8, %v1694_v39, %v1211_v45 }
 0x240   : > { %v4411_v21 = vmul.f32 -1.442695, %v6896_v50  ;;  %v1299_v59 = vpop.permute.xlu1 %1298  ;;  %v6907_v62 = vadd.f32 %v6505_v32, %v2127_v51  ;;  %2754 = vrot.lane.b32.xlu0 %v2677_v7, %s5394_s21  ;;  %v1822_v58 = vsel %vm1768_vm9, %v1757_v28, %v1297_v26 }
 0x241   : > { %5063 = vpow2.f32 %v4413_v61  ;;  %v4414_v56 = vmul.f32 -1.442695, %v6902_v43  ;;  %v1824_v5 = vsel %vm1768_vm9, %v1759_v54, %v1299_v59 }
 0x242   : > { %5065 = vpow2.f32 %v4411_v21  ;;  %v4412_v60 = vmul.f32 -1.442695, %v6907_v62 }
 0x243   : > { %v1367_v0 = vpop.permute.xlu0 %1366  ;;  %5067 = vpow2.f32 %v4414_v56 }
 0x244   : > { %v781_v14 = vpop.permute.xlu1 %780  ;;  %v1887_v25 = vsel %vm1833_vm10, %v1822_v58, %v1367_v0  ;;  %5069 = vpow2.f32 %v4412_v60 }
 0x245   : > { %4807 = vmatprep.mubr.msk.bf16.mxu0 %vm1925_vm11, %v1887_v25  ;;  %v1436_v60 = vsel %vm1378_vm3, %v5357_v40, %v781_v14 }
 0x247   : > { %v1369_v34 = vpop.permute.xlu0 %1368 }
 0x248   : > { %v783_v42 = vpop.permute.xlu1 %782  ;;  %v1889_v29 = vsel %vm1833_vm10, %v1824_v5, %v1369_v34 }
 0x249   : > { %4808 = vmatmul.mubr.msk.bf16.gmra.mrb[52].mxu0 %vm1925_vm11, %v1889_v29 }
 0x24b   : > { %v5064_v9 = vpop.eup %5063  ;;  %v911_v4 = vpop.permute.xlu0 %910 }
 0x24c   : > { %v913_v52 = vpop.permute.xlu1 %912  ;;  %v5066_v3 = vpop.eup %5065  ;;  %v2501_v55 = vadd.f32 1.0, %v5064_v9  ;;  %v1501_v39 = vsel %vm1443_vm4, %v1436_v60, %v911_v4 }
 0x24d   : > { %v5068_v20 = vpop.eup %5067  ;;  %v2499_v31 = vadd.f32 1.0, %v5066_v3 }
 0x24e   : > { %v2502_v61 = vadd.f32 1.0, %v5068_v20  ;;  %v5070_v45 = vpop.eup %5069  ;;  %5071 = vrcp.f32 %v2501_v55 }
 0x24f   : > { %v983_v63 = vpop.permute.xlu0 %982  ;;  %v2500_v51 = vadd.f32 1.0, %v5070_v45  ;;  %v5358_v45 = vld [vmem:[%s5444_s22 + $0xe8] sm:$0xff]  }
 0x250   : > { %v985_v7 = vpop.permute.xlu1 %984  ;;  %5073 = vrcp.f32 %v2502_v61  ;;  %v1566_v34 = vsel %vm1508_vm5, %v1501_v39, %v983_v63  ;;  %v1438_v63 = vsel %vm1378_vm3, %v5358_v45, %v783_v42 }
 0x251   : > { %5075 = vrcp.f32 %v2499_v31 }
 0x252   : > { %5077 = vrcp.f32 %v2500_v51 }
 0x253   : > { %v1071_v26 = vpop.permute.xlu0 %1070 }
 0x254   : > { %v1073_v17 = vpop.permute.xlu1 %1072  ;;  %v1631_v20 = vsel %vm1573_vm6, %v1566_v34, %v1071_v26 }
 0x257   : > { %v1141_v21 = vpop.permute.xlu0 %1140 }
 0x258   : > { %v1143_v59 = vpop.permute.xlu1 %1142  ;;  %v5072_v33 = vpop.eup %5071  ;;  %v1696_v51 = vsel %vm1638_vm7, %v1631_v20, %v1141_v21 }
 0x25a   : > { %v5074_v38 = vpop.eup %5073 }
 0x25b   : > { %v1213_v44 = vpop.permute.xlu0 %1212  ;;  %v5076_v28 = vpop.eup %5075  ;;  %v2680_v0 = vpack.c.bf16 %v5074_v38, %v5072_v33  ;;  %v1503_v38 = vsel %vm1443_vm4, %v1438_v63, %v913_v52 }
 0x25c   : > { %v1215_v56 = vpop.permute.xlu1 %1214  ;;  %v4785_v15 = vpop.f32.mrb[28].mxu0  ;;  %v1761_v26 = vsel %vm1703_vm8, %v1696_v51, %v1213_v44 }
 0x25d   : > { %v6930_v58 = vadd.f32 %v4785_v15, %v6505_v32  ;;  %v2140_v8 = vpop.f32.mrb[29].mxu0  ;;  %v5078_v25 = vpop.eup %5077  ;;  %2760 = vrot.lane.b32.xlu1 %v2680_v0, %s5394_s21  ;;  %v1568_v15 = vsel %vm1508_vm5, %v1503_v38, %v985_v7 }
 0x25e   : > { %v6934_v54 = vadd.f32 %v6505_v32, %v2140_v8  ;;  %v4786_v5 = vpop.f32.mrb[30].mxu0  ;;  %v2679_v9 = vpack.c.bf16 %v5078_v25, %v5076_v28  ;;  %v1633_v42 = vsel %vm1573_vm6, %v1568_v15, %v1073_v17 }
 0x25f   : > { %v4417_v29 = vmul.f32 -1.442695, %v6930_v58  ;;  %v6940_v14 = vadd.f32 %v4786_v5, %v6505_v32  ;;  %v2143_v3 = vpop.f32.mrb[31].mxu0  ;;  %v1301_v55 = vpop.permute.xlu0 %1300  ;;  %v1698_v0 = vsel %vm1638_vm7, %v1633_v42, %v1143_v59 }
 0x260   : > { %v4415_v4 = vmul.f32 -1.442695, %v6934_v54  ;;  %v1303_v31 = vpop.permute.xlu1 %1302  ;;  %v6945_v61 = vadd.f32 %v6505_v32, %v2143_v3  ;;  %2758 = vrot.lane.b32.xlu0 %v2679_v9, %s5394_s21  ;;  %v1826_v28 = vsel %vm1768_vm9, %v1761_v26, %v1301_v55  ;;  %v1763_v52 = vsel %vm1703_vm8, %v1698_v0, %v1215_v56 }
 0x261   : > { %5079 = vpow2.f32 %v4417_v29  ;;  %v4418_v33 = vmul.f32 -1.442695, %v6940_v14  ;;  %v1828_v7 = vsel %vm1768_vm9, %v1763_v52, %v1303_v31  ;;  %v6972_v52 = vld [vmem:[%s7697_s2] ss:$0 sm:$0xff] }
 0x262   : > { %5081 = vpow2.f32 %v4415_v4  ;;  %v4416_v32 = vmul.f32 -1.442695, %v6945_v61 }
 0x263   : > { %v1371_v40 = vpop.permute.xlu0 %1370  ;;  %5083 = vpow2.f32 %v4418_v33 }
 0x264   : > { %v785_v21 = vpop.permute.xlu1 %784  ;;  %v1891_v60 = vsel %vm1833_vm10, %v1826_v28, %v1371_v40  ;;  %5085 = vpow2.f32 %v4416_v32  ;;  %v5359_v40 = vld [vmem:[%s5444_s22 + $0xf0] sm:$0xff]  }
 0x265   : > { %4811 = vmatprep.mubr.msk.bf16.mxu0 %vm1925_vm11, %v1891_v60  ;;  %v1440_v42 = vsel %vm1378_vm3, %v5359_v40, %v785_v21  ;;  %v5360_v60 = vld [vmem:[%s5444_s22 + $0xf8] sm:$0xff]   ;;  %s4615_s22 = sshll.u32 %s7813_s15, 8 }
 0x266   : > { %s7224_s27 = scalar_lea.vmem %s7699_s4, %s4615_s22 }
 0x267   : > { %v1373_v44 = vpop.permute.xlu0 %1372 }
 0x268   : > { %v787_v8 = vpop.permute.xlu1 %786  ;;  %v1893_v25 = vsel %vm1833_vm10, %v1828_v7, %v1373_v44 }
 0x269   : > { %4812 = vmatmul.mubr.msk.bf16.gmra.mrb[56].mxu0 %vm1925_vm11, %v1893_v25  ;;  %v1442_v0 = vsel %vm1378_vm3, %v5360_v60, %v787_v8  ;;  %vm3202_vm3 = vcmp.gt.f32.partialorder %v6622_v48, 0.0 }
 0x26b   : > { %v5080_v17 = vpop.eup %5079  ;;  %v915_v39 = vpop.permute.xlu0 %914 }
 0x26c   : > { %v917_v5 = vpop.permute.xlu1 %916  ;;  %v5082_v34 = vpop.eup %5081  ;;  %v2505_v29 = vadd.f32 1.0, %v5080_v17 }
 0x26d   : > { %v5084_v59 = vpop.eup %5083  ;;  %v2503_v9 = vadd.f32 1.0, %v5082_v34  ;;  %v1507_v34 = vsel %vm1443_vm4, %v1442_v0, %v917_v5 }
 0x26e   : > { %v2506_v55 = vadd.f32 1.0, %v5084_v59  ;;  %v5086_v56 = vpop.eup %5085  ;;  %5087 = vrcp.f32 %v2505_v29  ;;  %v1505_v29 = vsel %vm1443_vm4, %v1440_v42, %v915_v39 }
 0x26f   : > { %v987_v3 = vpop.permute.xlu0 %986  ;;  %v2504_v4 = vadd.f32 1.0, %v5086_v56 }
 0x270   : > { %v989_v20 = vpop.permute.xlu1 %988  ;;  %5089 = vrcp.f32 %v2506_v55  ;;  %v1570_v8 = vsel %vm1508_vm5, %v1505_v29, %v987_v3 }
 0x271   : > { %5091 = vrcp.f32 %v2503_v9  ;;  %v1572_v5 = vsel %vm1508_vm5, %v1507_v34, %v989_v20  ;;  %vm3201_vm5 = vcmp.gt.f32.partialorder %v6628_v16, 0.0 }
 0x272   : > { %5093 = vrcp.f32 %v2504_v4 }
 0x273   : > { %v1075_v31 = vpop.permute.xlu0 %1074 }
 0x274   : > { %v1077_v45 = vpop.permute.xlu1 %1076  ;;  %v1635_v39 = vsel %vm1573_vm6, %v1570_v8, %v1075_v31 }
 0x275   : > { %v1637_v3 = vsel %vm1573_vm6, %v1572_v5, %v1077_v45  ;;  %vm3200_vm6 = vcmp.gt.f32.partialorder %v6647_v24, 0.0 }
 0x277   : > { %v1145_v63 = vpop.permute.xlu0 %1144 }
 0x278   : > { %v1147_v51 = vpop.permute.xlu1 %1146  ;;  %v5088_v33 = vpop.eup %5087  ;;  %v1700_v42 = vsel %vm1638_vm7, %v1635_v39, %v1145_v63 }
 0x27a   : > { %v5090_v26 = vpop.eup %5089 }
 0x27b   : > { %v1217_v38 = vpop.permute.xlu0 %1216  ;;  %v5092_v28 = vpop.eup %5091  ;;  %v2682_v44 = vpack.c.bf16 %v5090_v26, %v5088_v33 }
 0x27c   : > { %v1219_v15 = vpop.permute.xlu1 %1218  ;;  %v4789_v32 = vpop.f32.mrb[32].mxu0  ;;  %v1765_v20 = vsel %vm1703_vm8, %v1700_v42, %v1217_v38 }
 0x27d   : > { %v6975_v7 = vadd.f32 %v6972_v52, %v4789_v32  ;;  %v2156_v25 = vpop.f32.mrb[33].mxu0  ;;  %v5094_v17 = vpop.eup %5093  ;;  %2764 = vrot.lane.b32.xlu1 %v2682_v44, %s5394_s21 }
 0x27e   : > { %v6980_v21 = vadd.f32 %v6972_v52, %v2156_v25  ;;  %v4790_v59 = vpop.f32.mrb[34].mxu0  ;;  %v2681_v56 = vpack.c.bf16 %v5094_v17, %v5092_v28  ;;  %v1702_v28 = vsel %vm1638_vm7, %v1637_v3, %v1147_v51  ;;  %vm3207_vm7 = vcmp.gt.f32.partialorder %v6669_v1, 0.0 }
 0x27f   : > { %v4421_v9 = vmul.f32 -1.442695, %v6975_v7  ;;  %v6986_v55 = vadd.f32 %v6972_v52, %v4790_v59  ;;  %v2159_v4 = vpop.f32.mrb[35].mxu0  ;;  %v1305_v33 = vpop.permute.xlu0 %1304  ;;  %v1767_v31 = vsel %vm1703_vm8, %v1702_v28, %v1219_v15 }
 0x280   : > { %v4419_v26 = vmul.f32 -1.442695, %v6980_v21  ;;  %v1307_v32 = vpop.permute.xlu1 %1306  ;;  %v6992_v40 = vadd.f32 %v6972_v52, %v2159_v4  ;;  %2762 = vrot.lane.b32.xlu0 %v2681_v56, %s5394_s21  ;;  %v1830_v44 = vsel %vm1768_vm9, %v1765_v20, %v1305_v33 }
 0x281   : > { %5095 = vpow2.f32 %v4421_v9  ;;  %v4422_v60 = vmul.f32 -1.442695, %v6986_v55  ;;  %v1832_v45 = vsel %vm1768_vm9, %v1767_v31, %v1307_v32  ;;  %vm3205_vm9 = vcmp.gt.f32.partialorder %v6663_v11, 0.0 }
 0x282   : > { %5097 = vpow2.f32 %v4419_v26  ;;  %v4420_v0 = vmul.f32 -1.442695, %v6992_v40 }
 0x283   : > { %v1375_v25 = vpop.permute.xlu0 %1374  ;;  %5099 = vpow2.f32 %v4422_v60 }
 0x284   : > { %v1377_v63 = vpop.permute.xlu1 %1376  ;;  %v1895_v17 = vsel %vm1833_vm10, %v1830_v44, %v1375_v25  ;;  %5101 = vpow2.f32 %v4420_v0 }
 0x285   : > { %v1897_v34 = vsel %vm1833_vm10, %v1832_v45, %v1377_v63  ;;  %4815 = vmatprep.mubr.msk.bf16.mxu0 %vm1925_vm11, %v1895_v17  ;;  %vm3204_vm10 = vcmp.gt.f32.partialorder %v6676_v22, 0.0 }
 0x286   : > { %4816 = vmatmul.mubr.msk.bf16.gmra.mrb[60].mxu0 %vm1925_vm11, %v1897_v34  ;;  %vm3211_vm11 = vcmp.gt.f32.partialorder %v6683_v10, 0.0 }
 0x287   : > { %v2735_v51 = vpop.permute.xlu0 %2734 }
 0x288   : > { %v2737_v38 = vpop.permute.xlu1 %2736  ;;  %4823 = vmatprep.mubr.msk.bf16.mxu1 %vm1703_vm8, %v2735_v51 }
 0x289   : > { %4824 = vmatmul.mubr.msk.bf16.vlgmr.msra.gmra.mrb[0].mxu1 %vm1703_vm8, %v2737_v38 }
 0x28b   : > { %v5096_v15 = vpop.eup %5095  ;;  %v2739_v29 = vpop.permute.xlu0 %2738 }
 0x28c   : > { %4827 = vmatprep.mubr.msk.bf16.mxu1 %vm1703_vm8, %v2739_v29  ;;  %v5098_v59 = vpop.eup %5097  ;;  %v2509_v8 = vadd.f32 1.0, %v5096_v15  ;;  %v2741_v33 = vpop.permute.xlu1 %2740 }
 0x28d   : > { %v5100_v9 = vpop.eup %5099  ;;  %v2507_v56 = vadd.f32 1.0, %v5098_v59 }
 0x28e   : > { %v2510_v4 = vadd.f32 1.0, %v5100_v9  ;;  %v5102_v5 = vpop.eup %5101  ;;  %5103 = vrcp.f32 %v2509_v8 }
 0x28f   : > { %v2743_v39 = vpop.permute.xlu0 %2742  ;;  %v2508_v26 = vadd.f32 1.0, %v5102_v5 }
 0x290   : > { %5105 = vrcp.f32 %v2510_v4  ;;  %v2745_v32 = vpop.permute.xlu1 %2744 }
 0x291   : > { %4828 = vmatmul.mubr.msk.bf16.gmra.mrb[4].mxu1 %vm1703_vm8, %v2741_v33  ;;  %5107 = vrcp.f32 %v2507_v56 }
 0x292   : > { %4831 = vmatprep.mubr.msk.bf16.mxu1 %vm1703_vm8, %v2743_v39  ;;  %5109 = vrcp.f32 %v2508_v26 }
 0x293   : > { %v2747_v3 = vpop.permute.xlu0 %2746 }
 0x294   : > { %v2749_v15 = vpop.permute.xlu1 %2748 }
 0x297   : > { %v2751_v8 = vpop.permute.xlu0 %2750 }
 0x298   : > { %v5104_v42 = vpop.eup %5103  ;;  %v2753_v4 = vpop.permute.xlu1 %2752 }
 0x299   : > { %4832 = vmatmul.mubr.msk.bf16.gmra.mrb[8].mxu1 %vm1703_vm8, %v2745_v32 }
 0x29a   : > { %4835 = vmatprep.mubr.msk.bf16.mxu1 %vm1703_vm8, %v2747_v3  ;;  %v5106_v60 = vpop.eup %5105 }
 0x29b   : > { %v5108_v20 = vpop.eup %5107  ;;  %v2684_v0 = vpack.c.bf16 %v5106_v60, %v5104_v42 }
 0x29c   : > { %v4793_v28 = vpop.f32.mrb[36].mxu0  ;;  %v5110_v25 = vpop.eup %5109 }
 0x29d   : > { %v7016_v31 = vadd.f32 %v6972_v52, %v4793_v28  ;;  %v2172_v44 = vpop.f32.mrb[37].mxu0  ;;  %2768 = vrot.lane.b32.xlu1 %v2684_v0, %s5394_s21  ;;  %v2683_v51 = vpack.c.bf16 %v5110_v25, %v5108_v20 }
 0x29e   : > { %v7019_v45 = vadd.f32 %v6972_v52, %v2172_v44  ;;  %v4794_v63 = vpop.f32.mrb[38].mxu0 }
 0x29f   : > { %v4425_v17 = vmul.f32 -1.442695, %v7016_v31  ;;  %v7024_v34 = vadd.f32 %v6972_v52, %v4794_v63  ;;  %v2175_v38 = vpop.f32.mrb[39].mxu0  ;;  %2766 = vrot.lane.b32.xlu0 %v2683_v51, %s5394_s21 }
 0x2a0   : > { %7754 = vst [vmem:[#allocation2_spill] sm:$0xff] %v7019_v45  ;;  %v4423_v29 = vmul.f32 -1.442695, %v7019_v45  ;;  %v7028_v59 = vadd.f32 %v6972_v52, %v2175_v38 }
 0x2a1   : > { %7755 = vst [vmem:[#allocation3_spill] sm:$0xff] %v7024_v34  ;;  %5111 = vpow2.f32 %v4425_v17  ;;  %v4426_v9 = vmul.f32 -1.442695, %v7024_v34  ;;  %4836 = vmatmul.mubr.msk.bf16.gmra.mrb[12].mxu1 %vm1703_vm8, %v2749_v15 }
 0x2a2   : > { %7756 = vst [vmem:[#allocation4_spill] sm:$0xff] %v7028_v59  ;;  %4839 = vmatprep.mubr.msk.bf16.mxu1 %vm1703_vm8, %v2751_v8  ;;  %5113 = vpow2.f32 %v4423_v29  ;;  %v4424_v56 = vmul.f32 -1.442695, %v7028_v59 }
 0x2a3   : > { %5115 = vpow2.f32 %v4426_v9 }
 0x2a4   : > { %5117 = vpow2.f32 %v4424_v56 }
 0x2a9   : > { %4840 = vmatmul.mubr.msk.bf16.gmra.mrb[16].mxu1 %vm1703_vm8, %v2753_v4 }
 0x2ab   : > { %v5112_v33 = vpop.eup %5111 }
 0x2ac   : > { %v5114_v5 = vpop.eup %5113  ;;  %v2513_v39 = vadd.f32 1.0, %v5112_v33 }
 0x2ad   : > { %v5116_v26 = vpop.eup %5115  ;;  %v2511_v32 = vadd.f32 1.0, %v5114_v5 }
 0x2ae   : > { %v2514_v3 = vadd.f32 1.0, %v5116_v26  ;;  %v5118_v42 = vpop.eup %5117  ;;  %5119 = vrcp.f32 %v2513_v39 }
 0x2af   : > { %v2512_v60 = vadd.f32 1.0, %v5118_v42  ;;  %v2757_v20 = vpop.permute.xlu1 %2756 }
 0x2b0   : > { %5121 = vrcp.f32 %v2514_v3 }
 0x2b1   : > { %5123 = vrcp.f32 %v2511_v32 }
 0x2b2   : > { %v2755_v28 = vpop.permute.xlu0 %2754  ;;  %5125 = vrcp.f32 %v2512_v60 }
 0x2b3   : > { %4843 = vmatprep.mubr.msk.bf16.mxu1 %vm1703_vm8, %v2755_v28 }
 0x2b4   : > { %4844 = vmatmul.mubr.msk.bf16.gmra.mrb[20].mxu1 %vm1703_vm8, %v2757_v20 }
 0x2b8   : > { %v5120_v0 = vpop.eup %5119 }
 0x2ba   : > { %v5122_v44 = vpop.eup %5121 }
 0x2bb   : > { %v5124_v63 = vpop.eup %5123  ;;  %v2686_v51 = vpack.c.bf16 %v5122_v44, %v5120_v0 }
 0x2bc   : > { %v4797_v25 = vpop.f32.mrb[40].mxu0  ;;  %v5126_v15 = vpop.eup %5125 }
 0x2bd   : > { %v7039_v17 = vadd.f32 %v6972_v52, %v4797_v25  ;;  %v2188_v38 = vpop.f32.mrb[41].mxu0  ;;  %2772 = vrot.lane.b32.xlu1 %v2686_v51, %s5394_s21  ;;  %v2685_v4 = vpack.c.bf16 %v5126_v15, %v5124_v63 }
 0x2be   : > { %v7042_v29 = vadd.f32 %v6972_v52, %v2188_v38  ;;  %v4798_v8 = vpop.f32.mrb[42].mxu0 }
 0x2bf   : > { %7757 = vst [vmem:[#allocation5_spill] sm:$0xff] %v7039_v17  ;;  %v4429_v9 = vmul.f32 -1.442695, %v7039_v17  ;;  %v7047_v56 = vadd.f32 %v6972_v52, %v4798_v8  ;;  %v2191_v33 = vpop.f32.mrb[43].mxu0  ;;  %2770 = vrot.lane.b32.xlu0 %v2685_v4, %s5394_s21 }
 0x2c0   : > { %7758 = vst [vmem:[#allocation6_spill] sm:$0xff] %v7042_v29  ;;  %v4427_v5 = vmul.f32 -1.442695, %v7042_v29  ;;  %v7051_v39 = vadd.f32 %v6972_v52, %v2191_v33 }
 0x2c1   : > { %7759 = vst [vmem:[#allocation7_spill] sm:$0xff] %v7047_v56  ;;  %5127 = vpow2.f32 %v4429_v9  ;;  %v4430_v26 = vmul.f32 -1.442695, %v7047_v56 }
 0x2c2   : > { %7760 = vst [vmem:[#allocation8_spill] sm:$0xff] %v7051_v39  ;;  %5129 = vpow2.f32 %v4427_v5  ;;  %v4428_v32 = vmul.f32 -1.442695, %v7051_v39 }
 0x2c3   : > { %5131 = vpow2.f32 %v4430_v26 }
 0x2c4   : > { %5133 = vpow2.f32 %v4428_v32 }
 0x2cb   : > { %v5128_v3 = vpop.eup %5127 }
 0x2cc   : > { %v5130_v42 = vpop.eup %5129  ;;  %v2517_v60 = vadd.f32 1.0, %v5128_v3 }
 0x2cd   : > { %v5132_v28 = vpop.eup %5131  ;;  %v2515_v20 = vadd.f32 1.0, %v5130_v42 }
 0x2ce   : > { %v2518_v0 = vadd.f32 1.0, %v5132_v28  ;;  %v5134_v44 = vpop.eup %5133  ;;  %5135 = vrcp.f32 %v2517_v60 }
 0x2cf   : > { %v2516_v25 = vadd.f32 1.0, %v5134_v44  ;;  %v2761_v51 = vpop.permute.xlu1 %2760 }
 0x2d0   : > { %5137 = vrcp.f32 %v2518_v0 }
 0x2d1   : > { %5139 = vrcp.f32 %v2515_v20 }
 0x2d2   : > { %v2759_v63 = vpop.permute.xlu0 %2758  ;;  %5141 = vrcp.f32 %v2516_v25 }
 0x2d3   : > { %4847 = vmatprep.mubr.msk.bf16.mxu1 %vm1703_vm8, %v2759_v63 }
 0x2d4   : > { %4848 = vmatmul.mubr.msk.bf16.gmra.mrb[24].mxu1 %vm1703_vm8, %v2761_v51 }
 0x2d8   : > { %v5136_v38 = vpop.eup %5135 }
 0x2da   : > { %v5138_v15 = vpop.eup %5137 }
 0x2db   : > { %v5140_v9 = vpop.eup %5139  ;;  %v2688_v33 = vpack.c.bf16 %v5138_v15, %v5136_v38 }
 0x2dc   : > { %v4801_v8 = vpop.f32.mrb[44].mxu0  ;;  %v5142_v26 = vpop.eup %5141 }
 0x2dd   : > { %v7059_v4 = vadd.f32 %v6972_v52, %v4801_v8  ;;  %v2204_v5 = vpop.f32.mrb[45].mxu0  ;;  %2776 = vrot.lane.b32.xlu1 %v2688_v33, %s5394_s21  ;;  %v2687_v60 = vpack.c.bf16 %v5142_v26, %v5140_v9 }
 0x2de   : > { %v7062_v32 = vadd.f32 %v6972_v52, %v2204_v5  ;;  %v4802_v3 = vpop.f32.mrb[46].mxu0 }
 0x2df   : > { %7761 = vst [vmem:[#allocation9_spill] sm:$0xff] %v7059_v4  ;;  %v4433_v42 = vmul.f32 -1.442695, %v7059_v4  ;;  %v7067_v28 = vadd.f32 %v6972_v52, %v4802_v3  ;;  %v2207_v20 = vpop.f32.mrb[47].mxu0  ;;  %2774 = vrot.lane.b32.xlu0 %v2687_v60, %s5394_s21 }
 0x2e0   : > { %7762 = vst [vmem:[#allocation10_spill] sm:$0xff] %v7062_v32  ;;  %v4431_v0 = vmul.f32 -1.442695, %v7062_v32  ;;  %v7071_v44 = vadd.f32 %v6972_v52, %v2207_v20 }
 0x2e1   : > { %7763 = vst [vmem:[#allocation11_spill] sm:$0xff] %v7067_v28  ;;  %5143 = vpow2.f32 %v4433_v42  ;;  %v4434_v25 = vmul.f32 -1.442695, %v7067_v28 }
 0x2e2   : > { %7764 = vst [vmem:[#allocation12_spill] sm:$0xff] %v7071_v44  ;;  %5145 = vpow2.f32 %v4431_v0  ;;  %v4432_v63 = vmul.f32 -1.442695, %v7071_v44 }
 0x2e3   : > { %5147 = vpow2.f32 %v4434_v25 }
 0x2e4   : > { %5149 = vpow2.f32 %v4432_v63 }
 0x2eb   : > { %v5144_v51 = vpop.eup %5143 }
 0x2ec   : > { %v5146_v38 = vpop.eup %5145  ;;  %v2521_v15 = vadd.f32 1.0, %v5144_v51 }
 0x2ed   : > { %v5148_v8 = vpop.eup %5147  ;;  %v2519_v9 = vadd.f32 1.0, %v5146_v38 }
 0x2ee   : > { %v2522_v33 = vadd.f32 1.0, %v5148_v8  ;;  %v5150_v5 = vpop.eup %5149  ;;  %5151 = vrcp.f32 %v2521_v15 }
 0x2ef   : > { %v2520_v26 = vadd.f32 1.0, %v5150_v5  ;;  %v2765_v42 = vpop.permute.xlu1 %2764 }
 0x2f0   : > { %5153 = vrcp.f32 %v2522_v33 }
 0x2f1   : > { %5155 = vrcp.f32 %v2519_v9 }
 0x2f2   : > { %v2763_v3 = vpop.permute.xlu0 %2762  ;;  %5157 = vrcp.f32 %v2520_v26 }
 0x2f3   : > { %4851 = vmatprep.mubr.msk.bf16.mxu1 %vm1703_vm8, %v2763_v3 }
 0x2f4   : > { %4852 = vmatmul.mubr.msk.bf16.gmra.mrb[28].mxu1 %vm1703_vm8, %v2765_v42 }
 0x2f8   : > { %v5152_v60 = vpop.eup %5151 }
 0x2fa   : > { %v5154_v20 = vpop.eup %5153 }
 0x2fb   : > { %v5156_v25 = vpop.eup %5155  ;;  %v2690_v51 = vpack.c.bf16 %v5154_v20, %v5152_v60 }
 0x2fc   : > { %v4805_v0 = vpop.f32.mrb[48].mxu0  ;;  %v5158_v15 = vpop.eup %5157 }
 0x2fd   : > { %v7079_v63 = vadd.f32 %v6972_v52, %v4805_v0  ;;  %v2220_v38 = vpop.f32.mrb[49].mxu0  ;;  %2780 = vrot.lane.b32.xlu1 %v2690_v51, %s5394_s21  ;;  %v2689_v5 = vpack.c.bf16 %v5158_v15, %v5156_v25 }
 0x2fe   : > { %v7082_v8 = vadd.f32 %v6972_v52, %v2220_v38  ;;  %v4806_v9 = vpop.f32.mrb[50].mxu0 }
 0x2ff   : > { %7765 = vst [vmem:[#allocation13_spill] sm:$0xff] %v7079_v63  ;;  %v4437_v33 = vmul.f32 -1.442695, %v7079_v63  ;;  %v7087_v26 = vadd.f32 %v6972_v52, %v4806_v9  ;;  %v2223_v3 = vpop.f32.mrb[51].mxu0  ;;  %2778 = vrot.lane.b32.xlu0 %v2689_v5, %s5394_s21 }
 0x300   : > { %7766 = vst [vmem:[#allocation14_spill] sm:$0xff] %v7082_v8  ;;  %v4435_v42 = vmul.f32 -1.442695, %v7082_v8  ;;  %v7091_v0 = vadd.f32 %v6972_v52, %v2223_v3 }
 0x301   : > { %7767 = vst [vmem:[#allocation15_spill] sm:$0xff] %v7087_v26  ;;  %5159 = vpow2.f32 %v4437_v33  ;;  %v4438_v60 = vmul.f32 -1.442695, %v7087_v26 }
 0x302   : > { %7768 = vst [vmem:[#allocation16_spill] sm:$0xff] %v7091_v0  ;;  %5161 = vpow2.f32 %v4435_v42  ;;  %v4436_v20 = vmul.f32 -1.442695, %v7091_v0 }
 0x303   : > { %5163 = vpow2.f32 %v4438_v60 }
 0x304   : > { %5165 = vpow2.f32 %v4436_v20 }
 0x30b   : > { %v5160_v25 = vpop.eup %5159 }
 0x30c   : > { %v5162_v51 = vpop.eup %5161  ;;  %v2525_v38 = vadd.f32 1.0, %v5160_v25 }
 0x30d   : > { %v5164_v15 = vpop.eup %5163  ;;  %v2523_v9 = vadd.f32 1.0, %v5162_v51 }
 0x30e   : > { %v2526_v63 = vadd.f32 1.0, %v5164_v15  ;;  %v5166_v8 = vpop.eup %5165  ;;  %5167 = vrcp.f32 %v2525_v38 }
 0x30f   : > { %v2524_v3 = vadd.f32 1.0, %v5166_v8  ;;  %v2769_v5 = vpop.permute.xlu1 %2768 }
 0x310   : > { %5169 = vrcp.f32 %v2526_v63 }
 0x311   : > { %5171 = vrcp.f32 %v2523_v9  ;;  %v2767_v33 = vpop.permute.xlu0 %2766 }
 0x312   : > { %5173 = vrcp.f32 %v2524_v3  ;;  %4855 = vmatprep.mubr.msk.bf16.mxu1 %vm1703_vm8, %v2767_v33 }
 0x313   : > { %4856 = vmatmul.mubr.msk.bf16.gmra.mrb[32].mxu1 %vm1703_vm8, %v2769_v5 }
 0x318   : > { %v5168_v42 = vpop.eup %5167 }
 0x31a   : > { %v5170_v60 = vpop.eup %5169 }
 0x31b   : > { %v5172_v0 = vpop.eup %5171  ;;  %v2692_v51 = vpack.c.bf16 %v5170_v60, %v5168_v42 }
 0x31c   : > { %v4809_v20 = vpop.f32.mrb[52].mxu0  ;;  %v5174_v38 = vpop.eup %5173 }
 0x31d   : > { %v7099_v25 = vadd.f32 %v6972_v52, %v4809_v20  ;;  %v2236_v15 = vpop.f32.mrb[53].mxu0  ;;  %2784 = vrot.lane.b32.xlu1 %v2692_v51, %s5394_s21  ;;  %v2691_v3 = vpack.c.bf16 %v5174_v38, %v5172_v0 }
 0x31e   : > { %v7102_v63 = vadd.f32 %v6972_v52, %v2236_v15  ;;  %v4810_v8 = vpop.f32.mrb[54].mxu0 }
 0x31f   : > { %7769 = vst [vmem:[#allocation17_spill] sm:$0xff] %v7099_v25  ;;  %v4441_v9 = vmul.f32 -1.442695, %v7099_v25  ;;  %v7107_v33 = vadd.f32 %v6972_v52, %v4810_v8  ;;  %v2239_v5 = vpop.f32.mrb[55].mxu0  ;;  %2782 = vrot.lane.b32.xlu0 %v2691_v3, %s5394_s21 }
 0x320   : > { %7770 = vst [vmem:[#allocation18_spill] sm:$0xff] %v7102_v63  ;;  %v4439_v26 = vmul.f32 -1.442695, %v7102_v63  ;;  %v7111_v20 = vadd.f32 %v6972_v52, %v2239_v5 }
 0x321   : > { %7771 = vst [vmem:[#allocation19_spill] sm:$0xff] %v7107_v33  ;;  %5175 = vpow2.f32 %v4441_v9  ;;  %v4442_v42 = vmul.f32 -1.442695, %v7107_v33 }
 0x322   : > { %7772 = vst [vmem:[#allocation20_spill] sm:$0xff] %v7111_v20  ;;  %5177 = vpow2.f32 %v4439_v26  ;;  %v4440_v60 = vmul.f32 -1.442695, %v7111_v20 }
 0x323   : > { %5179 = vpow2.f32 %v4442_v42 }
 0x324   : > { %5181 = vpow2.f32 %v4440_v60 }
 0x32b   : > { %v5176_v0 = vpop.eup %5175 }
 0x32c   : > { %v5178_v51 = vpop.eup %5177  ;;  %v2529_v15 = vadd.f32 1.0, %v5176_v0 }
 0x32d   : > { %v5180_v38 = vpop.eup %5179  ;;  %v2527_v8 = vadd.f32 1.0, %v5178_v51 }
 0x32e   : > { %v2530_v25 = vadd.f32 1.0, %v5180_v38  ;;  %v5182_v63 = vpop.eup %5181  ;;  %5183 = vrcp.f32 %v2529_v15 }
 0x32f   : > { %v2528_v5 = vadd.f32 1.0, %v5182_v63  ;;  %v2773_v3 = vpop.permute.xlu1 %2772 }
 0x330   : > { %5185 = vrcp.f32 %v2530_v25 }
 0x331   : > { %5187 = vrcp.f32 %v2527_v8  ;;  %v2771_v9 = vpop.permute.xlu0 %2770 }
 0x332   : > { %5189 = vrcp.f32 %v2528_v5  ;;  %4859 = vmatprep.mubr.msk.bf16.mxu1 %vm1703_vm8, %v2771_v9 }
 0x333   : > { %4860 = vmatmul.mubr.msk.bf16.gmra.mrb[36].mxu1 %vm1703_vm8, %v2773_v3 }
 0x338   : > { %v5184_v26 = vpop.eup %5183 }
 0x33a   : > { %v5186_v42 = vpop.eup %5185 }
 0x33b   : > { %v5188_v20 = vpop.eup %5187  ;;  %v2694_v51 = vpack.c.bf16 %v5186_v42, %v5184_v26 }
 0x33c   : > { %v4813_v60 = vpop.f32.mrb[56].mxu0  ;;  %v5190_v15 = vpop.eup %5189 }
 0x33d   : > { %v7119_v0 = vadd.f32 %v6972_v52, %v4813_v60  ;;  %v2252_v38 = vpop.f32.mrb[57].mxu0  ;;  %2788 = vrot.lane.b32.xlu1 %v2694_v51, %s5394_s21  ;;  %v2693_v5 = vpack.c.bf16 %v5190_v15, %v5188_v20 }
 0x33e   : > { %v7122_v25 = vadd.f32 %v6972_v52, %v2252_v38  ;;  %v4814_v63 = vpop.f32.mrb[58].mxu0 }
 0x33f   : > { %7773 = vst [vmem:[#allocation21_spill] sm:$0xff] %v7119_v0  ;;  %v4445_v8 = vmul.f32 -1.442695, %v7119_v0  ;;  %v7127_v9 = vadd.f32 %v6972_v52, %v4814_v63  ;;  %v2255_v3 = vpop.f32.mrb[59].mxu0  ;;  %2786 = vrot.lane.b32.xlu0 %v2693_v5, %s5394_s21 }
 0x340   : > { %7774 = vst [vmem:[#allocation22_spill] sm:$0xff] %v7122_v25  ;;  %v4443_v33 = vmul.f32 -1.442695, %v7122_v25  ;;  %v7131_v60 = vadd.f32 %v6972_v52, %v2255_v3 }
 0x341   : > { %7775 = vst [vmem:[#allocation23_spill] sm:$0xff] %v7127_v9  ;;  %5191 = vpow2.f32 %v4445_v8  ;;  %v4446_v26 = vmul.f32 -1.442695, %v7127_v9 }
 0x342   : > { %7776 = vst [vmem:[#allocation24_spill] sm:$0xff] %v7131_v60  ;;  %5193 = vpow2.f32 %v4443_v33  ;;  %v4444_v42 = vmul.f32 -1.442695, %v7131_v60 }
 0x343   : > { %5195 = vpow2.f32 %v4446_v26 }
 0x344   : > { %5197 = vpow2.f32 %v4444_v42 }
 0x34b   : > { %v5192_v20 = vpop.eup %5191 }
 0x34c   : > { %v5194_v51 = vpop.eup %5193  ;;  %v2533_v38 = vadd.f32 1.0, %v5192_v20 }
 0x34d   : > { %v5196_v15 = vpop.eup %5195  ;;  %v2531_v63 = vadd.f32 1.0, %v5194_v51 }
 0x34e   : > { %v2534_v0 = vadd.f32 1.0, %v5196_v15  ;;  %v5198_v25 = vpop.eup %5197  ;;  %5199 = vrcp.f32 %v2533_v38 }
 0x34f   : > { %v2532_v3 = vadd.f32 1.0, %v5198_v25  ;;  %v2777_v5 = vpop.permute.xlu1 %2776 }
 0x350   : > { %5201 = vrcp.f32 %v2534_v0 }
 0x351   : > { %5203 = vrcp.f32 %v2531_v63  ;;  %v2775_v8 = vpop.permute.xlu0 %2774 }
 0x352   : > { %5205 = vrcp.f32 %v2532_v3  ;;  %4863 = vmatprep.mubr.msk.bf16.mxu1 %vm1703_vm8, %v2775_v8 }
 0x353   : > { %4864 = vmatmul.mubr.msk.bf16.gmra.mrb[40].mxu1 %vm1703_vm8, %v2777_v5 }
 0x358   : > { %v5200_v20 = vpop.eup %5199 }
 0x359   : > { %v4817_v33 = vpop.f32.mrb[60].mxu0 }
 0x35a   : > { %v7139_v26 = vadd.f32 %v6972_v52, %v4817_v33  ;;  %v2268_v42 = vpop.f32.mrb[61].mxu0  ;;  %v5202_v0 = vpop.eup %5201 }
 0x35b   : > { %v7142_v51 = vadd.f32 %v6972_v52, %v2268_v42  ;;  %v4818_v38 = vpop.f32.mrb[62].mxu0  ;;  %v5204_v8 = vpop.eup %5203  ;;  %v2696_v60 = vpack.c.bf16 %v5202_v0, %v5200_v20 }
 0x35c   : > { %7777 = vst [vmem:[#allocation25_spill] sm:$0xff] %v7139_v26  ;;  %v4449_v25 = vmul.f32 -1.442695, %v7139_v26  ;;  %v7146_v15 = vadd.f32 %v6972_v52, %v4818_v38  ;;  %v2271_v63 = vpop.f32.mrb[63].mxu0  ;;  %v4825_v3 = vpop.f32.mrb[0].mxu1 }
 0x35d   : > { %7778 = vst [vmem:[#allocation26_spill] sm:$0xff] %v7142_v51  ;;  %v4447_v5 = vmul.f32 -1.442695, %v7142_v51  ;;  %v7150_v33 = vadd.f32 %v6972_v52, %v2271_v63  ;;  %v2941_v9 = vpop.f32.mrb[1].mxu1  ;;  %v5206_v44 = vpop.eup %5205  ;;  %2792 = vrot.lane.b32.xlu1 %v2696_v60, %s5394_s21 }
 0x35e   : > { %7779 = vst [vmem:[#allocation27_spill] sm:$0xff] %v7146_v15  ;;  %5207 = vpow2.f32 %v4449_v25  ;;  %v4450_v42 = vmul.f32 -1.442695, %v7146_v15  ;;  %v4826_v32 = vpop.f32.mrb[2].mxu1  ;;  %v2695_v26 = vpack.c.bf16 %v5206_v44, %v5204_v8 }
 0x35f   : > { %7780 = vst [vmem:[#allocation28_spill] sm:$0xff] %v7150_v33  ;;  %v2944_v38 = vpop.f32.mrb[3].mxu1  ;;  %5209 = vpow2.f32 %v4447_v5  ;;  %v4448_v28 = vmul.f32 -1.442695, %v7150_v33 }
 0x360   : > { %2790 = vrot.lane.b32.xlu0 %v2695_v26, %s5394_s21  ;;  %5211 = vpow2.f32 %v4450_v42 }
 0x361   : > { %5213 = vpow2.f32 %v4448_v28 }
 0x364   : > { %v4829_v52 = vpop.f32.mrb[4].mxu1 }
 0x365   : > { %v2957_v63 = vpop.f32.mrb[5].mxu1 }
 0x366   : > { %v4830_v20 = vpop.f32.mrb[6].mxu1 }
 0x367   : > { %v2960_v0 = vpop.f32.mrb[7].mxu1 }
 0x368   : > { %v5208_v51 = vpop.eup %5207 }
 0x369   : > { %v5210_v25 = vpop.eup %5209  ;;  %v2537_v4 = vadd.f32 1.0, %v5208_v51 }
 0x36a   : > { %v5212_v15 = vpop.eup %5211  ;;  %v2535_v39 = vadd.f32 1.0, %v5210_v25 }
 0x36b   : > { %v2538_v60 = vadd.f32 1.0, %v5212_v15  ;;  %v5214_v8 = vpop.eup %5213  ;;  %5215 = vrcp.f32 %v2537_v4 }
 0x36c   : > { %v4833_v29 = vpop.f32.mrb[8].mxu1  ;;  %v2536_v33 = vadd.f32 1.0, %v5214_v8 }
 0x36d   : > { %v2973_v44 = vpop.f32.mrb[9].mxu1  ;;  %5217 = vrcp.f32 %v2538_v60 }
 0x36e   : > { %v4834_v5 = vpop.f32.mrb[10].mxu1  ;;  %5219 = vrcp.f32 %v2535_v39 }
 0x36f   : > { %v2976_v26 = vpop.f32.mrb[11].mxu1  ;;  %5221 = vrcp.f32 %v2536_v33  ;;  %v2781_v42 = vpop.permute.xlu1 %2780 }
 0x371   : > { %v2779_v28 = vpop.permute.xlu0 %2778 }
 0x372   : > { %4867 = vmatprep.mubr.msk.bf16.mxu1 %vm1703_vm8, %v2779_v28 }
 0x373   : > { %4868 = vmatmul.mubr.msk.bf16.gmra.mrb[44].mxu1 %vm1703_vm8, %v2781_v42 }
 0x374   : > { %v4837_v56 = vpop.f32.mrb[12].mxu1 }
 0x375   : > { %v2989_v51 = vpop.f32.mrb[13].mxu1  ;;  %v5216_v15 = vpop.eup %5215 }
 0x376   : > { %v4838_v25 = vpop.f32.mrb[14].mxu1 }
 0x377   : > { %v2992_v17 = vpop.f32.mrb[15].mxu1  ;;  %v5218_v59 = vpop.eup %5217 }
 0x378   : > { %v5220_v45 = vpop.eup %5219  ;;  %v2698_v4 = vpack.c.bf16 %v5218_v59, %v5216_v15  ;;  %v3262_v15 = vmul.f32 1.442695, %v6584_v37 }
 0x379   : > { %v5222_v34 = vpop.eup %5221 }
 0x37a   : > { %2796 = vrot.lane.b32.xlu1 %v2698_v4, %s5394_s21  ;;  %v2697_v60 = vpack.c.bf16 %v5222_v34, %v5220_v45  ;;  %v3260_v4 = vmul.f32 1.442695, %v6524_v2 }
 0x37c   : > { %v4841_v39 = vpop.f32.mrb[16].mxu1  ;;  %2794 = vrot.lane.b32.xlu0 %v2697_v60, %s5394_s21  ;;  %v3274_v60 = vmul.f32 1.442695, %v6634_v47 }
 0x37d   : > { %v3005_v33 = vpop.f32.mrb[17].mxu1 }
 0x37e   : > { %v4842_v8 = vpop.f32.mrb[18].mxu1  ;;  %3586 = vrot.lane.b32.xlu1 %v4826_v32, %s5388_s25 }
 0x37f   : > { %v3008_v28 = vpop.f32.mrb[19].mxu1 }
 0x380   : > { %3584 = vrot.lane.b32.xlu0 %v4825_v3, %s5388_s25 }
 0x382   : > { %3582 = vrot.lane.b32.xlu1 %v2944_v38, %s5388_s25 }
 0x384   : > { %3580 = vrot.lane.b32.xlu0 %v2941_v9, %s5388_s25 }
 0x386   : > { %3594 = vrot.lane.b32.xlu1 %v4830_v20, %s5388_s25 }
 0x387   : > { %v4845_v42 = vpop.f32.mrb[20].mxu1 }
 0x388   : > { %v3021_v59 = vpop.f32.mrb[21].mxu1  ;;  %3592 = vrot.lane.b32.xlu0 %v4829_v52, %s5388_s25 }
 0x389   : > { %v4846_v45 = vpop.f32.mrb[22].mxu1 }
 0x38a   : > { %v3024_v34 = vpop.f32.mrb[23].mxu1  ;;  %3590 = vrot.lane.b32.xlu1 %v2960_v0, %s5388_s25 }
 0x38c   : > { %3588 = vrot.lane.b32.xlu0 %v2957_v63, %s5388_s25 }
 0x38e   : > { %3602 = vrot.lane.b32.xlu1 %v4834_v5, %s5388_s25 }
 0x38f   : > { %v2785_v3 = vpop.permute.xlu1 %2784 }
 0x390   : > { %3600 = vrot.lane.b32.xlu0 %v4833_v29, %s5388_s25 }
 0x391   : > { %v2783_v32 = vpop.permute.xlu0 %2782 }
 0x392   : > { %4871 = vmatprep.mubr.msk.bf16.mxu1 %vm1703_vm8, %v2783_v32  ;;  %3598 = vrot.lane.b32.xlu1 %v2976_v26, %s5388_s25 }
 0x393   : > { %4872 = vmatmul.mubr.msk.bf16.gmra.mrb[48].mxu1 %vm1703_vm8, %v2785_v3 }
 0x394   : > { %3596 = vrot.lane.b32.xlu0 %v2973_v44, %s5388_s25 }
 0x396   : > { %3610 = vrot.lane.b32.xlu1 %v4838_v25, %s5388_s25  ;;  %v3264_v25 = vmul.f32 1.442695, %v6516_v27 }
 0x398   : > { %3608 = vrot.lane.b32.xlu0 %v4837_v56, %s5388_s25 }
 0x39a   : > { %3606 = vrot.lane.b32.xlu1 %v2992_v17, %s5388_s25 }
 0x39c   : > { %3604 = vrot.lane.b32.xlu0 %v2989_v51, %s5388_s25  ;;  %v3266_v51 = vmul.f32 1.442695, %v6535_v23 }
 0x39e   : > { %3618 = vrot.lane.b32.xlu1 %v4842_v8, %s5388_s25  ;;  %5223 = vpow2.f32 %v3266_v51 }
 0x39f   : > { %5225 = vpow2.f32 %v3264_v25 }
 0x3a0   : > { %3616 = vrot.lane.b32.xlu0 %v4841_v39, %s5388_s25  ;;  %5227 = vpow2.f32 %v3262_v15 }
 0x3a1   : > { %5229 = vpow2.f32 %v3260_v4 }
 0x3a2   : > { %3614 = vrot.lane.b32.xlu1 %v3008_v28, %s5388_s25  ;;  %5231 = vpow2.f32 %v3274_v60 }
 0x3a4   : > { %3612 = vrot.lane.b32.xlu0 %v3005_v33, %s5388_s25  ;;  %v3272_v33 = vmul.f32 1.442695, %v6622_v48 }
 0x3a6   : > { %3626 = vrot.lane.b32.xlu1 %v4846_v45, %s5388_s25  ;;  %5233 = vpow2.f32 %v3272_v33 }
 0x3a7   : > { %v4849_v29 = vpop.f32.mrb[24].mxu1 }
 0x3a8   : > { %v3037_v9 = vpop.f32.mrb[25].mxu1  ;;  %3624 = vrot.lane.b32.xlu0 %v4845_v42, %s5388_s25  ;;  %v3270_v42 = vmul.f32 1.442695, %v6628_v16  ;;  %v5224_v45 = vpop.eup %5223 }
 0x3a9   : > { %v4850_v38 = vpop.f32.mrb[26].mxu1  ;;  %v5226_v3 = vpop.eup %5225 }
 0x3aa   : > { %v3040_v56 = vpop.f32.mrb[27].mxu1  ;;  %3622 = vrot.lane.b32.xlu1 %v3024_v34, %s5388_s25  ;;  %v3268_v34 = vmul.f32 1.442695, %v6647_v24  ;;  %5235 = vpow2.f32 %v3270_v42  ;;  %v3290_v42 = vmul.f32 1.442695, %v6683_v10 }
 0x3ac   : > { %3620 = vrot.lane.b32.xlu0 %v3021_v59, %s5388_s25  ;;  %5237 = vpow2.f32 %v3268_v34 }
 0x3ae   : > { %3634 = vrot.lane.b32.xlu1 %v4850_v38, %s5388_s25  ;;  %v4488_v38 = vadd.f32 -1.0, %v5224_v45 }
 0x3af   : > { %v2789_v52 = vpop.permute.xlu1 %2788 }
 0x3b0   : > { %3632 = vrot.lane.b32.xlu0 %v4849_v29, %s5388_s25  ;;  %v3282_v29 = vmul.f32 1.442695, %v6669_v1 }
 0x3b1   : > { %v2787_v17 = vpop.permute.xlu0 %2786 }
 0x3b2   : > { %4875 = vmatprep.mubr.msk.bf16.mxu1 %vm1703_vm8, %v2787_v17  ;;  %3630 = vrot.lane.b32.xlu1 %v3040_v56, %s5388_s25  ;;  %v5228_v56 = vpop.eup %5227  ;;  %v3280_v17 = vmul.f32 1.442695, %v6656_v57  ;;  %5239 = vpow2.f32 %v3282_v29 }
 0x3b3   : > { %4876 = vmatmul.mubr.msk.bf16.gmra.mrb[52].mxu1 %vm1703_vm8, %v2789_v52  ;;  %v4486_v25 = vadd.f32 -1.0, %v5228_v56 }
 0x3b4   : > { %3628 = vrot.lane.b32.xlu0 %v3037_v9, %s5388_s25  ;;  %5241 = vpow2.f32 %v3280_v17 }
 0x3c7   : > { %v4853_v63 = vpop.f32.mrb[28].mxu1 }
 0x3c8   : > { %3640 = vrot.lane.b32.xlu0 %v4853_v63, %s5388_s25  ;;  %v3053_v20 = vpop.f32.mrb[29].mxu1  ;;  %v4487_v63 = vadd.f32 -1.0, %v5226_v3 }
 0x3c9   : > { %v4854_v0 = vpop.f32.mrb[30].mxu1 }
 0x3ca   : > { %3642 = vrot.lane.b32.xlu1 %v4854_v0, %s5388_s25  ;;  %v3056_v44 = vpop.f32.mrb[31].mxu1  ;;  %v3278_v0 = vmul.f32 1.442695, %v6663_v11 }
 0x3cc   : > { %3636 = vrot.lane.b32.xlu0 %v3053_v20, %s5388_s25  ;;  %v5230_v20 = vpop.eup %5229  ;;  %5243 = vpow2.f32 %v3278_v0  ;;  %v3286_v0 = vmul.f32 1.442695, %v6695_v13 }
 0x3cd   : > { %v5232_v15 = vpop.eup %5231 }
 0x3ce   : > { %3638 = vrot.lane.b32.xlu1 %v3056_v44, %s5388_s25  ;;  %v4492_v3 = vadd.f32 -1.0, %v5232_v15 }
 0x3cf   : > { %v2793_v26 = vpop.permute.xlu1 %2792 }
 0x3d2   : > { %v2791_v5 = vpop.permute.xlu0 %2790 }
 0x3d3   : > { %4879 = vmatprep.mubr.msk.bf16.mxu1 %vm1703_vm8, %v2791_v5  ;;  %v3276_v5 = vmul.f32 1.442695, %v6676_v22 }
 0x3d4   : > { %4880 = vmatmul.mubr.msk.bf16.gmra.mrb[56].mxu1 %vm1703_vm8, %v2793_v26  ;;  %v3455_v26 = vsel %vm3199_vm13, %v6535_v23, %v4488_v38  ;;  %vm3209_vm13 = vcmp.gt.f32.partialorder %v6695_v13, 0.0 }
 0x3d5   : > { %5245 = vpow2.f32 %v3276_v5 }
 0x3d6   : > { %5247 = vpow2.f32 %v3290_v42  ;;  %v3298_v42 = vmul.f32 1.442695, %v6742_v53 }
 0x3e6   : > { %v4857_v39 = vpop.f32.mrb[32].mxu1 }
 0x3e7   : > { %3648 = vrot.lane.b32.xlu0 %v4857_v39, %s5388_s25  ;;  %v3069_v8 = vpop.f32.mrb[33].mxu1 }
 0x3e8   : > { %v4858_v28 = vpop.f32.mrb[34].mxu1 }
 0x3e9   : > { %3650 = vrot.lane.b32.xlu1 %v4858_v28, %s5388_s25  ;;  %v3072_v59 = vpop.f32.mrb[35].mxu1  ;;  %v5234_v28 = vpop.eup %5233 }
 0x3ea   : > { %v5236_v29 = vpop.eup %5235 }
 0x3eb   : > { %3644 = vrot.lane.b32.xlu0 %v3069_v8, %s5388_s25  ;;  %v4485_v8 = vadd.f32 -1.0, %v5230_v20  ;;  %v5238_v20 = vpop.eup %5237 }
 0x3ec   : > { %v2797_v32 = vpop.permute.xlu1 %2796  ;;  %v5240_v15 = vpop.eup %5239 }
 0x3ed   : > { %3646 = vrot.lane.b32.xlu1 %v3072_v59, %s5388_s25 }
 0x3ee   : > { %v2795_v9 = vpop.permute.xlu0 %2794 }
 0x3ef   : > { %4883 = vmatprep.mubr.msk.bf16.mxu1 %vm1703_vm8, %v2795_v9  ;;  %v3288_v9 = vmul.f32 1.442695, %v6706_v36 }
 0x3f0   : > { %4884 = vmatmul.mubr.msk.bf16.gmra.mrb[60].mxu1 %vm1703_vm8, %v2797_v32  ;;  %v3587_v52 = vpop.permute.xlu1 %3586  ;;  %v3453_v32 = vsel %vm3197_vm0, %v6584_v37, %v4486_v25  ;;  %v4490_v25 = vadd.f32 -1.0, %v5236_v29  ;;  %v3296_v29 = vmul.f32 1.442695, %v6749_v35  ;;  %vm3206_vm8 = vcmp.gt.f32.partialorder %v6656_v57, 0.0 }
 0x3f1   : > { %v3775_v44 = vmul.f32 %v3587_v52, %v6535_v23  ;;  %v3454_v23 = vsel %vm3198_vm14, %v6516_v27, %v4487_v63  ;;  %v3452_v52 = vsel %vm3196_vm1, %v6524_v2, %v4485_v8  ;;  %v4491_v63 = vadd.f32 -1.0, %v5234_v28  ;;  %v5242_v28 = vpop.eup %5241 }
 0x3f2   : > { %v3585_v51 = vpop.permute.xlu0 %3584  ;;  %5249 = vpow2.f32 %v3288_v9  ;;  %v4489_v8 = vadd.f32 -1.0, %v5238_v20  ;;  %vm3208_vm14 = vcmp.gt.f32.partialorder %v6714_v12, 0.0  ;;  %vm3215_vm0 = vcmp.gt.f32.partialorder %v6742_v53, 0.0 }
 0x3f3   : > { %v3839_v4 = vsel %vm1443_vm4, %v3455_v26, %v3775_v44  ;;  %v3774_v60 = vmul.f32 %v3585_v51, %v6516_v27  ;;  %v3459_v51 = vsel %vm3203_vm2, %v6634_v47, %v4492_v3  ;;  %5251 = vpow2.f32 %v3286_v0  ;;  %v5244_v3 = vpop.eup %5243 }
 0x3f4   : > { %v4619_v39 = vpack.c.bf16 %v3839_v4, %v3839_v4  ;;  %v3583_v33 = vpop.permute.xlu1 %3582  ;;  %v3284_v4 = vmul.f32 1.442695, %v6714_v12  ;;  %vm3214_vm1 = vcmp.gt.f32.partialorder %v6749_v35, 0.0  ;;  %vm3213_vm2 = vcmp.gt.f32.partialorder %v6752_v41, 0.0 }
 0x3f5   : > { %v3838_v59 = vsel %vm1443_vm4, %v3454_v23, %v3774_v60  ;;  %v3773_v45 = vmul.f32 %v3583_v33, %v6584_v37  ;;  %v3458_v33 = vsel %vm3202_vm3, %v6622_v48, %v4491_v63  ;;  %v3294_v63 = vmul.f32 1.442695, %v6752_v41 }
 0x3f6   : > { %4160 = vst.msk [vmem:[%s7224_s27 + $0xc] sm:$0xf] %vm4156_vm15, %v4619_v39  ;;  %v4618_v34 = vpack.c.bf16 %v3838_v59, %v3838_v59  ;;  %v3581_v27 = vpop.permute.xlu0 %3580  ;;  %5253 = vpow2.f32 %v3284_v4  ;;  %vm3212_vm3 = vcmp.gt.f32.partialorder %v6734_v18, 0.0 }
 0x3f7   : > { %v3837_v38 = vsel %vm1443_vm4, %v3453_v32, %v3773_v45  ;;  %v3772_v56 = vmul.f32 %v3581_v27, %v6524_v2  ;;  %v3457_v32 = vsel %vm3201_vm5, %v6628_v16, %v4490_v25  ;;  %v4496_v27 = vadd.f32 -1.0, %v5240_v15 }
 0x3f8   : > { %4159 = vst.msk [vmem:[%s7224_s27 + $0x8] sm:$0xf] %vm4156_vm15, %v4618_v34  ;;  %v4617_v17 = vpack.c.bf16 %v3837_v38, %v3837_v38  ;;  %v3595_v37 = vpop.permute.xlu1 %3594  ;;  %5255 = vpow2.f32 %v3298_v42  ;;  %vm3219_vm5 = vcmp.gt.f32.partialorder %v6857_v19, 0.0 }
 0x3f9   : > { %v3836_v44 = vsel %vm1443_vm4, %v3452_v52, %v3772_v56  ;;  %v3779_v5 = vmul.f32 %v3595_v37, %v6634_v47  ;;  %v4495_v52 = vadd.f32 -1.0, %v5242_v28  ;;  %v5246_v37 = vpop.eup %5245  ;;  %5257 = vpow2.f32 %v3296_v29 }
 0x3fa   : > { %4158 = vst.msk [vmem:[%s7224_s27 + $0x4] sm:$0xf] %vm4156_vm15, %v4617_v17  ;;  %v4616_v26 = vpack.c.bf16 %v3836_v44, %v3836_v44  ;;  %v3593_v2 = vpop.permute.xlu0 %3592  ;;  %v3456_v17 = vsel %vm3200_vm6, %v6647_v24, %v4489_v8  ;;  %5259 = vpow2.f32 %v3294_v63  ;;  %vm3218_vm6 = vcmp.gt.f32.partialorder %v6844_v46, 0.0 }
 0x3fb   : > { %v3843_v60 = vsel %vm1443_vm4, %v3459_v51, %v3779_v5  ;;  %v3778_v39 = vmul.f32 %v3593_v2, %v6622_v48  ;;  %v3463_v5 = vsel %vm3207_vm7, %v6669_v1, %v4496_v27  ;;  %v5248_v51 = vpop.eup %5247  ;;  %v3292_v2 = vmul.f32 1.442695, %v6734_v18 }
 0x3fc   : > { %4157 = vst.msk [vmem:[%s7224_s27] sm:$0xf] %vm4156_vm15, %v4616_v26  ;;  %v4623_v23 = vpack.c.bf16 %v3843_v60, %v3843_v60  ;;  %v3591_v47 = vpop.permute.xlu1 %3590  ;;  %v4494_v26 = vadd.f32 -1.0, %v5244_v3  ;;  %v3462_v60 = vsel %vm3206_vm8, %v6656_v57, %v4495_v52  ;;  %vm3217_vm7 = vcmp.gt.f32.partialorder %v6865_v30, 0.0 }
 0x3fd   : > { %v3842_v59 = vsel %vm1443_vm4, %v3458_v33, %v3778_v39  ;;  %v3777_v45 = vmul.f32 %v3591_v47, %v6628_v16  ;;  %v4493_v39 = vadd.f32 -1.0, %v5246_v37  ;;  %v3306_v33 = vmul.f32 1.442695, %v6857_v19 }
 0x3fe   : > { %4164 = vst.msk [vmem:[%s7224_s27 + $0x1c] sm:$0xf] %vm4156_vm15, %v4623_v23  ;;  %v4622_v34 = vpack.c.bf16 %v3842_v59, %v3842_v59  ;;  %v3589_v48 = vpop.permute.xlu0 %3588  ;;  %v5250_v23 = vpop.eup %5249  ;;  %v3461_v42 = vsel %vm3205_vm9, %v6663_v11, %v4494_v26  ;;  %5261 = vpow2.f32 %v3292_v2  ;;  %vm3216_vm8 = vcmp.gt.f32.partialorder %v6851_v49, 0.0 }
 0x3ff   : > { %v3841_v9 = vsel %vm1443_vm4, %v3457_v32, %v3777_v45  ;;  %v3776_v38 = vmul.f32 %v3589_v48, %v6647_v24  ;;  %v4500_v45 = vadd.f32 -1.0, %v5248_v51  ;;  %v3304_v32 = vmul.f32 1.442695, %v6844_v46 }
 0x400   : > { %4163 = vst.msk [vmem:[%s7224_s27 + $0x18] sm:$0xf] %vm4156_vm15, %v4622_v34  ;;  %v4621_v56 = vpack.c.bf16 %v3841_v9, %v3841_v9  ;;  %v3603_v16 = vpop.permute.xlu1 %3602  ;;  %v5252_v34 = vpop.eup %5251  ;;  %v3460_v29 = vsel %vm3204_vm10, %v6676_v22, %v4493_v39  ;;  %5263 = vpow2.f32 %v3306_v33  ;;  %vm3223_vm9 = vcmp.gt.f32.partialorder %v6902_v43, 0.0 }
 0x401   : > { %v3840_v20 = vsel %vm1443_vm4, %v3456_v17, %v3776_v38  ;;  %v3783_v0 = vmul.f32 %v3603_v16, %v6669_v1  ;;  %v5254_v17 = vpop.eup %5253  ;;  %v3302_v16 = vmul.f32 1.442695, %v6865_v30  ;;  %5265 = vpow2.f32 %v3304_v32 }
 0x402   : > { %4162 = vst.msk [vmem:[%s7224_s27 + $0x14] sm:$0xf] %vm4156_vm15, %v4621_v56  ;;  %v4620_v44 = vpack.c.bf16 %v3840_v20, %v3840_v20  ;;  %v3601_v24 = vpop.permute.xlu0 %3600  ;;  %v4499_v56 = vadd.f32 -1.0, %v5250_v23  ;;  %v3467_v20 = vsel %vm3211_vm11, %v6683_v10, %v4500_v45  ;;  %vm3222_vm10 = vcmp.gt.f32.partialorder %v6892_v6, 0.0 }
 0x403   : > { %v3847_v25 = vsel %vm1443_vm4, %v3463_v5, %v3783_v0  ;;  %v3782_v15 = vmul.f32 %v3601_v24, %v6656_v57  ;;  %v5256_v5 = vpop.eup %5255  ;;  %v3300_v24 = vmul.f32 1.442695, %v6851_v49  ;;  %5267 = vpow2.f32 %v3302_v16 }
 0x404   : > { %4161 = vst.msk [vmem:[%s7224_s27 + $0x10] sm:$0xf] %vm4156_vm15, %v4620_v44  ;;  %v4627_v4 = vpack.c.bf16 %v3847_v25, %v3847_v25  ;;  %v3599_v1 = vpop.permute.xlu1 %3598  ;;  %v4498_v44 = vadd.f32 -1.0, %v5252_v34  ;;  %vm3221_vm11 = vcmp.gt.f32.partialorder %v6907_v62, 0.0 }
 0x405   : > { %v3846_v47 = vsel %vm1443_vm4, %v3462_v60, %v3782_v15  ;;  %v3781_v8 = vmul.f32 %v3599_v1, %v6663_v11  ;;  %v4497_v15 = vadd.f32 -1.0, %v5254_v17  ;;  %v3314_v60 = vmul.f32 1.442695, %v6902_v43 }
 0x406   : > { %4168 = vst.msk [vmem:[%s7224_s27 + $0x2c] sm:$0xf] %vm4156_vm15, %v4627_v4  ;;  %v4626_v28 = vpack.c.bf16 %v3846_v47, %v3846_v47  ;;  %v4861_v59 = vpop.f32.mrb[36].mxu1  ;;  %v3597_v57 = vpop.permute.xlu0 %3596  ;;  %v4504_v47 = vadd.f32 -1.0, %v5256_v5  ;;  %5269 = vpow2.f32 %v3300_v24 }
 0x407   : > { %v3845_v48 = vsel %vm1443_vm4, %v3461_v42, %v3781_v8  ;;  %v3780_v27 = vmul.f32 %v3597_v57, %v6676_v22  ;;  %3656 = vrot.lane.b32.xlu0 %v4861_v59, %s5388_s25  ;;  %v3085_v3 = vpop.f32.mrb[37].mxu1  ;;  %v5258_v4 = vpop.eup %5257  ;;  %v3464_v45 = vsel %vm3208_vm14, %v6714_v12, %v4497_v15  ;;  %5271 = vpow2.f32 %v3314_v60 }
 0x408   : > { %4167 = vst.msk [vmem:[%s7224_s27 + $0x28] sm:$0xf] %vm4156_vm15, %v4626_v28  ;;  %v4625_v11 = vpack.c.bf16 %v3845_v48, %v3845_v48  ;;  %v4862_v9 = vpop.f32.mrb[38].mxu1  ;;  %v3611_v38 = vpop.permute.xlu1 %3610  ;;  %v3312_v28 = vmul.f32 1.442695, %v6892_v6  ;;  %v4503_v34 = vadd.f32 -1.0, %v5258_v4 }
 0x409   : > { %v3844_v52 = vsel %vm1443_vm4, %v3460_v29, %v3780_v27  ;;  %v3787_v37 = vmul.f32 %v3611_v38, %v6683_v10  ;;  %3658 = vrot.lane.b32.xlu1 %v4862_v9, %s5388_s25  ;;  %v3088_v63 = vpop.f32.mrb[39].mxu1  ;;  %v3466_v10 = vsel %vm3210_vm12, %v6706_v36, %v4499_v56  ;;  %v5260_v8 = vpop.eup %5259  ;;  %v3310_v48 = vmul.f32 1.442695, %v6907_v62 }
 0x40a   : > { %4166 = vst.msk [vmem:[%s7224_s27 + $0x24] sm:$0xf] %vm4156_vm15, %v4625_v11  ;;  %v4624_v22 = vpack.c.bf16 %v3844_v52, %v3844_v52  ;;  %v3609_v0 = vpop.permute.xlu0 %3608  ;;  %v5262_v32 = vpop.eup %5261  ;;  %v3471_v29 = vsel %vm3215_vm0, %v6742_v53, %v4504_v47  ;;  %v4502_v9 = vadd.f32 -1.0, %v5260_v8  ;;  %5273 = vpow2.f32 %v3312_v28 }
 0x40b   : > { %v3851_v26 = vsel %vm1443_vm4, %v3467_v20, %v3787_v37  ;;  %v3786_v51 = vmul.f32 %v3609_v0, %v6706_v36  ;;  %3652 = vrot.lane.b32.xlu0 %v3085_v3, %s5388_s25  ;;  %v3465_v36 = vsel %vm3209_vm13, %v6695_v13, %v4498_v44  ;;  %v5264_v38 = vpop.eup %5263  ;;  %v3308_v56 = vmul.f32 1.442695, %v6896_v50 }
 0x40c   : > { %4165 = vst.msk [vmem:[%s7224_s27 + $0x20] sm:$0xf] %vm4156_vm15, %v4624_v22  ;;  %v4631_v2 = vpack.c.bf16 %v3851_v26, %v3851_v26  ;;  %v3607_v25 = vpop.permute.xlu1 %3606  ;;  %v3470_v37 = vsel %vm3214_vm1, %v6749_v35, %v4503_v34  ;;  %v5266_v22 = vpop.eup %5265  ;;  %5275 = vpow2.f32 %v3310_v48  ;;  %v3469_v5 = vsel %vm3213_vm2, %v6752_v41, %v4502_v9 }
 0x40d   : > { %v3850_v1 = vsel %vm1443_vm4, %v3466_v10, %v3786_v51  ;;  %v3785_v39 = vmul.f32 %v3607_v25, %v6695_v13  ;;  %3654 = vrot.lane.b32.xlu1 %v3088_v63, %s5388_s25  ;;  %v4508_v26 = vadd.f32 -1.0, %v5264_v38  ;;  %5277 = vpow2.f32 %v3308_v56 }
 0x40e   : > { %4172 = vst.msk [vmem:[%s7224_s27 + $0x3c] sm:$0xf] %vm4156_vm15, %v4631_v2  ;;  %v4630_v23 = vpack.c.bf16 %v3850_v1, %v3850_v1  ;;  %v3605_v33 = vpop.permute.xlu0 %3604  ;;  %v4507_v4 = vadd.f32 -1.0, %v5266_v22  ;;  %vm3220_vm12 = vcmp.gt.f32.partialorder %v6896_v50, 0.0  ;;  %vm3226_vm13 = vcmp.gt.f32.partialorder %v6930_v58, 0.0 }
 0x40f   : > { %v3849_v42 = vsel %vm1443_vm4, %v3465_v36, %v3785_v39  ;;  %v3784_v59 = vmul.f32 %v3605_v33, %v6714_v12  ;;  %vm3227_vm14 = vcmp.gt.f32.partialorder %v6940_v14, 0.0  ;;  %vm3224_vm0 = vcmp.gt.f32.partialorder %v6934_v54, 0.0 }
 0x410   : > { %4171 = vst.msk [vmem:[%s7224_s27 + $0x38] sm:$0xf] %vm4156_vm15, %v4630_v23  ;;  %v4629_v57 = vpack.c.bf16 %v3849_v42, %v3849_v42  ;;  %v3619_v13 = vpop.permute.xlu1 %3618  ;;  %v3475_v23 = vsel %vm3219_vm5, %v6857_v19, %v4508_v26  ;;  %v3474_v42 = vsel %vm3218_vm6, %v6844_v46, %v4507_v4  ;;  %vm3225_vm1 = vcmp.gt.f32.partialorder %v6945_v61, 0.0 }
 0x411   : > { %v3848_v27 = vsel %vm1443_vm4, %v3464_v45, %v3784_v59  ;;  %v3791_v3 = vmul.f32 %v3619_v13, %v6742_v53  ;;  %v4501_v53 = vadd.f32 -1.0, %v5262_v32  ;;  %vm3230_vm2 = vcmp.gt.f32.partialorder %v6975_v7, 0.0 }
 0x412   : > { %4170 = vst.msk [vmem:[%s7224_s27 + $0x34] sm:$0xf] %vm4156_vm15, %v4629_v57  ;;  %v4628_v11 = vpack.c.bf16 %v3848_v27, %v3848_v27  ;;  %v3617_v12 = vpop.permute.xlu0 %3616  ;;  %vm3228_vm5 = vcmp.gt.f32.partialorder %v6980_v21, 0.0  ;;  %vm3229_vm6 = vcmp.gt.f32.partialorder %v6992_v40, 0.0 }
 0x413   : > { %v3855_v17 = vsel %vm1443_vm4, %v3471_v29, %v3791_v3  ;;  %v3790_v16 = vmul.f32 %v3617_v12, %v6749_v35  ;;  %v5268_v35 = vpop.eup %5267  ;;  %v3468_v25 = vsel %vm3212_vm3, %v6734_v18, %v4501_v53  ;;  %vm3231_vm3 = vcmp.gt.f32.partialorder %v6986_v55, 0.0 }
 0x414   : > { %4169 = vst.msk [vmem:[%s7224_s27 + $0x30] sm:$0xf] %vm4156_vm15, %v4628_v11  ;;  %v4635_v52 = vpack.c.bf16 %v3855_v17, %v3855_v17  ;;  %v3615_v63 = vpop.permute.xlu1 %3614  ;;  %v4506_v33 = vadd.f32 -1.0, %v5268_v35 }
 0x415   : > { %v3854_v20 = vsel %vm1443_vm4, %v3470_v37, %v3790_v16  ;;  %v3789_v0 = vmul.f32 %v3615_v63, %v6752_v41  ;;  %v5270_v41 = vpop.eup %5269 }
 0x416   : > { %4176 = vst.msk [vmem:[%s7224_s27 + $0x4c] sm:$0xf] %vm4156_vm15, %v4635_v52  ;;  %v4634_v44 = vpack.c.bf16 %v3854_v20, %v3854_v20  ;;  %v3613_v24 = vpop.permute.xlu0 %3612  ;;  %v5272_v47 = vpop.eup %5271  ;;  %v4505_v57 = vadd.f32 -1.0, %v5270_v41  ;;  %v3473_v32 = vsel %vm3217_vm7, %v6865_v30, %v4506_v33  ;;  %vm3234_vm7 = vcmp.gt.f32.partialorder %v7016_v31, 0.0 }
 0x417   : > { %v3853_v51 = vsel %vm1443_vm4, %v3469_v5, %v3789_v0  ;;  %v3788_v2 = vmul.f32 %v3613_v24, %v6734_v18  ;;  %v5274_v45 = vpop.eup %5273  ;;  %v4512_v27 = vadd.f32 -1.0, %v5272_v47  ;;  %v3320_v24 = vmul.f32 1.442695, %v6930_v58 }
 0x418   : > { %4175 = vst.msk [vmem:[%s7224_s27 + $0x48] sm:$0xf] %vm4156_vm15, %v4634_v44  ;;  %v4633_v10 = vpack.c.bf16 %v3853_v51, %v3853_v51  ;;  %v3627_v15 = vpop.permute.xlu1 %3626  ;;  %v5276_v3 = vpop.eup %5275  ;;  %v3472_v12 = vsel %vm3216_vm8, %v6851_v49, %v4505_v57  ;;  %v4511_v38 = vadd.f32 -1.0, %v5274_v45 }
 0x419   : > { %v3852_v60 = vsel %vm1443_vm4, %v3468_v25, %v3788_v2  ;;  %v3795_v1 = vmul.f32 %v3627_v15, %v6857_v19  ;;  %v5278_v56 = vpop.eup %5277  ;;  %v3479_v52 = vsel %vm3223_vm9, %v6902_v43, %v4512_v27  ;;  %v4510_v63 = vadd.f32 -1.0, %v5276_v3 }
 0x41a   : > { %4174 = vst.msk [vmem:[%s7224_s27 + $0x44] sm:$0xf] %vm4156_vm15, %v4633_v10  ;;  %v4632_v39 = vpack.c.bf16 %v3852_v60, %v3852_v60  ;;  %v3625_v36 = vpop.permute.xlu0 %3624  ;;  %v3478_v20 = vsel %vm3222_vm10, %v6892_v6, %v4511_v38  ;;  %v4509_v44 = vadd.f32 -1.0, %v5278_v56  ;;  %v3322_v15 = vmul.f32 1.442695, %v6940_v14 }
 0x41b   : > { %v3859_v18 = vsel %vm1443_vm4, %v3475_v23, %v3795_v1  ;;  %v3794_v8 = vmul.f32 %v3625_v36, %v6844_v46  ;;  %v3477_v35 = vsel %vm3221_vm11, %v6907_v62, %v4510_v63  ;;  %5279 = vpow2.f32 %v3320_v24 }
 0x41c   : > { %4173 = vst.msk [vmem:[%s7224_s27 + $0x40] sm:$0xf] %vm4156_vm15, %v4632_v39  ;;  %v4639_v28 = vpack.c.bf16 %v3859_v18, %v3859_v18  ;;  %v3623_v59 = vpop.permute.xlu1 %3622  ;;  %v3316_v39 = vmul.f32 1.442695, %v6934_v54  ;;  %5281 = vpow2.f32 %v3322_v15  ;;  %v3318_v36 = vmul.f32 1.442695, %v6945_v61 }
 0x41d   : > { %v3858_v19 = vsel %vm1443_vm4, %v3474_v42, %v3794_v8  ;;  %v3793_v13 = vmul.f32 %v3623_v59, %v6865_v30 }
 0x41e   : > { %4180 = vst.msk [vmem:[%s7224_s27 + $0x5c] sm:$0xf] %vm4156_vm15, %v4639_v28  ;;  %v4638_v34 = vpack.c.bf16 %v3858_v19, %v3858_v19  ;;  %v3621_v48 = vpop.permute.xlu0 %3620  ;;  %5283 = vpow2.f32 %v3316_v39 }
 0x41f   : > { %v3857_v46 = vsel %vm1443_vm4, %v3473_v32, %v3793_v13  ;;  %v3792_v11 = vmul.f32 %v3621_v48, %v6851_v49  ;;  %5285 = vpow2.f32 %v3318_v36 }
 0x420   : > { %4179 = vst.msk [vmem:[%s7224_s27 + $0x58] sm:$0xf] %vm4156_vm15, %v4638_v34  ;;  %v4637_v29 = vpack.c.bf16 %v3857_v46, %v3857_v46  ;;  %v3635_v9 = vpop.permute.xlu1 %3634 }
 0x421   : > { %v3856_v30 = vsel %vm1443_vm4, %v3472_v12, %v3792_v11  ;;  %v3799_v17 = vmul.f32 %v3635_v9, %v6902_v43 }
 0x422   : > { %4178 = vst.msk [vmem:[%s7224_s27 + $0x54] sm:$0xf] %vm4156_vm15, %v4637_v29  ;;  %v4636_v16 = vpack.c.bf16 %v3856_v30, %v3856_v30  ;;  %v3633_v37 = vpop.permute.xlu0 %3632 }
 0x423   : > { %v3863_v53 = vsel %vm1443_vm4, %v3479_v52, %v3799_v17  ;;  %v3798_v49 = vmul.f32 %v3633_v37, %v6892_v6  ;;  %v3330_v37 = vmul.f32 1.442695, %v6986_v55 }
 0x424   : > { %4177 = vst.msk [vmem:[%s7224_s27 + $0x50] sm:$0xf] %vm4156_vm15, %v4636_v16  ;;  %v4643_v22 = vpack.c.bf16 %v3863_v53, %v3863_v53  ;;  %v3631_v0 = vpop.permute.xlu1 %3630 }
 0x425   : > { %v3862_v5 = vsel %vm1443_vm4, %v3478_v20, %v3798_v49  ;;  %v3797_v43 = vmul.f32 %v3631_v0, %v6907_v62  ;;  %v3476_v62 = vsel %vm3220_vm12, %v6896_v50, %v4509_v44  ;;  %v3326_v49 = vmul.f32 1.442695, %v6992_v40 }
 0x426   : > { %4184 = vst.msk [vmem:[%s7224_s27 + $0x6c] sm:$0xf] %vm4156_vm15, %v4643_v22  ;;  %v4642_v26 = vpack.c.bf16 %v3862_v5, %v3862_v5  ;;  %v4865_v51 = vpop.f32.mrb[40].mxu1  ;;  %v3629_v2 = vpop.permute.xlu0 %3628 }
 0x427   : > { %v3861_v6 = vsel %vm1443_vm4, %v3477_v35, %v3797_v43  ;;  %v3796_v10 = vmul.f32 %v3629_v2, %v6896_v50  ;;  %3664 = vrot.lane.b32.xlu0 %v4865_v51, %s5388_s25  ;;  %v3101_v25 = vpop.f32.mrb[41].mxu1  ;;  %v5280_v50 = vpop.eup %5279 }
 0x428   : > { %4183 = vst.msk [vmem:[%s7224_s27 + $0x68] sm:$0xf] %vm4156_vm15, %v4642_v26  ;;  %v4641_v4 = vpack.c.bf16 %v3861_v6, %v3861_v6  ;;  %v4866_v41 = vpop.f32.mrb[42].mxu1  ;;  %v5282_v33 = vpop.eup %5281  ;;  %v4515_v47 = vadd.f32 -1.0, %v5280_v50 }
 0x429   : > { %v3860_v60 = vsel %vm1443_vm4, %v3476_v62, %v3796_v10  ;;  %3666 = vrot.lane.b32.xlu1 %v4866_v41, %s5388_s25  ;;  %v3104_v1 = vpop.f32.mrb[43].mxu1  ;;  %v5284_v18 = vpop.eup %5283  ;;  %v4516_v28 = vadd.f32 -1.0, %v5282_v33 }
 0x42a   : > { %4182 = vst.msk [vmem:[%s7224_s27 + $0x64] sm:$0xf] %vm4156_vm15, %v4641_v4  ;;  %v4640_v23 = vpack.c.bf16 %v3860_v60, %v3860_v60  ;;  %v5286_v42 = vpop.eup %5285  ;;  %v3482_v57 = vsel %vm3226_vm13, %v6930_v58, %v4515_v47  ;;  %v4513_v19 = vadd.f32 -1.0, %v5284_v18 }
 0x42b   : > { %3660 = vrot.lane.b32.xlu0 %v3101_v25, %s5388_s25  ;;  %v3483_v48 = vsel %vm3227_vm14, %v6940_v14, %v4516_v28  ;;  %v4514_v3 = vadd.f32 -1.0, %v5286_v42  ;;  %v7781_v28 = vld [vmem:[#allocation3_spill] sm:$0xff] }
 0x42c   : > { %4181 = vst.msk [vmem:[%s7224_s27 + $0x60] sm:$0xf] %vm4156_vm15, %v4640_v23  ;;  %v3480_v29 = vsel %vm3224_vm0, %v6934_v54, %v4513_v19  ;;  %v3338_v42 = vmul.f32 1.442695, %v7781_v28  ;;  %v7783_v19 = vld [vmem:[#allocation4_spill] sm:$0xff]  ;;  %vm3235_vm8 = vcmp.gt.f32.partialorder %v7781_v28, 0.0 }
 0x42d   : > { %3662 = vrot.lane.b32.xlu1 %v3104_v1, %s5388_s25  ;;  %v3481_v56 = vsel %vm3225_vm1, %v6945_v61, %v4514_v3  ;;  %vm3233_vm10 = vcmp.gt.f32.partialorder %v7783_v19, 0.0 }
 0x43a   : > { %v3641_v8 = vpop.permute.xlu0 %3640 }
 0x43b   : > { %v3802_v59 = vmul.f32 %v3641_v8, %v6930_v58 }
 0x43c   : > { %v3643_v45 = vpop.permute.xlu1 %3642 }
 0x43d   : > { %v3866_v13 = vsel %vm1443_vm4, %v3482_v57, %v3802_v59  ;;  %v3803_v34 = vmul.f32 %v3643_v45, %v6940_v14 }
 0x43e   : > { %v4646_v32 = vpack.c.bf16 %v3866_v13, %v3866_v13  ;;  %v3637_v27 = vpop.permute.xlu0 %3636  ;;  %v3334_v13 = vmul.f32 1.442695, %v7783_v19 }
 0x43f   : > { %v3867_v46 = vsel %vm1443_vm4, %v3483_v48, %v3803_v34  ;;  %v3800_v58 = vmul.f32 %v3637_v27, %v6934_v54  ;;  %v3328_v54 = vmul.f32 1.442695, %v6975_v7 }
 0x440   : > { %4187 = vst.msk [vmem:[%s7224_s27 + $0x78] sm:$0xf] %vm4156_vm15, %v4646_v32  ;;  %v4647_v11 = vpack.c.bf16 %v3867_v46, %v3867_v46  ;;  %v3639_v12 = vpop.permute.xlu1 %3638 }
 0x441   : > { %v3864_v9 = vsel %vm1443_vm4, %v3480_v29, %v3800_v58  ;;  %v3801_v14 = vmul.f32 %v3639_v12, %v6945_v61  ;;  %5287 = vpow2.f32 %v3328_v54  ;;  %v3324_v61 = vmul.f32 1.442695, %v6980_v21 }
 0x442   : > { %4188 = vst.msk [vmem:[%s7224_s27 + $0x7c] sm:$0xf] %vm4156_vm15, %v4647_v11  ;;  %v4644_v38 = vpack.c.bf16 %v3864_v9, %v3864_v9  ;;  %5289 = vpow2.f32 %v3330_v37 }
 0x443   : > { %v3865_v30 = vsel %vm1443_vm4, %v3481_v56, %v3801_v14  ;;  %5291 = vpow2.f32 %v3324_v61 }
 0x444   : > { %4185 = vst.msk [vmem:[%s7224_s27 + $0x70] sm:$0xf] %vm4156_vm15, %v4644_v38  ;;  %v4645_v17 = vpack.c.bf16 %v3865_v30, %v3865_v30  ;;  %5293 = vpow2.f32 %v3326_v49 }
 0x446   : > { %4186 = vst.msk [vmem:[%s7224_s27 + $0x74] sm:$0xf] %vm4156_vm15, %v4645_v17  ;;  %v4869_v16 = vpop.f32.mrb[44].mxu1 }
 0x447   : > { %3672 = vrot.lane.b32.xlu0 %v4869_v16, %s5388_s25  ;;  %v3117_v52 = vpop.f32.mrb[45].mxu1 }
 0x448   : > { %v4870_v63 = vpop.f32.mrb[46].mxu1 }
 0x449   : > { %3674 = vrot.lane.b32.xlu1 %v4870_v63, %s5388_s25  ;;  %v3120_v53 = vpop.f32.mrb[47].mxu1 }
 0x44b   : > { %3668 = vrot.lane.b32.xlu0 %v3117_v52, %s5388_s25  ;;  %v5288_v22 = vpop.eup %5287 }
 0x44c   : > { %v5290_v20 = vpop.eup %5289  ;;  %v4519_v0 = vadd.f32 -1.0, %v5288_v22 }
 0x44d   : > { %3670 = vrot.lane.b32.xlu1 %v3120_v53, %s5388_s25  ;;  %v5292_v44 = vpop.eup %5291  ;;  %v4520_v43 = vadd.f32 -1.0, %v5290_v20 }
 0x44e   : > { %v5294_v24 = vpop.eup %5293  ;;  %v3486_v35 = vsel %vm3230_vm2, %v6975_v7, %v4519_v0  ;;  %v4517_v2 = vadd.f32 -1.0, %v5292_v44  ;;  %v7784_v44 = vld [vmem:[#allocation5_spill] sm:$0xff] }
 0x44f   : > { %v3487_v15 = vsel %vm3231_vm3, %v6986_v55, %v4520_v43  ;;  %v4518_v62 = vadd.f32 -1.0, %v5294_v24  ;;  %vm3238_vm11 = vcmp.gt.f32.partialorder %v7784_v44, 0.0 }
 0x450   : > { %v3484_v1 = vsel %vm3228_vm5, %v6980_v21, %v4517_v2 }
 0x451   : > { %v3485_v50 = vsel %vm3229_vm6, %v6992_v40, %v4518_v62 }
 0x459   : > { %v3649_v5 = vpop.permute.xlu0 %3648 }
 0x45a   : > { %v3806_v26 = vmul.f32 %v3649_v5, %v6975_v7  ;;  %v3344_v5 = vmul.f32 1.442695, %v7784_v44 }
 0x45b   : > { %v3651_v51 = vpop.permute.xlu1 %3650 }
 0x45c   : > { %v3870_v6 = vsel %vm1443_vm4, %v3486_v35, %v3806_v26  ;;  %v3807_v10 = vmul.f32 %v3651_v51, %v6986_v55  ;;  %v7785_v26 = vld [vmem:[#allocation7_spill] sm:$0xff] }
 0x45d   : > { %v4650_v25 = vpack.c.bf16 %v3870_v6, %v3870_v6  ;;  %v3645_v4 = vpop.permute.xlu0 %3644  ;;  %v3346_v35 = vmul.f32 1.442695, %v7785_v26  ;;  %v7786_v6 = vld [vmem:[#allocation6_spill] sm:$0xff]  ;;  %vm3239_vm12 = vcmp.gt.f32.partialorder %v7785_v26, 0.0 }
 0x45e   : > { %v3871_v41 = vsel %vm1443_vm4, %v3487_v15, %v3807_v10  ;;  %v3804_v7 = vmul.f32 %v3645_v4, %v6980_v21  ;;  %v3336_v21 = vmul.f32 1.442695, %v7016_v31  ;;  %v3340_v10 = vmul.f32 1.442695, %v7786_v6 }
 0x45f   : > { %4191 = vst.msk [vmem:[%s7224_s27 + $0x88] sm:$0xf] %vm4156_vm15, %v4650_v25  ;;  %v4651_v60 = vpack.c.bf16 %v3871_v41, %v3871_v41  ;;  %v3647_v39 = vpop.permute.xlu1 %3646  ;;  %v7787_v25 = vld [vmem:[#allocation8_spill] sm:$0xff]  ;;  %vm3236_vm13 = vcmp.gt.f32.partialorder %v7786_v6, 0.0 }
 0x460   : > { %v3868_v23 = vsel %vm1443_vm4, %v3484_v1, %v3804_v7  ;;  %v3805_v55 = vmul.f32 %v3647_v39, %v6992_v40  ;;  %5295 = vpow2.f32 %v3336_v21  ;;  %v7782_v40 = vld [vmem:[#allocation2_spill] sm:$0xff]  ;;  %v3342_v15 = vmul.f32 1.442695, %v7787_v25 }
 0x461   : > { %4192 = vst.msk [vmem:[%s7224_s27 + $0x8c] sm:$0xf] %vm4156_vm15, %v4651_v60  ;;  %v4648_v36 = vpack.c.bf16 %v3868_v23, %v3868_v23  ;;  %v3332_v45 = vmul.f32 1.442695, %v7782_v40  ;;  %5297 = vpow2.f32 %v3338_v42  ;;  %vm3232_vm9 = vcmp.gt.f32.partialorder %v7782_v40, 0.0 }
 0x462   : > { %v3869_v33 = vsel %vm1443_vm4, %v3485_v50, %v3805_v55  ;;  %vm3237_vm14 = vcmp.gt.f32.partialorder %v7787_v25, 0.0 }
 0x463   : > { %4189 = vst.msk [vmem:[%s7224_s27 + $0x80] sm:$0xf] %vm4156_vm15, %v4648_v36  ;;  %v4649_v47 = vpack.c.bf16 %v3869_v33, %v3869_v33  ;;  %5299 = vpow2.f32 %v3332_v45 }
 0x464   : > { %5301 = vpow2.f32 %v3334_v13 }
 0x465   : > { %4190 = vst.msk [vmem:[%s7224_s27 + $0x84] sm:$0xf] %vm4156_vm15, %v4649_v47  ;;  %5303 = vpow2.f32 %v3344_v5 }
 0x466   : > { %v4873_v18 = vpop.f32.mrb[48].mxu1  ;;  %5305 = vpow2.f32 %v3346_v35 }
 0x467   : > { %3680 = vrot.lane.b32.xlu0 %v4873_v18, %s5388_s25  ;;  %v3133_v8 = vpop.f32.mrb[49].mxu1  ;;  %5307 = vpow2.f32 %v3340_v10 }
 0x468   : > { %v4874_v59 = vpop.f32.mrb[50].mxu1  ;;  %5309 = vpow2.f32 %v3342_v15 }
 0x469   : > { %3682 = vrot.lane.b32.xlu1 %v4874_v59, %s5388_s25  ;;  %v3136_v57 = vpop.f32.mrb[51].mxu1 }
 0x46a   : > { %v5296_v34 = vpop.eup %5295 }
 0x46b   : > { %3676 = vrot.lane.b32.xlu0 %v3133_v8, %s5388_s25  ;;  %v5298_v32 = vpop.eup %5297  ;;  %v4523_v48 = vadd.f32 -1.0, %v5296_v34 }
 0x46c   : > { %v4524_v46 = vadd.f32 -1.0, %v5298_v32 }
 0x46d   : > { %3678 = vrot.lane.b32.xlu1 %v3136_v57, %s5388_s25  ;;  %v5300_v27 = vpop.eup %5299  ;;  %v3490_v29 = vsel %vm3234_vm7, %v7016_v31, %v4523_v48 }
 0x46e   : > { %v5302_v58 = vpop.eup %5301  ;;  %v4521_v9 = vadd.f32 -1.0, %v5300_v27  ;;  %v3491_v30 = vsel %vm3235_vm8, %v7781_v28, %v4524_v46 }
 0x46f   : > { %v4522_v54 = vadd.f32 -1.0, %v5302_v58  ;;  %v5304_v4 = vpop.eup %5303 }
 0x470   : > { %v3488_v37 = vsel %vm3232_vm9, %v7782_v40, %v4521_v9  ;;  %v5306_v62 = vpop.eup %5305  ;;  %v4527_v41 = vadd.f32 -1.0, %v5304_v4 }
 0x471   : > { %v3489_v22 = vsel %vm3233_vm10, %v7783_v19, %v4522_v54  ;;  %v5308_v7 = vpop.eup %5307  ;;  %v4528_v1 = vadd.f32 -1.0, %v5306_v62 }
 0x472   : > { %v5310_v39 = vpop.eup %5309  ;;  %v3494_v55 = vsel %vm3238_vm11, %v7784_v44, %v4527_v41  ;;  %v4525_v50 = vadd.f32 -1.0, %v5308_v7 }
 0x473   : > { %v3495_v18 = vsel %vm3239_vm12, %v7785_v26, %v4528_v1 }
 0x479   : > { %v3657_v3 = vpop.permute.xlu0 %3656 }
 0x47a   : > { %v3810_v11 = vmul.f32 %v3657_v3, %v7016_v31  ;;  %v7788_v3 = vld [vmem:[#allocation9_spill] sm:$0xff] }
 0x47b   : > { %v3659_v12 = vpop.permute.xlu1 %3658  ;;  %v3352_v46 = vmul.f32 1.442695, %v7788_v3  ;;  %vm3242_vm0 = vcmp.gt.f32.partialorder %v7788_v3, 0.0 }
 0x47c   : > { %v3874_v14 = vsel %vm1443_vm4, %v3490_v29, %v3810_v11  ;;  %v3811_v38 = vmul.f32 %v3659_v12, %v7781_v28  ;;  %v4526_v28 = vadd.f32 -1.0, %v5310_v39  ;;  %v7789_v29 = vld [vmem:[#allocation11_spill] sm:$0xff] }
 0x47d   : > { %v4654_v56 = vpack.c.bf16 %v3874_v14, %v3874_v14  ;;  %v3653_v17 = vpop.permute.xlu0 %3652  ;;  %v3354_v12 = vmul.f32 1.442695, %v7789_v29  ;;  %5311 = vpow2.f32 %v3352_v46  ;;  %vm3243_vm1 = vcmp.gt.f32.partialorder %v7789_v29, 0.0 }
 0x47e   : > { %v3875_v16 = vsel %vm1443_vm4, %v3491_v30, %v3811_v38  ;;  %v3808_v31 = vmul.f32 %v3653_v17, %v7782_v40  ;;  %v3492_v40 = vsel %vm3236_vm13, %v7786_v6, %v4525_v50  ;;  %v3493_v32 = vsel %vm3237_vm14, %v7787_v25, %v4526_v28  ;;  %v7790_v38 = vld [vmem:[#allocation10_spill] sm:$0xff]  ;;  %v7791_v30 = vld [vmem:[#allocation12_spill] sm:$0xff]  ;;  %v7793_v50 = vld [vmem:[#allocation15_spill] sm:$0xff] }
 0x47f   : > { %4195 = vst.msk [vmem:[%s7224_s27 + $0x98] sm:$0xf] %vm4156_vm15, %v4654_v56  ;;  %v4655_v52 = vpack.c.bf16 %v3875_v16, %v3875_v16  ;;  %v3655_v63 = vpop.permute.xlu1 %3654  ;;  %v3348_v56 = vmul.f32 1.442695, %v7790_v38  ;;  %5313 = vpow2.f32 %v3354_v12  ;;  %v3350_v17 = vmul.f32 1.442695, %v7791_v30 }
 0x480   : > { %v3872_v53 = vsel %vm1443_vm4, %v3488_v37, %v3808_v31  ;;  %v3809_v61 = vmul.f32 %v3655_v63, %v7783_v19  ;;  %vm3240_vm2 = vcmp.gt.f32.partialorder %v7790_v38, 0.0  ;;  %vm3241_vm3 = vcmp.gt.f32.partialorder %v7791_v30, 0.0 }
 0x481   : > { %4196 = vst.msk [vmem:[%s7224_s27 + $0x9c] sm:$0xf] %vm4156_vm15, %v4655_v52  ;;  %v4652_v49 = vpack.c.bf16 %v3872_v53, %v3872_v53  ;;  %5315 = vpow2.f32 %v3348_v56  ;;  %vm3247_vm6 = vcmp.gt.f32.partialorder %v7793_v50, 0.0 }
 0x482   : > { %v3873_v20 = vsel %vm1443_vm4, %v3489_v22, %v3809_v61  ;;  %5317 = vpow2.f32 %v3350_v17 }
 0x483   : > { %4193 = vst.msk [vmem:[%s7224_s27 + $0x90] sm:$0xf] %vm4156_vm15, %v4652_v49  ;;  %v4653_v0 = vpack.c.bf16 %v3873_v20, %v3873_v20 }
 0x485   : > { %4194 = vst.msk [vmem:[%s7224_s27 + $0x94] sm:$0xf] %vm4156_vm15, %v4653_v0 }
 0x486   : > { %v4877_v43 = vpop.f32.mrb[52].mxu1 }
 0x487   : > { %3688 = vrot.lane.b32.xlu0 %v4877_v43, %s5388_s25  ;;  %v3149_v24 = vpop.f32.mrb[53].mxu1  ;;  %v5312_v54 = vpop.eup %5311 }
 0x488   : > { %v4878_v51 = vpop.f32.mrb[54].mxu1  ;;  %v4531_v31 = vadd.f32 -1.0, %v5312_v54 }
 0x489   : > { %3690 = vrot.lane.b32.xlu1 %v4878_v51, %s5388_s25  ;;  %v3152_v2 = vpop.f32.mrb[55].mxu1  ;;  %v5314_v16 = vpop.eup %5313 }
 0x48a   : > { %v4532_v63 = vadd.f32 -1.0, %v5314_v16  ;;  %v3498_v49 = vsel %vm3242_vm0, %v7788_v3, %v4531_v31 }
 0x48b   : > { %3684 = vrot.lane.b32.xlu0 %v3149_v24, %s5388_s25  ;;  %v5316_v52 = vpop.eup %5315 }
 0x48c   : > { %v5318_v53 = vpop.eup %5317  ;;  %v4529_v20 = vadd.f32 -1.0, %v5316_v52  ;;  %v3499_v43 = vsel %vm3243_vm1, %v7789_v29, %v4532_v63 }
 0x48d   : > { %3686 = vrot.lane.b32.xlu1 %v3152_v2, %s5388_s25 }
 0x499   : > { %v3665_v60 = vpop.permute.xlu0 %3664 }
 0x49a   : > { %v3814_v23 = vmul.f32 %v3665_v60, %v7784_v44 }
 0x49b   : > { %v3667_v36 = vpop.permute.xlu1 %3666 }
 0x49c   : > { %v3878_v33 = vsel %vm1443_vm4, %v3494_v55, %v3814_v23  ;;  %v3815_v47 = vmul.f32 %v3667_v36, %v7785_v26  ;;  %v4530_v26 = vadd.f32 -1.0, %v5318_v53  ;;  %v7792_v23 = vld [vmem:[#allocation13_spill] sm:$0xff]  ;;  %v7797_v53 = vld [vmem:[#allocation19_spill] sm:$0xff] }
 0x49d   : > { %v4658_v21 = vpack.c.bf16 %v3878_v33, %v3878_v33  ;;  %v3661_v8 = vpop.permute.xlu0 %3660  ;;  %v3360_v55 = vmul.f32 1.442695, %v7792_v23  ;;  %v3362_v33 = vmul.f32 1.442695, %v7793_v50  ;;  %vm3246_vm5 = vcmp.gt.f32.partialorder %v7792_v23, 0.0 }
 0x49e   : > { %v3879_v42 = vsel %vm1443_vm4, %v3495_v18, %v3815_v47  ;;  %v3812_v59 = vmul.f32 %v3661_v8, %v7786_v6  ;;  %v3496_v6 = vsel %vm3240_vm2, %v7790_v38, %v4529_v20  ;;  %v3497_v62 = vsel %vm3241_vm3, %v7791_v30, %v4530_v26  ;;  %v7794_v47 = vld [vmem:[#allocation14_spill] sm:$0xff]  ;;  %v7795_v18 = vld [vmem:[#allocation16_spill] sm:$0xff] }
 0x49f   : > { %4199 = vst.msk [vmem:[%s7224_s27 + $0xa8] sm:$0xf] %vm4156_vm15, %v4658_v21  ;;  %v4659_v57 = vpack.c.bf16 %v3879_v42, %v3879_v42  ;;  %v3663_v45 = vpop.permute.xlu1 %3662  ;;  %5319 = vpow2.f32 %v3360_v55  ;;  %v3356_v21 = vmul.f32 1.442695, %v7794_v47  ;;  %v3358_v8 = vmul.f32 1.442695, %v7795_v18 }
 0x4a0   : > { %v3876_v19 = vsel %vm1443_vm4, %v3492_v40, %v3812_v59  ;;  %v3813_v13 = vmul.f32 %v3663_v45, %v7787_v25  ;;  %5321 = vpow2.f32 %v3362_v33  ;;  %vm3244_vm7 = vcmp.gt.f32.partialorder %v7794_v47, 0.0  ;;  %v7799_v20 = vld [vmem:[#allocation20_spill] sm:$0xff] }
 0x4a1   : > { %4200 = vst.msk [vmem:[%s7224_s27 + $0xac] sm:$0xf] %vm4156_vm15, %v4659_v57  ;;  %v4656_v34 = vpack.c.bf16 %v3876_v19, %v3876_v19  ;;  %5323 = vpow2.f32 %v3356_v21  ;;  %vm3245_vm8 = vcmp.gt.f32.partialorder %v7795_v18, 0.0  ;;  %vm3251_vm10 = vcmp.gt.f32.partialorder %v7797_v53, 0.0 }
 0x4a2   : > { %v3877_v48 = vsel %vm1443_vm4, %v3493_v32, %v3813_v13  ;;  %5325 = vpow2.f32 %v3358_v8  ;;  %vm3249_vm12 = vcmp.gt.f32.partialorder %v7799_v20, 0.0 }
 0x4a3   : > { %4197 = vst.msk [vmem:[%s7224_s27 + $0xa0] sm:$0xf] %vm4156_vm15, %v4656_v34  ;;  %v4657_v27 = vpack.c.bf16 %v3877_v48, %v3877_v48 }
 0x4a5   : > { %4198 = vst.msk [vmem:[%s7224_s27 + $0xa4] sm:$0xf] %vm4156_vm15, %v4657_v27 }
 0x4a7   : > { %v4881_v58 = vpop.f32.mrb[56].mxu1 }
 0x4a8   : > { %3696 = vrot.lane.b32.xlu0 %v4881_v58, %s5388_s25  ;;  %v3165_v11 = vpop.f32.mrb[57].mxu1 }
 0x4a9   : > { %v4882_v9 = vpop.f32.mrb[58].mxu1  ;;  %v5320_v28 = vpop.eup %5319 }
 0x4aa   : > { %3698 = vrot.lane.b32.xlu1 %v4882_v9, %s5388_s25  ;;  %v3168_v14 = vpop.f32.mrb[59].mxu1  ;;  %v5322_v42 = vpop.eup %5321  ;;  %v4535_v59 = vadd.f32 -1.0, %v5320_v28  ;;  %v7800_v28 = vld [vmem:[#allocation21_spill] sm:$0xff] }
 0x4ab   : > { %v5324_v57 = vpop.eup %5323  ;;  %v4536_v45 = vadd.f32 -1.0, %v5322_v42  ;;  %v3376_v42 = vmul.f32 1.442695, %v7800_v28  ;;  %vm3254_vm13 = vcmp.gt.f32.partialorder %v7800_v28, 0.0 }
 0x4ac   : > { %3692 = vrot.lane.b32.xlu0 %v3165_v11, %s5388_s25  ;;  %v5326_v19 = vpop.eup %5325  ;;  %v3502_v34 = vsel %vm3246_vm5, %v7792_v23, %v4535_v59  ;;  %v4533_v48 = vadd.f32 -1.0, %v5324_v57  ;;  %v7801_v59 = vld [vmem:[#allocation23_spill] sm:$0xff] }
 0x4ad   : > { %v3503_v58 = vsel %vm3247_vm6, %v7793_v50, %v4536_v45  ;;  %v3378_v57 = vmul.f32 1.442695, %v7801_v59  ;;  %vm3255_vm14 = vcmp.gt.f32.partialorder %v7801_v59, 0.0 }
 0x4ae   : > { %3694 = vrot.lane.b32.xlu1 %v3168_v14, %s5388_s25 }
 0x4b9   : > { %v3673_v37 = vpop.permute.xlu0 %3672 }
 0x4ba   : > { %v3818_v61 = vmul.f32 %v3673_v37, %v7788_v3  ;;  %v7796_v37 = vld [vmem:[#allocation17_spill] sm:$0xff] }
 0x4bb   : > { %v3675_v22 = vpop.permute.xlu1 %3674  ;;  %v3368_v63 = vmul.f32 1.442695, %v7796_v37  ;;  %vm3250_vm9 = vcmp.gt.f32.partialorder %v7796_v37, 0.0 }
 0x4bc   : > { %v3882_v0 = vsel %vm1443_vm4, %v3498_v49, %v3818_v61  ;;  %v3819_v44 = vmul.f32 %v3675_v22, %v7789_v29  ;;  %v4534_v29 = vadd.f32 -1.0, %v5326_v19  ;;  %v3370_v61 = vmul.f32 1.442695, %v7797_v53  ;;  %v7798_v49 = vld [vmem:[#allocation18_spill] sm:$0xff]  ;;  %v7803_v19 = vld [vmem:[#allocation24_spill] sm:$0xff] }
 0x4bd   : > { %v4662_v5 = vpack.c.bf16 %v3882_v0, %v3882_v0  ;;  %v3669_v24 = vpop.permute.xlu0 %3668  ;;  %5327 = vpow2.f32 %v3368_v63  ;;  %v3364_v22 = vmul.f32 1.442695, %v7798_v49  ;;  %v3366_v0 = vmul.f32 1.442695, %v7799_v20 }
 0x4be   : > { %v3883_v35 = vsel %vm1443_vm4, %v3499_v43, %v3819_v44  ;;  %v3816_v51 = vmul.f32 %v3669_v24, %v7790_v38  ;;  %v3500_v38 = vsel %vm3244_vm7, %v7794_v47, %v4533_v48  ;;  %v3501_v16 = vsel %vm3245_vm8, %v7795_v18, %v4534_v29 }
 0x4bf   : > { %4203 = vst.msk [vmem:[%s7224_s27 + $0xb8] sm:$0xf] %vm4156_vm15, %v4662_v5  ;;  %v4663_v2 = vpack.c.bf16 %v3883_v35, %v3883_v35  ;;  %v3671_v10 = vpop.permute.xlu1 %3670  ;;  %5329 = vpow2.f32 %v3370_v61  ;;  %vm3248_vm11 = vcmp.gt.f32.partialorder %v7798_v49, 0.0  ;;  %vm3253_vm1 = vcmp.gt.f32.partialorder %v7803_v19, 0.0 }
 0x4c0   : > { %v3880_v25 = vsel %vm1443_vm4, %v3496_v6, %v3816_v51  ;;  %v3817_v15 = vmul.f32 %v3671_v10, %v7791_v30  ;;  %5331 = vpow2.f32 %v3364_v22 }
 0x4c1   : > { %4204 = vst.msk [vmem:[%s7224_s27 + $0xbc] sm:$0xf] %vm4156_vm15, %v4663_v2  ;;  %v4660_v4 = vpack.c.bf16 %v3880_v25, %v3880_v25  ;;  %5333 = vpow2.f32 %v3366_v0 }
 0x4c2   : > { %v3881_v41 = vsel %vm1443_vm4, %v3497_v62, %v3817_v15  ;;  %5335 = vpow2.f32 %v3376_v42 }
 0x4c3   : > { %4201 = vst.msk [vmem:[%s7224_s27 + $0xb0] sm:$0xf] %vm4156_vm15, %v4660_v4  ;;  %v4661_v7 = vpack.c.bf16 %v3881_v41, %v3881_v41  ;;  %v4885_v60 = vpop.f32.mrb[60].mxu1  ;;  %5337 = vpow2.f32 %v3378_v57 }
 0x4c4   : > { %v3181_v1 = vpop.f32.mrb[61].mxu1 }
 0x4c5   : > { %4202 = vst.msk [vmem:[%s7224_s27 + $0xb4] sm:$0xf] %vm4156_vm15, %v4661_v7  ;;  %3700 = vrot.lane.b32.xlu0 %v3181_v1, %s5388_s25  ;;  %v4886_v39 = vpop.f32.mrb[62].mxu1 }
 0x4c6   : > { %v3184_v36 = vpop.f32.mrb[63].mxu1 }
 0x4c7   : > { %3702 = vrot.lane.b32.xlu1 %v3184_v36, %s5388_s25  ;;  %v5328_v44 = vpop.eup %5327 }
 0x4c8   : > { %v4539_v43 = vadd.f32 -1.0, %v5328_v44  ;;  %v7804_v44 = vld [vmem:[#allocation26_spill] sm:$0xff] }
 0x4c9   : > { %3704 = vrot.lane.b32.xlu0 %v4885_v60, %s5388_s25  ;;  %v5330_v5 = vpop.eup %5329  ;;  %vm3256_vm2 = vcmp.gt.f32.partialorder %v7804_v44, 0.0 }
 0x4ca   : > { %v5332_v24 = vpop.eup %5331  ;;  %v4540_v35 = vadd.f32 -1.0, %v5330_v5  ;;  %v3506_v6 = vsel %vm3250_vm9, %v7796_v37, %v4539_v43  ;;  %v3380_v5 = vmul.f32 1.442695, %v7804_v44  ;;  %v7805_v43 = vld [vmem:[#allocation28_spill] sm:$0xff] }
 0x4cb   : > { %3706 = vrot.lane.b32.xlu1 %v4886_v39, %s5388_s25  ;;  %v5334_v51 = vpop.eup %5333  ;;  %v4537_v25 = vadd.f32 -1.0, %v5332_v24  ;;  %v3382_v24 = vmul.f32 1.442695, %v7805_v43  ;;  %vm3257_vm3 = vcmp.gt.f32.partialorder %v7805_v43, 0.0 }
 0x4cc   : > { %v3507_v41 = vsel %vm3251_vm10, %v7797_v53, %v4540_v35  ;;  %v4538_v60 = vadd.f32 -1.0, %v5334_v51  ;;  %v7807_v51 = vld [vmem:[#allocation27_spill] sm:$0xff] }
 0x4cd   : > { %v3504_v55 = vsel %vm3248_vm11, %v7798_v49, %v4537_v25  ;;  %vm3259_vm6 = vcmp.gt.f32.partialorder %v7807_v51, 0.0 }
 0x4ce   : > { %v3505_v21 = vsel %vm3249_vm12, %v7799_v20, %v4538_v60 }
 0x4d9   : > { %v3681_v40 = vpop.permute.xlu0 %3680 }
 0x4da   : > { %v3822_v13 = vmul.f32 %v3681_v40, %v7792_v23  ;;  %v7802_v40 = vld [vmem:[#allocation22_spill] sm:$0xff] }
 0x4db   : > { %v3683_v32 = vpop.permute.xlu1 %3682  ;;  %v3372_v45 = vmul.f32 1.442695, %v7802_v40  ;;  %vm3252_vm0 = vcmp.gt.f32.partialorder %v7802_v40, 0.0 }
 0x4dc   : > { %v3886_v27 = vsel %vm1443_vm4, %v3502_v34, %v3822_v13  ;;  %v3823_v3 = vmul.f32 %v3683_v32, %v7793_v50  ;;  %v3374_v13 = vmul.f32 1.442695, %v7803_v19  ;;  %v5336_v34 = vpop.eup %5335 }
 0x4dd   : > { %v4666_v46 = vpack.c.bf16 %v3886_v27, %v3886_v27  ;;  %v3677_v11 = vpop.permute.xlu0 %3676  ;;  %5339 = vpow2.f32 %v3372_v45  ;;  %v5338_v32 = vpop.eup %5337  ;;  %v4543_v48 = vadd.f32 -1.0, %v5336_v34 }
 0x4de   : > { %v3887_v12 = vsel %vm1443_vm4, %v3503_v58, %v3823_v3  ;;  %v3820_v9 = vmul.f32 %v3677_v11, %v7794_v47  ;;  %5341 = vpow2.f32 %v3374_v13 }
 0x4df   : > { %4207 = vst.msk [vmem:[%s7224_s27 + $0xc8] sm:$0xf] %vm4156_vm15, %v4666_v46  ;;  %v4667_v14 = vpack.c.bf16 %v3887_v12, %v3887_v12  ;;  %v3679_v56 = vpop.permute.xlu1 %3678  ;;  %v4544_v46 = vadd.f32 -1.0, %v5338_v32  ;;  %v3510_v29 = vsel %vm3254_vm13, %v7800_v28, %v4543_v48  ;;  %5343 = vpow2.f32 %v3380_v5 }
 0x4e0   : > { %v3884_v30 = vsel %vm1443_vm4, %v3500_v38, %v3820_v9  ;;  %v3821_v17 = vmul.f32 %v3679_v56, %v7795_v18  ;;  %5345 = vpow2.f32 %v3382_v24 }
 0x4e1   : > { %4208 = vst.msk [vmem:[%s7224_s27 + $0xcc] sm:$0xf] %vm4156_vm15, %v4667_v14  ;;  %v4664_v54 = vpack.c.bf16 %v3884_v30, %v3884_v30  ;;  %v3511_v30 = vsel %vm3255_vm14, %v7801_v59, %v4544_v46 }
 0x4e2   : > { %v3885_v31 = vsel %vm1443_vm4, %v3501_v16, %v3821_v17 }
 0x4e3   : > { %4205 = vst.msk [vmem:[%s7224_s27 + $0xc0] sm:$0xf] %vm4156_vm15, %v4664_v54  ;;  %v4665_v52 = vpack.c.bf16 %v3885_v31, %v3885_v31 }
 0x4e5   : > { %4206 = vst.msk [vmem:[%s7224_s27 + $0xc4] sm:$0xf] %vm4156_vm15, %v4665_v52 }
 0x4e7   : > { %v5340_v27 = vpop.eup %5339 }
 0x4e8   : > { %v5342_v58 = vpop.eup %5341  ;;  %v4541_v9 = vadd.f32 -1.0, %v5340_v27 }
 0x4e9   : > { %v4542_v54 = vadd.f32 -1.0, %v5342_v58 }
 0x4eb   : > { %v3509_v22 = vsel %vm3253_vm1, %v7803_v19, %v4542_v54 }
 0x4f9   : > { %v3689_v26 = vpop.permute.xlu0 %3688 }
 0x4fa   : > { %v3826_v2 = vmul.f32 %v3689_v26, %v7796_v37  ;;  %v3508_v37 = vsel %vm3252_vm0, %v7802_v40, %v4541_v9  ;;  %v7806_v26 = vld [vmem:[#allocation25_spill] sm:$0xff] }
 0x4fb   : > { %v3691_v10 = vpop.permute.xlu1 %3690  ;;  %v3384_v35 = vmul.f32 1.442695, %v7806_v26  ;;  %vm3258_vm5 = vcmp.gt.f32.partialorder %v7806_v26, 0.0 }
 0x4fc   : > { %v3890_v15 = vsel %vm1443_vm4, %v3506_v6, %v3826_v2  ;;  %v3827_v4 = vmul.f32 %v3691_v10, %v7797_v53  ;;  %v3386_v2 = vmul.f32 1.442695, %v7807_v51  ;;  %v5344_v6 = vpop.eup %5343 }
 0x4fd   : > { %v4670_v62 = vpack.c.bf16 %v3890_v15, %v3890_v15  ;;  %v3685_v7 = vpop.permute.xlu0 %3684  ;;  %5347 = vpow2.f32 %v3384_v35  ;;  %v5346_v10 = vpop.eup %5345  ;;  %v4545_v25 = vadd.f32 -1.0, %v5344_v6 }
 0x4fe   : > { %v3891_v1 = vsel %vm1443_vm4, %v3507_v41, %v3827_v4  ;;  %v3824_v39 = vmul.f32 %v3685_v7, %v7798_v49  ;;  %5349 = vpow2.f32 %v3386_v2 }
 0x4ff   : > { %4211 = vst.msk [vmem:[%s7224_s27 + $0xd8] sm:$0xf] %vm4156_vm15, %v4670_v62  ;;  %v4671_v23 = vpack.c.bf16 %v3891_v1, %v3891_v1  ;;  %v3687_v36 = vpop.permute.xlu1 %3686  ;;  %v4546_v62 = vadd.f32 -1.0, %v5346_v10  ;;  %v3512_v60 = vsel %vm3256_vm2, %v7804_v44, %v4545_v25 }
 0x500   : > { %v3888_v50 = vsel %vm1443_vm4, %v3504_v55, %v3824_v39  ;;  %v3825_v33 = vmul.f32 %v3687_v36, %v7799_v20 }
 0x501   : > { %4212 = vst.msk [vmem:[%s7224_s27 + $0xdc] sm:$0xf] %vm4156_vm15, %v4671_v23  ;;  %v4668_v47 = vpack.c.bf16 %v3888_v50, %v3888_v50  ;;  %v3513_v50 = vsel %vm3257_vm3, %v7805_v43, %v4546_v62 }
 0x502   : > { %v3889_v18 = vsel %vm1443_vm4, %v3505_v21, %v3825_v33 }
 0x503   : > { %4209 = vst.msk [vmem:[%s7224_s27 + $0xd0] sm:$0xf] %vm4156_vm15, %v4668_v47  ;;  %v4669_v8 = vpack.c.bf16 %v3889_v18, %v3889_v18 }
 0x505   : > { %4210 = vst.msk [vmem:[%s7224_s27 + $0xd4] sm:$0xf] %vm4156_vm15, %v4669_v8 }
 0x507   : > { %v5348_v15 = vpop.eup %5347 }
 0x508   : > { %v5350_v41 = vpop.eup %5349  ;;  %v4547_v39 = vadd.f32 -1.0, %v5348_v15 }
 0x509   : > { %v4548_v47 = vadd.f32 -1.0, %v5350_v41 }
 0x50b   : > { %v3515_v45 = vsel %vm3259_vm6, %v7807_v51, %v4548_v47 }
 0x51a   : > { %v3697_v3 = vpop.permute.xlu0 %3696 }
 0x51b   : > { %v3830_v11 = vmul.f32 %v3697_v3, %v7800_v28  ;;  %v3514_v28 = vsel %vm3258_vm5, %v7806_v26, %v4547_v39 }
 0x51c   : > { %v3699_v12 = vpop.permute.xlu1 %3698 }
 0x51d   : > { %v3894_v14 = vsel %vm1443_vm4, %v3510_v29, %v3830_v11  ;;  %v3831_v38 = vmul.f32 %v3699_v12, %v7801_v59 }
 0x51e   : > { %v4674_v56 = vpack.c.bf16 %v3894_v14, %v3894_v14  ;;  %v3693_v17 = vpop.permute.xlu0 %3692 }
 0x51f   : > { %v3895_v16 = vsel %vm1443_vm4, %v3511_v30, %v3831_v38  ;;  %v3828_v31 = vmul.f32 %v3693_v17, %v7802_v40 }
 0x520   : > { %4215 = vst.msk [vmem:[%s7224_s27 + $0xe8] sm:$0xf] %vm4156_vm15, %v4674_v56  ;;  %v4675_v52 = vpack.c.bf16 %v3895_v16, %v3895_v16  ;;  %v3695_v63 = vpop.permute.xlu1 %3694 }
 0x521   : > { %v3892_v53 = vsel %vm1443_vm4, %v3508_v37, %v3828_v31  ;;  %v3829_v61 = vmul.f32 %v3695_v63, %v7803_v19 }
 0x522   : > { %4216 = vst.msk [vmem:[%s7224_s27 + $0xec] sm:$0xf] %vm4156_vm15, %v4675_v52  ;;  %v4672_v49 = vpack.c.bf16 %v3892_v53, %v3892_v53 }
 0x523   : > { %v3893_v20 = vsel %vm1443_vm4, %v3509_v22, %v3829_v61 }
 0x524   : > { %4213 = vst.msk [vmem:[%s7224_s27 + $0xe0] sm:$0xf] %vm4156_vm15, %v4672_v49  ;;  %v4673_v0 = vpack.c.bf16 %v3893_v20, %v3893_v20 }
 0x526   : > { %4214 = vst.msk [vmem:[%s7224_s27 + $0xe4] sm:$0xf] %vm4156_vm15, %v4673_v0 }
 0x537   : > { %v3701_v4 = vpop.permute.xlu0 %3700 }
 0x538   : > { %v3832_v7 = vmul.f32 %v3701_v4, %v7804_v44 }
 0x539   : > { %v3703_v1 = vpop.permute.xlu1 %3702 }
 0x53a   : > { %v3896_v23 = vsel %vm1443_vm4, %v3512_v60, %v3832_v7  ;;  %v3833_v55 = vmul.f32 %v3703_v1, %v7805_v43 }
 0x53b   : > { %v4676_v36 = vpack.c.bf16 %v3896_v23, %v3896_v23  ;;  %v3705_v33 = vpop.permute.xlu0 %3704 }
 0x53c   : > { %v3897_v21 = vsel %vm1443_vm4, %v3513_v50, %v3833_v55  ;;  %v3834_v18 = vmul.f32 %v3705_v33, %v7806_v26 }
 0x53d   : > { %4217 = vst.msk [vmem:[%s7224_s27 + $0xf0] sm:$0xf] %vm4156_vm15, %v4676_v36  ;;  %v4677_v8 = vpack.c.bf16 %v3897_v21, %v3897_v21  ;;  %v3707_v42 = vpop.permute.xlu1 %3706 }
 0x53e   : > { %v3898_v59 = vsel %vm1443_vm4, %v3514_v28, %v3834_v18  ;;  %v3835_v57 = vmul.f32 %v3707_v42, %v7807_v51 }
 0x53f   : > { %4218 = vst.msk [vmem:[%s7224_s27 + $0xf4] sm:$0xf] %vm4156_vm15, %v4677_v8  ;;  %v4678_v40 = vpack.c.bf16 %v3898_v59, %v3898_v59 }
 0x540   : > { %v3899_v19 = vsel %vm1443_vm4, %v3515_v45, %v3835_v57 }
 0x541   : > { %4219 = vst.msk [vmem:[%s7224_s27 + $0xf8] sm:$0xf] %vm4156_vm15, %v4678_v40  ;;  %v4679_v13 = vpack.c.bf16 %v3899_v19, %v3899_v19 }
 0x543   : > { %4220 = vst.msk [vmem:[%s7224_s27 + $0xfc] sm:$0xf] %vm4156_vm15, %v4679_v13 }
 0x544 PF: > { %s14_s17 = sadd.s32 1, %s5384_s17   ;;  %s7808_s15 = smov %s5380_s16 }
 0x545   : > { %p11_p5 = scmp.ge.s32.totalorder %s14_s17, 4   ;;  %s7809_s16 = smov %s7811_s18 }
 0x547   :  { %13 = sbr.rel (!%p11_p5) target bundleno = 2 (0x2), region = 67 }

</bundles_post_ra>
